<compile_context>
chip_gen: v6e
topology: v6e:2x2x1
jax: 0.10.0
libtpu: 0.0.40
codegen_flags: <defaults>
</compile_context>

<pallas_src>
import numpy as np
import jax
import jax.numpy as jnp
from jax.experimental import pallas as pl
from jax.experimental.pallas import tpu as pltpu


SMALL_BATCH_MAX = 64  # dispatch threshold between the two kernels


def _round_up(x, m):
    return ((x + m - 1) // m) * m


# --------------------------------------------------------------------------- #
# Host-side operator construction
# --------------------------------------------------------------------------- #
def make_H(point_num, distance, wave_length, screen_length):
    """Transfer function built in DiffractiveLayer.__init__ (already fftshift-ed)."""
    wave_num = 2 * 3.14159 / wave_length
    dx = screen_length / point_num
    # Same samples as np.arange(-1/(2*dx), 1/(2*dx), 1/screen_length) in the original
    # module, built explicitly so a float-step arange can never yield N +/- 1 samples
    # and without np.fromfunction(..., dtype=int16) index truncation.
    fx_list = (-1.0 / (2.0 * dx)) + np.arange(point_num) / screen_length
    fx2 = np.square(wave_length * fx_list)
    phi = (1.0 - (fx2[:, None] + fx2[None, :])).astype(np.complex64)
    H = np.exp(1j * wave_num * distance * np.sqrt(phi))
    return np.fft.fftshift(H, axes=(0, 1)).astype(np.complex64)


def make_sep_operators(H):
    """N x N operators for the separable small-batch path.

    A @ x == fft(fftshift(x)) along an axis and Bm @ y == ifftshift(ifft(y)), so
    out = Bm @ (H * (A @ X @ A^T)) @ Bm^T reproduces the module's forward exactly."""
    N = H.shape[0]
    eye = np.eye(N, dtype=np.complex64)
    A = np.fft.fft(np.fft.fftshift(eye, axes=0), axis=0).astype(np.complex64)
    Bm = np.fft.ifftshift(np.fft.ifft(eye, axis=0), axes=0).astype(np.complex64)

    def ri(M):  # (2, N, N) float32: [real, imag]
        return np.stack([M.real, M.imag]).astype(np.float32)

    return (ri(A), ri(A.T), ri(Bm), ri(Bm.T), ri(H))


def make_flat_operator(H):
    """Dense (N^2, N^2) operator W^T such that x_flat @ W^T equals
    ifftshift(ifft2(fft2(fftshift(x)) * H)) on the row-major-flattened field.
    Returns (Wr, Wi, Wr+Wi) for the Gauss 3-matmul complex product."""
    N = H.shape[0]
    N2 = N * N
    basis = np.eye(N2, dtype=np.complex64).reshape(N2, N, N)
    r = np.fft.fftshift(basis, axes=(1, 2))
    r = np.fft.fft2(r, axes=(1, 2))
    r = r * H[None]
    r = np.fft.ifft2(r, axes=(1, 2))
    r = np.fft.ifftshift(r, axes=(1, 2))
    # Row k of r is forward(e_k) flattened == column k of W, i.e. r_flat == W^T.
    Wt = np.ascontiguousarray(r.reshape(N2, N2))
    Wr = Wt.real.astype(np.float32)
    Wi = Wt.imag.astype(np.float32)
    return Wr, Wi, (Wr + Wi).astype(np.float32)


# --------------------------------------------------------------------------- #
# Pallas kernels
# --------------------------------------------------------------------------- #
def _sep_kernel(a_ref, at_ref, b_ref, bt_ref, h_ref, xr_ref, xi_ref, zr_ref, zi_ref):
    """Separable path: out = Bm @ (H * (A @ X @ A^T)) @ Bm^T per image (complex)."""
    Bt, N, _ = xr_ref.shape

    def bmm(lr, li, rr, ri):
        # complex batched matmul (Bt,N,N) @ (Bt,N,N), fp32 MXU accumulation
        dot = lambda a, b: jnp.einsum('bij,bjk->bik', a, b,
                                      preferred_element_type=jnp.float32)
        return dot(lr, rr) - dot(li, ri), dot(lr, ri) + dot(li, rr)

    def bcast(m_ref):
        return (jnp.broadcast_to(m_ref[0], (Bt, N, N)),
                jnp.broadcast_to(m_ref[1], (Bt, N, N)))

    xr, xi = xr_ref[...], xi_ref[...]
    ar, ai = bcast(a_ref)
    atr, ati = bcast(at_ref)
    br, bi = bcast(b_ref)
    btr, bti = bcast(bt_ref)
    hr, hi = bcast(h_ref)

    ur, ui = bmm(xr, xi, atr, ati)        # X @ A^T
    kr, ki = bmm(ar, ai, ur, ui)          # A @ (X @ A^T)
    mr = hr * kr - hi * ki                # H * K  (elementwise complex)
    mi = hr * ki + hi * kr
    vr, vi = bmm(mr, mi, btr, bti)        # M @ Bm^T
    zr, zi = bmm(br, bi, vr, vi)          # Bm @ (M @ Bm^T)
    zr_ref[...] = zr
    zi_ref[...] = zi


def _dense_kernel(wr_ref, wi_ref, ws_ref, xr_ref, xi_ref, zr_ref, zi_ref):
    """Flat-operator path: out = X @ W (complex) via the Gauss 3-matmul form."""
    xr, xi = xr_ref[...], xi_ref[...]
    t1 = jnp.dot(xr, wr_ref[...], preferred_element_type=jnp.float32)
    t2 = jnp.dot(xi, wi_ref[...], preferred_element_type=jnp.float32)
    t3 = jnp.dot(xr + xi, ws_ref[...], preferred_element_type=jnp.float32)
    zr_ref[...] = t1 - t2
    zi_ref[...] = t3 - t1 - t2


# --------------------------------------------------------------------------- #
# Wrapper
# --------------------------------------------------------------------------- #
class DiffractiveLayer:
    """Pallas TPU forward of the PyTorch DiffractiveLayer."""

    def __init__(self, point_num=32, distance=0.1, wave_length=5.32e-7,
                 screen_length=0.02):
        self.N = point_num
        self.H = make_H(point_num, distance, wave_length, screen_length)
        # Small-batch operators: ~24 KB total.
        self._sep_ops = tuple(jnp.asarray(o) for o in make_sep_operators(self.H))
        # Large-batch dense operator (3 x 4 MiB at N=32): built lazily.
        self._flat_ops = None

    # ----------------------- small-batch separable path ----------------------- #
    def _forward_separable(self, xr, xi):
        B, N = xr.shape[0], self.N
        # Small batch tiles keep the unrolled per-image matmul count (and compile
        # time) modest; the regime is HBM/latency-bound, not MXU-bound.
        block_b = min(_round_up(B, 8), 16)
        B_pad = _round_up(B, block_b)
        if B_pad != B:
            pad = ((0, B_pad - B), (0, 0), (0, 0))
            xr, xi = jnp.pad(xr, pad), jnp.pad(xi, pad)

        op_spec = pl.BlockSpec((2, N, N), lambda b: (0, 0, 0))      # constant, tiny
        x_spec = pl.BlockSpec((block_b, N, N), lambda b: (b, 0, 0))

        zr, zi = pl.pallas_call(
            _sep_kernel,
            out_shape=(jax.ShapeDtypeStruct((B_pad, N, N), jnp.float32),
                       jax.ShapeDtypeStruct((B_pad, N, N), jnp.float32)),
            grid_spec=pltpu.PrefetchScalarGridSpec(
                num_scalar_prefetch=0,
                grid=(B_pad // block_b,),
                in_specs=[op_spec] * 5 + [x_spec, x_spec],
                out_specs=[x_spec, x_spec]),
            compiler_params=pltpu.CompilerParams(
                dimension_semantics=("parallel",)),
        )(*self._sep_ops, xr, xi)
        return zr[:B], zi[:B]

    # ------------------------ large-batch dense path -------------------------- #
    def _forward_dense(self, xr, xi):
        B, N = xr.shape[0], self.N
        N2 = N * N
        if self._flat_ops is None:
            self._flat_ops = tuple(jnp.asarray(o) for o in make_flat_operator(self.H))

        xr = xr.reshape(B, N2)
        xi = xi.reshape(B, N2)
        # Feed the MXU M dimension properly: one M=128 step, not sixteen M=8 steps.
        block_b = min(_round_up(B, 8), 128)
        num_blocks = (B + block_b - 1) // block_b
        B_pad = num_blocks * block_b
        if B_pad != B:
            xr = jnp.pad(xr, ((0, B_pad - B), (0, 0)))
            xi = jnp.pad(xi, ((0, B_pad - B), (0, 0)))

        # Constant-index operator blocks: nothing to double-buffer -> single buffer
        # (12 MiB instead of 24 MiB of operator VMEM at N=32).
        mat_spec = pl.BlockSpec((N2, N2), lambda b: (0, 0),
                                pipeline_mode=pl.Buffered(1))
        vec_spec = pl.BlockSpec((block_b, N2), lambda b: (b, 0))

        # VMEM budget from actual buffer sizes: 3 single-buffered operators +
        # 4 double-buffered (block_b, N2) field tiles + internal-scratch headroom.
        # (Headroom is generous enough to also cover the operators being double-
        # buffered, and the cap keeps us under v7x's 64 MiB physical per-core VMEM.)
        op_bytes = 3 * N2 * N2 * 4
        vec_bytes = 4 * 2 * block_b * N2 * 4
        vmem_limit = min(op_bytes + vec_bytes + (16 << 20), 56 << 20)

        zr, zi = pl.pallas_call(
            _dense_kernel,
            out_shape=(jax.ShapeDtypeStruct((B_pad, N2), jnp.float32),
                       jax.ShapeDtypeStruct((B_pad, N2), jnp.float32)),
            grid_spec=pltpu.PrefetchScalarGridSpec(
                num_scalar_prefetch=0,
                grid=(num_blocks,),
                in_specs=[mat_spec, mat_spec, mat_spec, vec_spec, vec_spec],
                out_specs=[vec_spec, vec_spec]),
            compiler_params=pltpu.CompilerParams(
                dimension_semantics=("parallel",),
                vmem_limit_bytes=vmem_limit),
        )(*self._flat_ops, xr, xi)
        return zr[:B].reshape(B, N, N), zi[:B].reshape(B, N, N)

    def __call__(self, waves):
        """waves: (B, N, N) complex64 -> (B, N, N) complex64."""
        B = waves.shape[0]
        xr = jnp.real(waves).astype(jnp.float32)
        xi = jnp.imag(waves).astype(jnp.float32)
        if B <= SMALL_BATCH_MAX:
            zr, zi = self._forward_separable(xr, xi)
        else:
            zr, zi = self._forward_dense(xr, xi)
        return zr + 1j * zi


if __name__ == "__main__":
    N = 32  # img_size
    layer = DiffractiveLayer(point_num=N, distance=0.1, wave_length=5.32e-7,
                             screen_length=0.02)
    Hj = jnp.asarray(layer.H)

    def reference(waves):
        return jnp.fft.ifftshift(
            jnp.fft.ifft2(
                jnp.fft.fft2(jnp.fft.fftshift(waves, axes=(1, 2)), axes=(1, 2))
                * Hj[None], axes=(1, 2)),
            axes=(1, 2))

    key = jax.random.PRNGKey(0)

    # Small-batch (HBM-bound) separable path — the benchmark case.
    k1, k2 = jax.random.split(key)
    waves = (jax.random.normal(k1, (2, N, N), dtype=jnp.float32)
             + 1j * jax.random.normal(k2, (2, N, N), dtype=jnp.float32))
    out_small = jax.block_until_ready(layer(waves))
    assert np.allclose(np.asarray(out_small), np.asarray(reference(waves)),
                       atol=5e-3, rtol=5e-3)

    # Large-batch (MXU-bound) dense-operator path.
    k3, k4 = jax.random.split(k2)
    waves_big = (jax.random.normal(k3, (96, N, N), dtype=jnp.float32)
                 + 1j * jax.random.normal(k4, (96, N, N), dtype=jnp.float32))
    out_big = jax.block_until_ready(layer(waves_big))
    assert np.allclose(np.asarray(out_big), np.asarray(reference(waves_big)),
                       atol=5e-3, rtol=5e-3)

    print("KERNEL_OK")
</pallas_src>

<mosaic_0001>
module attributes {stable_mosaic.version = 11 : i64} {
  func.func @_sep_kernel(%arg0: i32, %arg1: memref<2x32x32xf32, #tpu.memory_space<vmem>>, %arg2: memref<2x32x32xf32, #tpu.memory_space<vmem>>, %arg3: memref<2x32x32xf32, #tpu.memory_space<vmem>>, %arg4: memref<2x32x32xf32, #tpu.memory_space<vmem>>, %arg5: memref<2x32x32xf32, #tpu.memory_space<vmem>>, %arg6: memref<8x32x32xf32, #tpu.memory_space<vmem>>, %arg7: memref<8x32x32xf32, #tpu.memory_space<vmem>>, %arg8: memref<8x32x32xf32, #tpu.memory_space<vmem>>, %arg9: memref<8x32x32xf32, #tpu.memory_space<vmem>>) attributes {dimension_semantics = [#tpu.dimension_semantics<parallel>], iteration_bounds = array<i64: 1>, scalar_prefetch = 0 : i64, scratch_operands = 0 : i64, tpu.core_type = #tpu.core_type<tc>, window_params = [{pipeline_mode = #tpu.pipeline_mode<synchronous>, transform_indices = @transform_0, window_bounds = array<i64: 2, 32, 32>}, {pipeline_mode = #tpu.pipeline_mode<synchronous>, transform_indices = @transform_1, window_bounds = array<i64: 2, 32, 32>}, {pipeline_mode = #tpu.pipeline_mode<synchronous>, transform_indices = @transform_2, window_bounds = array<i64: 2, 32, 32>}, {pipeline_mode = #tpu.pipeline_mode<synchronous>, transform_indices = @transform_3, window_bounds = array<i64: 2, 32, 32>}, {pipeline_mode = #tpu.pipeline_mode<synchronous>, transform_indices = @transform_4, window_bounds = array<i64: 2, 32, 32>}, {transform_indices = @transform_5, window_bounds = array<i64: 8, 32, 32>}, {transform_indices = @transform_6, window_bounds = array<i64: 8, 32, 32>}, {transform_indices = @transform_7, window_bounds = array<i64: 8, 32, 32>}, {transform_indices = @transform_8, window_bounds = array<i64: 8, 32, 32>}]} {
    %c0 = arith.constant 0 : index
    %c0_0 = arith.constant 0 : index
    %c0_1 = arith.constant 0 : index
    %0 = vector.load %arg6[%c0, %c0_0, %c0_1] : memref<8x32x32xf32, #tpu.memory_space<vmem>>, vector<8x32x32xf32>
    %c0_2 = arith.constant 0 : index
    %c0_3 = arith.constant 0 : index
    %c0_4 = arith.constant 0 : index
    %1 = vector.load %arg7[%c0_2, %c0_3, %c0_4] : memref<8x32x32xf32, #tpu.memory_space<vmem>>, vector<8x32x32xf32>
    %c0_5 = arith.constant 0 : index
    %c0_6 = arith.constant 0 : index
    %c0_7 = arith.constant 0 : index
    %2 = vector.load %arg1[%c0_5, %c0_6, %c0_7] : memref<2x32x32xf32, #tpu.memory_space<vmem>>, vector<1x32x32xf32>
    %3 = vector.shape_cast %2 : vector<1x32x32xf32> to vector<32x32xf32>
    %4 = vector.shape_cast %3 : vector<32x32xf32> to vector<1x32x32xf32>
    %5 = vector.broadcast %4 : vector<1x32x32xf32> to vector<8x32x32xf32>
    %c1 = arith.constant 1 : index
    %c0_8 = arith.constant 0 : index
    %c0_9 = arith.constant 0 : index
    %6 = vector.load %arg1[%c1, %c0_8, %c0_9] : memref<2x32x32xf32, #tpu.memory_space<vmem>>, vector<1x32x32xf32>
    %7 = vector.shape_cast %6 : vector<1x32x32xf32> to vector<32x32xf32>
    %8 = vector.shape_cast %7 : vector<32x32xf32> to vector<1x32x32xf32>
    %9 = vector.broadcast %8 : vector<1x32x32xf32> to vector<8x32x32xf32>
    %c0_10 = arith.constant 0 : index
    %c0_11 = arith.constant 0 : index
    %c0_12 = arith.constant 0 : index
    %10 = vector.load %arg2[%c0_10, %c0_11, %c0_12] : memref<2x32x32xf32, #tpu.memory_space<vmem>>, vector<1x32x32xf32>
    %11 = vector.shape_cast %10 : vector<1x32x32xf32> to vector<32x32xf32>
    %12 = vector.shape_cast %11 : vector<32x32xf32> to vector<1x32x32xf32>
    %13 = vector.broadcast %12 : vector<1x32x32xf32> to vector<8x32x32xf32>
    %c1_13 = arith.constant 1 : index
    %c0_14 = arith.constant 0 : index
    %c0_15 = arith.constant 0 : index
    %14 = vector.load %arg2[%c1_13, %c0_14, %c0_15] : memref<2x32x32xf32, #tpu.memory_space<vmem>>, vector<1x32x32xf32>
    %15 = vector.shape_cast %14 : vector<1x32x32xf32> to vector<32x32xf32>
    %16 = vector.shape_cast %15 : vector<32x32xf32> to vector<1x32x32xf32>
    %17 = vector.broadcast %16 : vector<1x32x32xf32> to vector<8x32x32xf32>
    %c0_16 = arith.constant 0 : index
    %c0_17 = arith.constant 0 : index
    %c0_18 = arith.constant 0 : index
    %18 = vector.load %arg3[%c0_16, %c0_17, %c0_18] : memref<2x32x32xf32, #tpu.memory_space<vmem>>, vector<1x32x32xf32>
    %19 = vector.shape_cast %18 : vector<1x32x32xf32> to vector<32x32xf32>
    %20 = vector.shape_cast %19 : vector<32x32xf32> to vector<1x32x32xf32>
    %21 = vector.broadcast %20 : vector<1x32x32xf32> to vector<8x32x32xf32>
    %c1_19 = arith.constant 1 : index
    %c0_20 = arith.constant 0 : index
    %c0_21 = arith.constant 0 : index
    %22 = vector.load %arg3[%c1_19, %c0_20, %c0_21] : memref<2x32x32xf32, #tpu.memory_space<vmem>>, vector<1x32x32xf32>
    %23 = vector.shape_cast %22 : vector<1x32x32xf32> to vector<32x32xf32>
    %24 = vector.shape_cast %23 : vector<32x32xf32> to vector<1x32x32xf32>
    %25 = vector.broadcast %24 : vector<1x32x32xf32> to vector<8x32x32xf32>
    %c0_22 = arith.constant 0 : index
    %c0_23 = arith.constant 0 : index
    %c0_24 = arith.constant 0 : index
    %26 = vector.load %arg4[%c0_22, %c0_23, %c0_24] : memref<2x32x32xf32, #tpu.memory_space<vmem>>, vector<1x32x32xf32>
    %27 = vector.shape_cast %26 : vector<1x32x32xf32> to vector<32x32xf32>
    %28 = vector.shape_cast %27 : vector<32x32xf32> to vector<1x32x32xf32>
    %29 = vector.broadcast %28 : vector<1x32x32xf32> to vector<8x32x32xf32>
    %c1_25 = arith.constant 1 : index
    %c0_26 = arith.constant 0 : index
    %c0_27 = arith.constant 0 : index
    %30 = vector.load %arg4[%c1_25, %c0_26, %c0_27] : memref<2x32x32xf32, #tpu.memory_space<vmem>>, vector<1x32x32xf32>
    %31 = vector.shape_cast %30 : vector<1x32x32xf32> to vector<32x32xf32>
    %32 = vector.shape_cast %31 : vector<32x32xf32> to vector<1x32x32xf32>
    %33 = vector.broadcast %32 : vector<1x32x32xf32> to vector<8x32x32xf32>
    %c0_28 = arith.constant 0 : index
    %c0_29 = arith.constant 0 : index
    %c0_30 = arith.constant 0 : index
    %34 = vector.load %arg5[%c0_28, %c0_29, %c0_30] : memref<2x32x32xf32, #tpu.memory_space<vmem>>, vector<1x32x32xf32>
    %35 = vector.shape_cast %34 : vector<1x32x32xf32> to vector<32x32xf32>
    %36 = vector.shape_cast %35 : vector<32x32xf32> to vector<1x32x32xf32>
    %37 = vector.broadcast %36 : vector<1x32x32xf32> to vector<8x32x32xf32>
    %c1_31 = arith.constant 1 : index
    %c0_32 = arith.constant 0 : index
    %c0_33 = arith.constant 0 : index
    %38 = vector.load %arg5[%c1_31, %c0_32, %c0_33] : memref<2x32x32xf32, #tpu.memory_space<vmem>>, vector<1x32x32xf32>
    %39 = vector.shape_cast %38 : vector<1x32x32xf32> to vector<32x32xf32>
    %40 = vector.shape_cast %39 : vector<32x32xf32> to vector<1x32x32xf32>
    %41 = vector.broadcast %40 : vector<1x32x32xf32> to vector<8x32x32xf32>
    "tpu.trace_start"() <{level = 10 : i32, message = "bij,bjk->bik"}> : () -> ()
    %cst = arith.constant dense<0.000000e+00> : vector<8x32x32xf32>
    %42 = tpu.matmul %0, %13, %cst {dimension_numbers = #tpu.dot_dimension_numbers<[2], [1], [1], [2], [0, 0, 0, 1, 1, 2], [0], [0]>} : vector<8x32x32xf32>, vector<8x32x32xf32>, vector<8x32x32xf32> -> vector<8x32x32xf32>
    %cst_34 = arith.constant dense<0.000000e+00> : vector<8x32x32xf32>
    %43 = tpu.matmul %1, %17, %cst_34 {dimension_numbers = #tpu.dot_dimension_numbers<[2], [1], [1], [2], [0, 0, 0, 1, 1, 2], [0], [0]>} : vector<8x32x32xf32>, vector<8x32x32xf32>, vector<8x32x32xf32> -> vector<8x32x32xf32>
    "tpu.trace_stop"() : () -> ()
    %44 = arith.subf %42, %43 : vector<8x32x32xf32>
    "tpu.trace_start"() <{level = 10 : i32, message = "bij,bjk->bik"}> : () -> ()
    %cst_35 = arith.constant dense<0.000000e+00> : vector<8x32x32xf32>
    %45 = tpu.matmul %0, %17, %cst_35 {dimension_numbers = #tpu.dot_dimension_numbers<[2], [1], [1], [2], [0, 0, 0, 1, 1, 2], [0], [0]>} : vector<8x32x32xf32>, vector<8x32x32xf32>, vector<8x32x32xf32> -> vector<8x32x32xf32>
    %cst_36 = arith.constant dense<0.000000e+00> : vector<8x32x32xf32>
    %46 = tpu.matmul %1, %13, %cst_36 {dimension_numbers = #tpu.dot_dimension_numbers<[2], [1], [1], [2], [0, 0, 0, 1, 1, 2], [0], [0]>} : vector<8x32x32xf32>, vector<8x32x32xf32>, vector<8x32x32xf32> -> vector<8x32x32xf32>
    "tpu.trace_stop"() : () -> ()
    %47 = arith.addf %45, %46 : vector<8x32x32xf32>
    "tpu.trace_start"() <{level = 10 : i32, message = "bij,bjk->bik"}> : () -> ()
    %cst_37 = arith.constant dense<0.000000e+00> : vector<8x32x32xf32>
    %48 = tpu.matmul %5, %44, %cst_37 {dimension_numbers = #tpu.dot_dimension_numbers<[2], [1], [1], [2], [0, 0, 0, 1, 1, 2], [0], [0]>} : vector<8x32x32xf32>, vector<8x32x32xf32>, vector<8x32x32xf32> -> vector<8x32x32xf32>
    %cst_38 = arith.constant dense<0.000000e+00> : vector<8x32x32xf32>
    %49 = tpu.matmul %9, %47, %cst_38 {dimension_numbers = #tpu.dot_dimension_numbers<[2], [1], [1], [2], [0, 0, 0, 1, 1, 2], [0], [0]>} : vector<8x32x32xf32>, vector<8x32x32xf32>, vector<8x32x32xf32> -> vector<8x32x32xf32>
    "tpu.trace_stop"() : () -> ()
    %50 = arith.subf %48, %49 : vector<8x32x32xf32>
    "tpu.trace_start"() <{level = 10 : i32, message = "bij,bjk->bik"}> : () -> ()
    %cst_39 = arith.constant dense<0.000000e+00> : vector<8x32x32xf32>
    %51 = tpu.matmul %5, %47, %cst_39 {dimension_numbers = #tpu.dot_dimension_numbers<[2], [1], [1], [2], [0, 0, 0, 1, 1, 2], [0], [0]>} : vector<8x32x32xf32>, vector<8x32x32xf32>, vector<8x32x32xf32> -> vector<8x32x32xf32>
    %cst_40 = arith.constant dense<0.000000e+00> : vector<8x32x32xf32>
    %52 = tpu.matmul %9, %44, %cst_40 {dimension_numbers = #tpu.dot_dimension_numbers<[2], [1], [1], [2], [0, 0, 0, 1, 1, 2], [0], [0]>} : vector<8x32x32xf32>, vector<8x32x32xf32>, vector<8x32x32xf32> -> vector<8x32x32xf32>
    "tpu.trace_stop"() : () -> ()
    %53 = arith.addf %51, %52 : vector<8x32x32xf32>
    %54 = arith.mulf %37, %50 : vector<8x32x32xf32>
    %55 = arith.mulf %41, %53 : vector<8x32x32xf32>
    %56 = arith.subf %54, %55 : vector<8x32x32xf32>
    %57 = arith.mulf %37, %53 : vector<8x32x32xf32>
    %58 = arith.mulf %41, %50 : vector<8x32x32xf32>
    %59 = arith.addf %57, %58 : vector<8x32x32xf32>
    "tpu.trace_start"() <{level = 10 : i32, message = "bij,bjk->bik"}> : () -> ()
    %cst_41 = arith.constant dense<0.000000e+00> : vector<8x32x32xf32>
    %60 = tpu.matmul %56, %29, %cst_41 {dimension_numbers = #tpu.dot_dimension_numbers<[2], [1], [1], [2], [0, 0, 0, 1, 1, 2], [0], [0]>} : vector<8x32x32xf32>, vector<8x32x32xf32>, vector<8x32x32xf32> -> vector<8x32x32xf32>
    %cst_42 = arith.constant dense<0.000000e+00> : vector<8x32x32xf32>
    %61 = tpu.matmul %59, %33, %cst_42 {dimension_numbers = #tpu.dot_dimension_numbers<[2], [1], [1], [2], [0, 0, 0, 1, 1, 2], [0], [0]>} : vector<8x32x32xf32>, vector<8x32x32xf32>, vector<8x32x32xf32> -> vector<8x32x32xf32>
    "tpu.trace_stop"() : () -> ()
    %62 = arith.subf %60, %61 : vector<8x32x32xf32>
    "tpu.trace_start"() <{level = 10 : i32, message = "bij,bjk->bik"}> : () -> ()
    %cst_43 = arith.constant dense<0.000000e+00> : vector<8x32x32xf32>
    %63 = tpu.matmul %56, %33, %cst_43 {dimension_numbers = #tpu.dot_dimension_numbers<[2], [1], [1], [2], [0, 0, 0, 1, 1, 2], [0], [0]>} : vector<8x32x32xf32>, vector<8x32x32xf32>, vector<8x32x32xf32> -> vector<8x32x32xf32>
    %cst_44 = arith.constant dense<0.000000e+00> : vector<8x32x32xf32>
    %64 = tpu.matmul %59, %29, %cst_44 {dimension_numbers = #tpu.dot_dimension_numbers<[2], [1], [1], [2], [0, 0, 0, 1, 1, 2], [0], [0]>} : vector<8x32x32xf32>, vector<8x32x32xf32>, vector<8x32x32xf32> -> vector<8x32x32xf32>
    "tpu.trace_stop"() : () -> ()
    %65 = arith.addf %63, %64 : vector<8x32x32xf32>
    "tpu.trace_start"() <{level = 10 : i32, message = "bij,bjk->bik"}> : () -> ()
    %cst_45 = arith.constant dense<0.000000e+00> : vector<8x32x32xf32>
    %66 = tpu.matmul %21, %62, %cst_45 {dimension_numbers = #tpu.dot_dimension_numbers<[2], [1], [1], [2], [0, 0, 0, 1, 1, 2], [0], [0]>} : vector<8x32x32xf32>, vector<8x32x32xf32>, vector<8x32x32xf32> -> vector<8x32x32xf32>
    %cst_46 = arith.constant dense<0.000000e+00> : vector<8x32x32xf32>
    %67 = tpu.matmul %25, %65, %cst_46 {dimension_numbers = #tpu.dot_dimension_numbers<[2], [1], [1], [2], [0, 0, 0, 1, 1, 2], [0], [0]>} : vector<8x32x32xf32>, vector<8x32x32xf32>, vector<8x32x32xf32> -> vector<8x32x32xf32>
    "tpu.trace_stop"() : () -> ()
    %68 = arith.subf %66, %67 : vector<8x32x32xf32>
    "tpu.trace_start"() <{level = 10 : i32, message = "bij,bjk->bik"}> : () -> ()
    %cst_47 = arith.constant dense<0.000000e+00> : vector<8x32x32xf32>
    %69 = tpu.matmul %21, %65, %cst_47 {dimension_numbers = #tpu.dot_dimension_numbers<[2], [1], [1], [2], [0, 0, 0, 1, 1, 2], [0], [0]>} : vector<8x32x32xf32>, vector<8x32x32xf32>, vector<8x32x32xf32> -> vector<8x32x32xf32>
    %cst_48 = arith.constant dense<0.000000e+00> : vector<8x32x32xf32>
    %70 = tpu.matmul %25, %62, %cst_48 {dimension_numbers = #tpu.dot_dimension_numbers<[2], [1], [1], [2], [0, 0, 0, 1, 1, 2], [0], [0]>} : vector<8x32x32xf32>, vector<8x32x32xf32>, vector<8x32x32xf32> -> vector<8x32x32xf32>
    "tpu.trace_stop"() : () -> ()
    %71 = arith.addf %69, %70 : vector<8x32x32xf32>
    %c0_49 = arith.constant 0 : index
    %c0_50 = arith.constant 0 : index
    %c0_51 = arith.constant 0 : index
    %72 = vector.load %arg8[%c0_49, %c0_50, %c0_51] : memref<8x32x32xf32, #tpu.memory_space<vmem>>, vector<8x32x32xf32>
    tpu.vector_store %arg8[%c0_49, %c0_50, %c0_51], %68 {strides = array<i32>} : memref<8x32x32xf32, #tpu.memory_space<vmem>>, vector<8x32x32xf32>,
    %c0_52 = arith.constant 0 : index
    %c0_53 = arith.constant 0 : index
    %c0_54 = arith.constant 0 : index
    %73 = vector.load %arg9[%c0_52, %c0_53, %c0_54] : memref<8x32x32xf32, #tpu.memory_space<vmem>>, vector<8x32x32xf32>
    tpu.vector_store %arg9[%c0_52, %c0_53, %c0_54], %71 {strides = array<i32>} : memref<8x32x32xf32, #tpu.memory_space<vmem>>, vector<8x32x32xf32>,
    return
  }
  func.func @transform_0(%arg0: i32) -> (i32, i32, i32) {
    %c0_i32 = arith.constant 0 : i32
    %c0_i32_0 = arith.constant 0 : i32
    %c0_i32_1 = arith.constant 0 : i32
    %c0_i32_2 = arith.constant 0 : i32
    return %c0_i32, %c0_i32_0, %c0_i32_1 : i32, i32, i32
  }
  func.func @transform_1(%arg0: i32) -> (i32, i32, i32) {
    %c0_i32 = arith.constant 0 : i32
    %c0_i32_0 = arith.constant 0 : i32
    %c0_i32_1 = arith.constant 0 : i32
    %c0_i32_2 = arith.constant 0 : i32
    return %c0_i32, %c0_i32_0, %c0_i32_1 : i32, i32, i32
  }
  func.func @transform_2(%arg0: i32) -> (i32, i32, i32) {
    %c0_i32 = arith.constant 0 : i32
    %c0_i32_0 = arith.constant 0 : i32
    %c0_i32_1 = arith.constant 0 : i32
    %c0_i32_2 = arith.constant 0 : i32
    return %c0_i32, %c0_i32_0, %c0_i32_1 : i32, i32, i32
  }
  func.func @transform_3(%arg0: i32) -> (i32, i32, i32) {
    %c0_i32 = arith.constant 0 : i32
    %c0_i32_0 = arith.constant 0 : i32
    %c0_i32_1 = arith.constant 0 : i32
    %c0_i32_2 = arith.constant 0 : i32
    return %c0_i32, %c0_i32_0, %c0_i32_1 : i32, i32, i32
  }
  func.func @transform_4(%arg0: i32) -> (i32, i32, i32) {
    %c0_i32 = arith.constant 0 : i32
    %c0_i32_0 = arith.constant 0 : i32
    %c0_i32_1 = arith.constant 0 : i32
    %c0_i32_2 = arith.constant 0 : i32
    return %c0_i32, %c0_i32_0, %c0_i32_1 : i32, i32, i32
  }
  func.func @transform_5(%arg0: i32) -> (i32, i32, i32) {
    %c0_i32 = arith.constant 0 : i32
    %c0_i32_0 = arith.constant 0 : i32
    %c0_i32_1 = arith.constant 0 : i32
    return %arg0, %c0_i32, %c0_i32_0 : i32, i32, i32
  }
  func.func @transform_6(%arg0: i32) -> (i32, i32, i32) {
    %c0_i32 = arith.constant 0 : i32
    %c0_i32_0 = arith.constant 0 : i32
    %c0_i32_1 = arith.constant 0 : i32
    return %arg0, %c0_i32, %c0_i32_0 : i32, i32, i32
  }
  func.func @transform_7(%arg0: i32) -> (i32, i32, i32) {
    %c0_i32 = arith.constant 0 : i32
    %c0_i32_0 = arith.constant 0 : i32
    %c0_i32_1 = arith.constant 0 : i32
    return %arg0, %c0_i32, %c0_i32_0 : i32, i32, i32
  }
  func.func @transform_8(%arg0: i32) -> (i32, i32, i32) {
    %c0_i32 = arith.constant 0 : i32
    %c0_i32_0 = arith.constant 0 : i32
    %c0_i32_1 = arith.constant 0 : i32
    return %arg0, %c0_i32, %c0_i32_0 : i32, i32, i32
  }
}

</mosaic_0001>

<bundles_post_ra>
// kernel: tpu_custom_call.1
= control target key start
LH: loop header
LB: loop body
LE: loop exit
PB: predicated region body
PF: predicated region fallthrough
CT: control target
= control target key end

     0   :  { %14 = vsyncpa [#allocation3], 0  ;;  %s19381_s0 = inlined_call_operand.hbm [shape: f32[2,32,32], index: 0, kind: input, shape index: {}]   ;;  %s19382_s1 = inlined_call_operand.hbm [shape: f32[2,32,32], index: 1, kind: input, shape index: {}]   ;;  %s19383_s2 = inlined_call_operand.hbm [shape: f32[2,32,32], index: 2, kind: input, shape index: {}]   ;;  %s19384_s3 = inlined_call_operand.hbm [shape: f32[2,32,32], index: 3, kind: input, shape index: {}]   ;;  %s19385_s4 = inlined_call_operand.hbm [shape: f32[2,32,32], index: 4, kind: input, shape index: {}]   ;;  %s19386_s5 = inlined_call_operand.hbm [shape: f32[8,32,32], index: 5, kind: input, shape index: {}]   ;;  %s19387_s6 = inlined_call_operand.hbm [shape: f32[8,32,32], index: 6, kind: input, shape index: {}]   ;;  %s19388_s7 = inlined_call_operand.hbm [shape: f32[8,32,32], index: 7, kind: output, shape index: {0}]   ;;  %s19389_s8 = inlined_call_operand.hbm [shape: f32[8,32,32], index: 8, kind: output, shape index: {1}]  }
   0x1   :  { %15 = vsyncpa [#allocation6], 0 }
   0x2   :  { %16 = vsyncpa [#allocation9], 0 }
   0x3   :  { %17 = vsyncpa [#allocation12], 0 }
   0x4   :  { %18 = vsyncpa [#allocation4], 0 }
   0x5   :  { %19 = vsyncpa [#allocation16], 0  ;;  %s15508_s27 = smov [#allocation5]   ;;  %s15509_s29 = smov [#allocation8]  }
   0x6   :  { %s37_s28 = sshll.u32 %s15508_s27, 4  ;;  %s61_s30 = sshll.u32 %s15509_s29, 4  ;;  %s38_s28 = int_to_ptr.vmem [resolvable:$true] %s37_s28  ;;  %s62_s30 = int_to_ptr.vmem [resolvable:$true] %s61_s30 }
   0x7   :  { %s15324_s9 = scalar_lea.vmem %s38_s28, 1024  ;;  %p15329_p1 = scmp.lt.s32.totalorder %s38_s28, %s38_s28 }
   0x8   :  { %p15325_p0 = scmp.ne.s32.totalorder %s38_s28, %s15324_s9  ;;  %p15330_p2 = scmp.lt.s32.totalorder %s15324_s9, %s15324_s9 }
   0xa   :  { %p15331_p3 = por %p15330_p2, %p15329_p1 }
   0xc   :  { %p15332_p4 = pnand %p15331_p3, %p15325_p0 }
   0xe   :  { %15335 = shalt.err (!%p15332_p4)
}
   0xf   :  { %s15510_s10 = smov 128   ;;  %s15511_s11 = smov 8  }
  0x10   :  { %43 = dma.hbm_to_vmem [thread:$0]  %s19382_s1, 1024, %s38_s28, [#allocation6], %s15510_s10, %s15510_s10, %s15511_s11  }
  0x11   :  { %s15344_s14 = scalar_lea.vmem %s62_s30, 1024  ;;  %p15349_p6 = scmp.lt.s32.totalorder %s62_s30, %s62_s30 }
  0x12   :  { %p15345_p5 = scmp.ne.s32.totalorder %s62_s30, %s15344_s14  ;;  %p15350_p7 = scmp.lt.s32.totalorder %s15344_s14, %s15344_s14 }
  0x14   :  { %p15351_p8 = por %p15350_p7, %p15349_p6 }
  0x16   :  { %p15352_p9 = pnand %p15351_p8, %p15345_p5 }
  0x18   :  { %15355 = shalt.err (!%p15352_p9)
}
  0x19   :  { %67 = dma.hbm_to_vmem [thread:$0]  %s19384_s3, 1024, %s62_s30, [#allocation9], %s15510_s10, %s15510_s10, %s15511_s11  }
  0x1a   :  { %s15512_s17 = smov [#allocation11]   ;;  %s15513_s19 = smov [#allocation2]  }
  0x1b   :  { %s85_s18 = sshll.u32 %s15512_s17, 4  ;;  %s25_s20 = sshll.u32 %s15513_s19, 4  ;;  %s86_s18 = int_to_ptr.vmem [resolvable:$true] %s85_s18  ;;  %s26_s20 = int_to_ptr.vmem [resolvable:$true] %s25_s20 }
  0x1c   :  { %s15364_s1 = scalar_lea.vmem %s86_s18, 4096  ;;  %p15369_p11 = scmp.lt.s32.totalorder %s86_s18, %s86_s18 }
  0x1d   :  { %p15365_p10 = scmp.ne.s32.totalorder %s86_s18, %s15364_s1  ;;  %p15370_p12 = scmp.lt.s32.totalorder %s15364_s1, %s15364_s1 }
  0x1f   :  { %p15371_p13 = por %p15370_p12, %p15369_p11 }
  0x21   :  { %p15372_p0 = pnand %p15371_p13, %p15365_p10 }
  0x23   :  { %15375 = shalt.err (!%p15372_p0)
}
  0x24   :  { %91 = dma.hbm_to_vmem [thread:$0]  %s19386_s5, 4096, %s86_s18, [#allocation12], %s15510_s10, %s15510_s10, %s15511_s11  }
  0x25   :  { %s15384_s3 = scalar_lea.vmem %s26_s20, 1024  ;;  %p15389_p2 = scmp.lt.s32.totalorder %s26_s20, %s26_s20 }
  0x26   :  { %p15385_p1 = scmp.ne.s32.totalorder %s26_s20, %s15384_s3  ;;  %p15390_p3 = scmp.lt.s32.totalorder %s15384_s3, %s15384_s3 }
  0x28   :  { %p15391_p4 = por %p15390_p3, %p15389_p2 }
  0x2a   :  { %p15392_p5 = pnand %p15391_p4, %p15385_p1 }
  0x2c   :  { %15395 = shalt.err (!%p15392_p5)
}
  0x2d   :  { %31 = dma.hbm_to_vmem [thread:$0]  %s19381_s0, 1024, %s26_s20, [#allocation3], %s15510_s10, %s15510_s10, %s15511_s11  }
  0x2e   :  { %s15514_s25 = smov [#allocation7]   ;;  %s15515_s27 = smov [#allocation10]  }
  0x2f   :  { %s49_s26 = sshll.u32 %s15514_s25, 4  ;;  %s73_s28 = sshll.u32 %s15515_s27, 4  ;;  %s50_s26 = int_to_ptr.vmem [resolvable:$true] %s49_s26  ;;  %s74_s28 = int_to_ptr.vmem [resolvable:$true] %s73_s28 }
  0x30   :  { %s15404_s5 = scalar_lea.vmem %s50_s26, 1024  ;;  %p15409_p7 = scmp.lt.s32.totalorder %s50_s26, %s50_s26 }
  0x31   :  { %p15405_p6 = scmp.ne.s32.totalorder %s50_s26, %s15404_s5  ;;  %p15410_p8 = scmp.lt.s32.totalorder %s15404_s5, %s15404_s5 }
  0x33   :  { %p15411_p9 = por %p15410_p8, %p15409_p7 }
  0x35   :  { %p15412_p10 = pnand %p15411_p9, %p15405_p6 }
  0x37   :  { %15415 = shalt.err (!%p15412_p10)
}
  0x38   :  { %55 = dma.hbm_to_vmem [thread:$0]  %s19383_s2, 1024, %s50_s26, [#allocation6], %s15510_s10, %s15510_s10, %s15511_s11  }
  0x39   :  { %s15424_s0 = scalar_lea.vmem %s74_s28, 1024  ;;  %p15429_p12 = scmp.lt.s32.totalorder %s74_s28, %s74_s28 }
  0x3a   :  { %p15425_p11 = scmp.ne.s32.totalorder %s74_s28, %s15424_s0  ;;  %p15430_p13 = scmp.lt.s32.totalorder %s15424_s0, %s15424_s0 }
  0x3c   :  { %p15431_p0 = por %p15430_p13, %p15429_p12 }
  0x3e   :  { %p15432_p1 = pnand %p15431_p0, %p15425_p11 }
  0x40   :  { %15435 = shalt.err (!%p15432_p1)
}
  0x41   :  { %79 = dma.hbm_to_vmem [thread:$0]  %s19385_s4, 1024, %s74_s28, [#allocation9], %s15510_s10, %s15510_s10, %s15511_s11  }
  0x42   :  { %s15516_s13 = smov [#allocation13]  }
  0x43   :  { %s97_s14 = sshll.u32 %s15516_s13, 4  ;;  %s98_s14 = int_to_ptr.vmem [resolvable:$true] %s97_s14 }
  0x44   :  { %s15444_s15 = scalar_lea.vmem %s98_s14, 4096  ;;  %p15449_p3 = scmp.lt.s32.totalorder %s98_s14, %s98_s14 }
  0x45   :  { %p15445_p2 = scmp.ne.s32.totalorder %s98_s14, %s15444_s15  ;;  %p15450_p4 = scmp.lt.s32.totalorder %s15444_s15, %s15444_s15 }
  0x47   :  { %p15451_p5 = por %p15450_p4, %p15449_p3 }
  0x49   :  { %p15452_p6 = pnand %p15451_p5, %p15445_p2 }
  0x4b   :  { %15455 = shalt.err (!%p15452_p6)
}
  0x4c   :  { %103 = dma.hbm_to_vmem [thread:$0]  %s19387_s6, 4096, %s98_s14, [#allocation12], %s15510_s10, %s15510_s10, %s15511_s11  }
  0x4d   :  { %15496 = dma.done.wait [#allocation3], 1024  }
  0x4e   :  { %15497 = vsyncadd [#allocation3], 4294966272 }
  0x4f   :  { %15498 = dma.done.wait [#allocation6], 2048  }
  0x50   :  { %15499 = vsyncadd [#allocation6], 4294965248 }
  0x51   :  { %15500 = dma.done.wait [#allocation9], 2048  }
  0x52   :  { %15501 = vsyncadd [#allocation9], 4294965248 }
  0x53   :  { %15502 = dma.done.wait [#allocation12], 8192  }
  0x54   :  { %15503 = vsyncadd [#allocation12], 4294959104  ;;  %v15606_v0 = vld [vmem:[#allocation5 + $0x18] sm:$0xff]  ;;  %v15608_v1 = vld [vmem:[#allocation5 + $0x10] sm:$0xff]  ;;  %vm234_vm0 = vcmask 261120   ;;  %s15517_s4 = smov [#allocation14]  }
  0x55   :  { %13503 = vmatprep.subr.mxu0 %v15606_v0  ;;  %13517 = vmatprep.subr.mxu1 %v15606_v0  ;;  %v15614_v2 = vld [vmem:[#allocation5 + $0x8] sm:$0xff]  ;;  %v15620_v3 = vld [vmem:[#allocation5] sm:$0xff]  ;;  %v15648_v8 = vld [vmem:[#allocation11 + $0x10] sm:$0xff]  ;;  %s11936_s6 = sshll.u32 %s15517_s4, 4  ;;  %s11937_s6 = int_to_ptr.vmem [resolvable:$true] %s11936_s6 }
  0x56   :  { %13504 = vmatpush3.msra.mxu0 %v15606_v0  ;;  %13518 = vmatpush3.msra.mxu1 %v15606_v0  ;;  %v15624_v4 = vld [vmem:[#allocation11] sm:$0xff]  ;;  %v15632_v6 = vld [vmem:[#allocation11 + $0x8] sm:$0xff]  ;;  %v15650_v9 = vld [vmem:[#allocation11 + $0x30] sm:$0xff]  ;;  %s15456_s17 = scalar_lea.vmem %s11937_s6, 4096  ;;  %p15461_p8 = scmp.lt.s32.totalorder %s11937_s6, %s11937_s6 }
  0x57   :  { %13505 = vmatprep.subr.mxu0 %v15608_v1  ;;  %13519 = vmatprep.subr.mxu1 %v15608_v1  ;;  %v15628_v5 = vld [vmem:[#allocation11 + $0x20] sm:$0xff]  ;;  %v15634_v7 = vld [vmem:[#allocation11 + $0x28] sm:$0xff]  ;;  %v15656_v10 = vld [vmem:[#allocation11 + $0x18] sm:$0xff]  ;;  %p15457_p7 = scmp.ne.s32.totalorder %s11937_s6, %s15456_s17  ;;  %p15462_p9 = scmp.lt.s32.totalorder %s15456_s17, %s15456_s17 }
  0x58   :  { %13506 = vmatpush3.msra.mxu0 %v15608_v1  ;;  %13520 = vmatpush3.msra.mxu1 %v15608_v1  ;;  %v15658_v11 = vld [vmem:[#allocation11 + $0x38] sm:$0xff]  ;;  %v15672_v12 = vld [vmem:[#allocation11 + $0x40] sm:$0xff]  ;;  %v15680_v14 = vld [vmem:[#allocation11 + $0x48] sm:$0xff] }
  0x59   :  { %13507 = vmatprep.subr.mxu0 %v15614_v2  ;;  %13521 = vmatprep.subr.mxu1 %v15614_v2  ;;  %v15676_v13 = vld [vmem:[#allocation11 + $0x60] sm:$0xff]  ;;  %v15682_v15 = vld [vmem:[#allocation11 + $0x68] sm:$0xff]  ;;  %v15696_v16 = vld [vmem:[#allocation11 + $0x50] sm:$0xff]  ;;  %p15463_p10 = por %p15462_p9, %p15461_p8 }
  0x5a   :  { %13508 = vmatpush3.msra.mxu0 %v15614_v2  ;;  %13522 = vmatpush3.msra.mxu1 %v15614_v2  ;;  %v15698_v17 = vld [vmem:[#allocation11 + $0x70] sm:$0xff]  ;;  %v15704_v18 = vld [vmem:[#allocation11 + $0x58] sm:$0xff]  ;;  %v15720_v20 = vld [vmem:[#allocation11 + $0x80] sm:$0xff] }
  0x5b   :  { %13509 = vmatprep.subr.mxu0 %v15620_v3  ;;  %13523 = vmatprep.subr.mxu1 %v15620_v3  ;;  %v15706_v19 = vld [vmem:[#allocation11 + $0x78] sm:$0xff]  ;;  %v15724_v21 = vld [vmem:[#allocation11 + $0xa0] sm:$0xff]  ;;  %v15728_v22 = vld [vmem:[#allocation11 + $0x88] sm:$0xff]  ;;  %p15464_p11 = pnand %p15463_p10, %p15457_p7 }
  0x5c   :  { %13510 = vmatpush3.msra.mxu0 %v15620_v3  ;;  %13511 = vmatprep.mubr.msk.f32.mxu0 %vm234_vm0, %v15624_v4  ;;  %v15730_v23 = vld [vmem:[#allocation11 + $0xa8] sm:$0xff]  ;;  %v15744_v24 = vld [vmem:[#allocation11 + $0x90] sm:$0xff]  ;;  %v15752_v26 = vld [vmem:[#allocation11 + $0x98] sm:$0xff] }
  0x5d   :  { %13524 = vmatpush3.msra.mxu1 %v15620_v3  ;;  %13525 = vmatprep.mubr.msk.f32.mxu1 %vm234_vm0, %v15628_v5  ;;  %v15746_v25 = vld [vmem:[#allocation11 + $0xb0] sm:$0xff]  ;;  %v15754_v27 = vld [vmem:[#allocation11 + $0xb8] sm:$0xff]  ;;  %v15768_v28 = vld [vmem:[#allocation11 + $0xc0] sm:$0xff] }
  0x5e   :  { %13512 = vmatmul.mubr.msk.f32.vlgmr.msra.gmra.mxu0 %vm234_vm0, %v15632_v6  ;;  %13526 = vmatmul.mubr.msk.f32.vlgmr.msra.gmra.mxu1 %vm234_vm0, %v15634_v7  ;;  %19530 = vst [vmem:[#allocation23_spill] sm:$0xff] %v15768_v28  ;;  %v15772_v29 = vld [vmem:[#allocation11 + $0xe0] sm:$0xff]  ;;  %v15776_v30 = vld [vmem:[#allocation11 + $0xc8] sm:$0xff]  ;;  %v15783_v32 = vld [vmem:[#allocation5 + $0x38] sm:$0xff] }
  0x5f   :  { %13531 = vmatprep.subr.mxu0 %v15606_v0  ;;  %13545 = vmatprep.subr.mxu1 %v15606_v0  ;;  %19531 = vst [vmem:[#allocation24_spill] sm:$0xff] %v15772_v29  ;;  %19532 = vst [vmem:[#allocation25_spill] sm:$0xff] %v15776_v30  ;;  %v15778_v31 = vld [vmem:[#allocation11 + $0xe8] sm:$0xff]  ;;  %v15792_v33 = vld [vmem:[#allocation5 + $0x30] sm:$0xff] }
  0x60   :  { %13532 = vmatpush3.msra.mxu0 %v15606_v0  ;;  %13546 = vmatpush3.msra.mxu1 %v15606_v0  ;;  %19533 = vst [vmem:[#allocation26_spill] sm:$0xff] %v15778_v31  ;;  %v15796_v34 = vld [vmem:[#allocation11 + $0xd0] sm:$0xff]  ;;  %v15804_v36 = vld [vmem:[#allocation11 + $0xd8] sm:$0xff]  ;;  %v15812_v38 = vld [vmem:[#allocation5 + $0x28] sm:$0xff] }
  0x61   :  { %13533 = vmatprep.subr.mxu0 %v15608_v1  ;;  %13547 = vmatprep.subr.mxu1 %v15608_v1  ;;  %19534 = vst [vmem:[#allocation27_spill] sm:$0xff] %v15796_v34  ;;  %v15798_v35 = vld [vmem:[#allocation11 + $0xf0] sm:$0xff]  ;;  %19536 = vst [vmem:[#allocation29_spill] sm:$0xff] %v15804_v36  ;;  %v15806_v37 = vld [vmem:[#allocation11 + $0xf8] sm:$0xff] }
  0x62   :  { %13514 = vmatprep.mubr.msk.f32.mxu0 %vm234_vm0, %v15648_v8  ;;  %13528 = vmatprep.mubr.msk.f32.mxu1 %vm234_vm0, %v15650_v9  ;;  %19535 = vst [vmem:[#allocation28_spill] sm:$0xff] %v15798_v35  ;;  %19537 = vst [vmem:[#allocation30_spill] sm:$0xff] %v15806_v37  ;;  %v15820_v39 = vld [vmem:[#allocation5 + $0x20] sm:$0xff]  ;;  %v15832_v42 = vld [vmem:[#allocation13 + $0x8] sm:$0xff] }
  0x63   :  { %13534 = vmatpush3.msra.mxu0 %v15608_v1  ;;  %13548 = vmatpush3.msra.mxu1 %v15608_v1  ;;  %v15824_v40 = vld [vmem:[#allocation13] sm:$0xff]  ;;  %v15834_v43 = vld [vmem:[#allocation13 + $0x28] sm:$0xff]  ;;  %v15848_v44 = vld [vmem:[#allocation13 + $0x10] sm:$0xff] }
  0x64   :  { %13515 = vmatmul.mubr.msk.f32.gmra.mxu0 %vm234_vm0, %v15656_v10  ;;  %13529 = vmatmul.mubr.msk.f32.gmra.mxu1 %vm234_vm0, %v15658_v11  ;;  %v15828_v41 = vld [vmem:[#allocation13 + $0x20] sm:$0xff]  ;;  %v15850_v45 = vld [vmem:[#allocation13 + $0x30] sm:$0xff]  ;;  %v15856_v46 = vld [vmem:[#allocation13 + $0x18] sm:$0xff] }
  0x65   :  { %13535 = vmatprep.subr.mxu0 %v15614_v2  ;;  %13549 = vmatprep.subr.mxu1 %v15614_v2  ;;  %v15858_v47 = vld [vmem:[#allocation13 + $0x38] sm:$0xff]  ;;  %v15872_v48 = vld [vmem:[#allocation13 + $0x40] sm:$0xff]  ;;  %v15880_v50 = vld [vmem:[#allocation13 + $0x48] sm:$0xff] }
  0x66   :  { %13536 = vmatpush3.msra.mxu0 %v15614_v2  ;;  %13550 = vmatpush3.msra.mxu1 %v15614_v2  ;;  %v15876_v49 = vld [vmem:[#allocation13 + $0x60] sm:$0xff]  ;;  %v15882_v51 = vld [vmem:[#allocation13 + $0x68] sm:$0xff]  ;;  %v15896_v52 = vld [vmem:[#allocation13 + $0x50] sm:$0xff] }
  0x67   :  { %13537 = vmatprep.subr.mxu0 %v15620_v3  ;;  %13551 = vmatprep.subr.mxu1 %v15620_v3  ;;  %v15898_v53 = vld [vmem:[#allocation13 + $0x70] sm:$0xff]  ;;  %v15904_v54 = vld [vmem:[#allocation13 + $0x58] sm:$0xff]  ;;  %v15920_v56 = vld [vmem:[#allocation13 + $0x80] sm:$0xff] }
  0x68   :  { %13538 = vmatpush3.msra.mxu0 %v15620_v3  ;;  %13539 = vmatprep.mubr.msk.f32.mxu0 %vm234_vm0, %v15672_v12  ;;  %v15906_v55 = vld [vmem:[#allocation13 + $0x78] sm:$0xff]  ;;  %v15924_v57 = vld [vmem:[#allocation13 + $0xa0] sm:$0xff]  ;;  %v15928_v58 = vld [vmem:[#allocation13 + $0x88] sm:$0xff] }
  0x69   :  { %13552 = vmatpush3.msra.mxu1 %v15620_v3  ;;  %13553 = vmatprep.mubr.msk.f32.mxu1 %vm234_vm0, %v15676_v13  ;;  %v15930_v59 = vld [vmem:[#allocation13 + $0xa8] sm:$0xff]  ;;  %v15944_v60 = vld [vmem:[#allocation13 + $0x90] sm:$0xff]  ;;  %v15952_v62 = vld [vmem:[#allocation13 + $0x98] sm:$0xff] }
  0x6a   :  { %13540 = vmatmul.mubr.msk.f32.vlgmr.msra.gmra.mxu0 %vm234_vm0, %v15680_v14  ;;  %13554 = vmatmul.mubr.msk.f32.vlgmr.msra.gmra.mxu1 %vm234_vm0, %v15682_v15  ;;  %v15946_v61 = vld [vmem:[#allocation13 + $0xb0] sm:$0xff]  ;;  %v15954_v63 = vld [vmem:[#allocation13 + $0xb8] sm:$0xff] }
  0x6b   :  { %13559 = vmatprep.subr.mxu0 %v15606_v0  ;;  %13573 = vmatprep.subr.mxu1 %v15606_v0 }
  0x6c   :  { %13560 = vmatpush3.msra.mxu0 %v15606_v0  ;;  %13574 = vmatpush3.msra.mxu1 %v15606_v0 }
  0x6d   :  { %13561 = vmatprep.subr.mxu0 %v15608_v1  ;;  %13575 = vmatprep.subr.mxu1 %v15608_v1 }
  0x6e   :  { %13542 = vmatprep.mubr.msk.f32.mxu0 %vm234_vm0, %v15696_v16  ;;  %13556 = vmatprep.mubr.msk.f32.mxu1 %vm234_vm0, %v15698_v17 }
  0x6f   :  { %13562 = vmatpush3.msra.mxu0 %v15608_v1  ;;  %13576 = vmatpush3.msra.mxu1 %v15608_v1 }
  0x70   :  { %13543 = vmatmul.mubr.msk.f32.gmra.mxu0 %vm234_vm0, %v15704_v18  ;;  %13557 = vmatmul.mubr.msk.f32.gmra.mxu1 %vm234_vm0, %v15706_v19 }
  0x71   :  { %13563 = vmatprep.subr.mxu0 %v15614_v2  ;;  %13577 = vmatprep.subr.mxu1 %v15614_v2 }
  0x72   :  { %13564 = vmatpush3.msra.mxu0 %v15614_v2  ;;  %13578 = vmatpush3.msra.mxu1 %v15614_v2 }
  0x73   :  { %13565 = vmatprep.subr.mxu0 %v15620_v3  ;;  %13579 = vmatprep.subr.mxu1 %v15620_v3 }
  0x74   :  { %13566 = vmatpush3.msra.mxu0 %v15620_v3  ;;  %13567 = vmatprep.mubr.msk.f32.mxu0 %vm234_vm0, %v15720_v20 }
  0x75   :  { %13580 = vmatpush3.msra.mxu1 %v15620_v3  ;;  %13581 = vmatprep.mubr.msk.f32.mxu1 %vm234_vm0, %v15724_v21 }
  0x76   :  { %13568 = vmatmul.mubr.msk.f32.vlgmr.msra.gmra.mxu0 %vm234_vm0, %v15728_v22  ;;  %13582 = vmatmul.mubr.msk.f32.vlgmr.msra.gmra.mxu1 %vm234_vm0, %v15730_v23 }
  0x77   :  { %13587 = vmatprep.subr.mxu0 %v15606_v0  ;;  %13601 = vmatprep.subr.mxu1 %v15606_v0 }
  0x78   :  { %13588 = vmatpush3.msra.mxu0 %v15606_v0  ;;  %13602 = vmatpush3.msra.mxu1 %v15606_v0 }
  0x79   :  { %13589 = vmatprep.subr.mxu0 %v15608_v1  ;;  %13603 = vmatprep.subr.mxu1 %v15608_v1 }
  0x7a   :  { %13570 = vmatprep.mubr.msk.f32.mxu0 %vm234_vm0, %v15744_v24  ;;  %13584 = vmatprep.mubr.msk.f32.mxu1 %vm234_vm0, %v15746_v25 }
  0x7b   :  { %13590 = vmatpush3.msra.mxu0 %v15608_v1  ;;  %13604 = vmatpush3.msra.mxu1 %v15608_v1 }
  0x7c   :  { %13571 = vmatmul.mubr.msk.f32.gmra.mxu0 %vm234_vm0, %v15752_v26  ;;  %13585 = vmatmul.mubr.msk.f32.gmra.mxu1 %vm234_vm0, %v15754_v27 }
  0x7d   :  { %13591 = vmatprep.subr.mxu0 %v15614_v2  ;;  %13605 = vmatprep.subr.mxu1 %v15614_v2 }
  0x7e   :  { %13592 = vmatpush3.msra.mxu0 %v15614_v2  ;;  %13606 = vmatpush3.msra.mxu1 %v15614_v2 }
  0x7f   :  { %13593 = vmatprep.subr.mxu0 %v15620_v3  ;;  %13607 = vmatprep.subr.mxu1 %v15620_v3 }
  0x80   :  { %13594 = vmatpush3.msra.mxu0 %v15620_v3  ;;  %13595 = vmatprep.mubr.msk.f32.mxu0 %vm234_vm0, %v15768_v28  ;;  %v16002_v28 = vld [vmem:[#allocation13 + $0xf8] sm:$0xff] }
  0x81   :  { %13608 = vmatpush3.msra.mxu1 %v15620_v3  ;;  %13609 = vmatprep.mubr.msk.f32.mxu1 %vm234_vm0, %v15772_v29  ;;  %v16000_v29 = vld [vmem:[#allocation13 + $0xd8] sm:$0xff] }
  0x82   :  { %13596 = vmatmul.mubr.msk.f32.vlgmr.msra.gmra.mxu0 %vm234_vm0, %v15776_v30  ;;  %13610 = vmatmul.mubr.msk.f32.vlgmr.msra.gmra.mxu1 %vm234_vm0, %v15778_v31  ;;  %v15992_v31 = vld [vmem:[#allocation13 + $0xd0] sm:$0xff] }
  0x83   :  { %13615 = vmatprep.subr.mxu0 %v15783_v32  ;;  %13629 = vmatprep.subr.mxu1 %v15783_v32  ;;  %v15994_v30 = vld [vmem:[#allocation13 + $0xf0] sm:$0xff] }
  0x84   :  { %13616 = vmatpush3.msra.mxu0 %v15783_v32  ;;  %13630 = vmatpush3.msra.mxu1 %v15783_v32 }
  0x85   :  { %13617 = vmatprep.subr.mxu0 %v15792_v33  ;;  %13631 = vmatprep.subr.mxu1 %v15792_v33 }
  0x86   :  { %13598 = vmatprep.mubr.msk.f32.mxu0 %vm234_vm0, %v15796_v34  ;;  %13612 = vmatprep.mubr.msk.f32.mxu1 %vm234_vm0, %v15798_v35  ;;  %v15976_v35 = vld [vmem:[#allocation13 + $0xc8] sm:$0xff] }
  0x87   :  { %13618 = vmatpush3.msra.mxu0 %v15792_v33  ;;  %13632 = vmatpush3.msra.mxu1 %v15792_v33  ;;  %v15978_v34 = vld [vmem:[#allocation13 + $0xe8] sm:$0xff] }
  0x88   :  { %13599 = vmatmul.mubr.msk.f32.gmra.mxu0 %vm234_vm0, %v15804_v36  ;;  %13613 = vmatmul.mubr.msk.f32.gmra.mxu1 %vm234_vm0, %v15806_v37  ;;  %v15968_v37 = vld [vmem:[#allocation13 + $0xc0] sm:$0xff] }
  0x89   :  { %13619 = vmatprep.subr.mxu0 %v15812_v38  ;;  %13633 = vmatprep.subr.mxu1 %v15812_v38  ;;  %v15972_v36 = vld [vmem:[#allocation13 + $0xe0] sm:$0xff] }
  0x8a   :  { %13620 = vmatpush3.msra.mxu0 %v15812_v38  ;;  %13634 = vmatpush3.msra.mxu1 %v15812_v38 }
  0x8b   :  { %13621 = vmatprep.subr.mxu0 %v15820_v39  ;;  %13635 = vmatprep.subr.mxu1 %v15820_v39 }
  0x8c   :  { %13622 = vmatpush3.msra.mxu0 %v15820_v39  ;;  %13623 = vmatprep.mubr.msk.f32.mxu0 %vm234_vm0, %v15824_v40 }
  0x8d   :  { %13636 = vmatpush3.msra.mxu1 %v15820_v39  ;;  %13637 = vmatprep.mubr.msk.f32.mxu1 %vm234_vm0, %v15828_v41 }
  0x8e   :  { %13624 = vmatmul.mubr.msk.f32.vlgmr.msra.gmra.mxu0 %vm234_vm0, %v15832_v42  ;;  %13638 = vmatmul.mubr.msk.f32.vlgmr.msra.gmra.mxu1 %vm234_vm0, %v15834_v43 }
  0x8f   :  { %13643 = vmatprep.subr.mxu0 %v15783_v32  ;;  %13657 = vmatprep.subr.mxu1 %v15783_v32 }
  0x90   :  { %13644 = vmatpush3.msra.mxu0 %v15783_v32  ;;  %13658 = vmatpush3.msra.mxu1 %v15783_v32 }
  0x91   :  { %13645 = vmatprep.subr.mxu0 %v15792_v33  ;;  %13659 = vmatprep.subr.mxu1 %v15792_v33 }
  0x92   :  { %13626 = vmatprep.mubr.msk.f32.mxu0 %vm234_vm0, %v15848_v44  ;;  %13640 = vmatprep.mubr.msk.f32.mxu1 %vm234_vm0, %v15850_v45 }
  0x93   :  { %13646 = vmatpush3.msra.mxu0 %v15792_v33  ;;  %13660 = vmatpush3.msra.mxu1 %v15792_v33 }
  0x94   :  { %13627 = vmatmul.mubr.msk.f32.gmra.mxu0 %vm234_vm0, %v15856_v46  ;;  %13641 = vmatmul.mubr.msk.f32.gmra.mxu1 %vm234_vm0, %v15858_v47 }
  0x95   :  { %13647 = vmatprep.subr.mxu0 %v15812_v38  ;;  %13661 = vmatprep.subr.mxu1 %v15812_v38 }
  0x96   :  { %13648 = vmatpush3.msra.mxu0 %v15812_v38  ;;  %13662 = vmatpush3.msra.mxu1 %v15812_v38 }
  0x97   :  { %13649 = vmatprep.subr.mxu0 %v15820_v39  ;;  %13663 = vmatprep.subr.mxu1 %v15820_v39 }
  0x98   :  { %13650 = vmatpush3.msra.mxu0 %v15820_v39  ;;  %13651 = vmatprep.mubr.msk.f32.mxu0 %vm234_vm0, %v15872_v48 }
  0x99   :  { %13664 = vmatpush3.msra.mxu1 %v15820_v39  ;;  %13665 = vmatprep.mubr.msk.f32.mxu1 %vm234_vm0, %v15876_v49 }
  0x9a   :  { %13652 = vmatmul.mubr.msk.f32.vlgmr.msra.gmra.mxu0 %vm234_vm0, %v15880_v50  ;;  %13666 = vmatmul.mubr.msk.f32.vlgmr.msra.gmra.mxu1 %vm234_vm0, %v15882_v51 }
  0x9b   :  { %13671 = vmatprep.subr.mxu0 %v15783_v32  ;;  %13685 = vmatprep.subr.mxu1 %v15783_v32 }
  0x9c   :  { %13672 = vmatpush3.msra.mxu0 %v15783_v32  ;;  %13686 = vmatpush3.msra.mxu1 %v15783_v32 }
  0x9d   :  { %13673 = vmatprep.subr.mxu0 %v15792_v33  ;;  %13687 = vmatprep.subr.mxu1 %v15792_v33 }
  0x9e   :  { %13654 = vmatprep.mubr.msk.f32.mxu0 %vm234_vm0, %v15896_v52  ;;  %13668 = vmatprep.mubr.msk.f32.mxu1 %vm234_vm0, %v15898_v53 }
  0x9f   :  { %13674 = vmatpush3.msra.mxu0 %v15792_v33  ;;  %13688 = vmatpush3.msra.mxu1 %v15792_v33 }
  0xa0   :  { %13655 = vmatmul.mubr.msk.f32.gmra.mxu0 %vm234_vm0, %v15904_v54  ;;  %13669 = vmatmul.mubr.msk.f32.gmra.mxu1 %vm234_vm0, %v15906_v55 }
  0xa1   :  { %13675 = vmatprep.subr.mxu0 %v15812_v38  ;;  %13689 = vmatprep.subr.mxu1 %v15812_v38 }
  0xa2   :  { %13676 = vmatpush3.msra.mxu0 %v15812_v38  ;;  %13690 = vmatpush3.msra.mxu1 %v15812_v38 }
  0xa3   :  { %13677 = vmatprep.subr.mxu0 %v15820_v39  ;;  %13691 = vmatprep.subr.mxu1 %v15820_v39 }
  0xa4   :  { %13678 = vmatpush3.msra.mxu0 %v15820_v39  ;;  %13679 = vmatprep.mubr.msk.f32.mxu0 %vm234_vm0, %v15920_v56 }
  0xa5   :  { %13692 = vmatpush3.msra.mxu1 %v15820_v39  ;;  %13693 = vmatprep.mubr.msk.f32.mxu1 %vm234_vm0, %v15924_v57 }
  0xa6   :  { %13680 = vmatmul.mubr.msk.f32.vlgmr.msra.gmra.mxu0 %vm234_vm0, %v15928_v58  ;;  %13694 = vmatmul.mubr.msk.f32.vlgmr.msra.gmra.mxu1 %vm234_vm0, %v15930_v59 }
  0xa7   :  { %13699 = vmatprep.subr.mxu0 %v15783_v32  ;;  %13713 = vmatprep.subr.mxu1 %v15783_v32 }
  0xa8   :  { %13700 = vmatpush3.msra.mxu0 %v15783_v32  ;;  %13714 = vmatpush3.msra.mxu1 %v15783_v32 }
  0xa9   :  { %13701 = vmatprep.subr.mxu0 %v15792_v33  ;;  %13715 = vmatprep.subr.mxu1 %v15792_v33 }
  0xaa   :  { %13682 = vmatprep.mubr.msk.f32.mxu0 %vm234_vm0, %v15944_v60  ;;  %13696 = vmatprep.mubr.msk.f32.mxu1 %vm234_vm0, %v15946_v61 }
  0xab   :  { %13702 = vmatpush3.msra.mxu0 %v15792_v33  ;;  %13716 = vmatpush3.msra.mxu1 %v15792_v33 }
  0xac   :  { %13683 = vmatmul.mubr.msk.f32.gmra.mxu0 %vm234_vm0, %v15952_v62  ;;  %13697 = vmatmul.mubr.msk.f32.gmra.mxu1 %vm234_vm0, %v15954_v63 }
  0xad   :  { %13703 = vmatprep.subr.mxu0 %v15812_v38  ;;  %13717 = vmatprep.subr.mxu1 %v15812_v38 }
  0xae   :  { %13704 = vmatpush3.msra.mxu0 %v15812_v38  ;;  %13718 = vmatpush3.msra.mxu1 %v15812_v38 }
  0xaf   :  { %13705 = vmatprep.subr.mxu0 %v15820_v39  ;;  %13719 = vmatprep.subr.mxu1 %v15820_v39 }
  0xb0   :  { %13706 = vmatpush3.msra.mxu0 %v15820_v39  ;;  %13707 = vmatprep.mubr.msk.f32.mxu0 %vm234_vm0, %v15968_v37 }
  0xb1   :  { %13720 = vmatpush3.msra.mxu1 %v15820_v39  ;;  %13721 = vmatprep.mubr.msk.f32.mxu1 %vm234_vm0, %v15972_v36 }
  0xb2   :  { %13708 = vmatmul.mubr.msk.f32.vlgmr.msra.gmra.mxu0 %vm234_vm0, %v15976_v35  ;;  %13722 = vmatmul.mubr.msk.f32.vlgmr.msra.gmra.mxu1 %vm234_vm0, %v15978_v34 }
  0xb3   :  { %13727 = vmatprep.subr.mxu0 %v15606_v0  ;;  %13741 = vmatprep.subr.mxu1 %v15606_v0 }
  0xb4   :  { %13728 = vmatpush3.msra.mxu0 %v15606_v0  ;;  %13742 = vmatpush3.msra.mxu1 %v15606_v0 }
  0xb5   :  { %13729 = vmatprep.subr.mxu0 %v15608_v1  ;;  %13743 = vmatprep.subr.mxu1 %v15608_v1 }
  0xb6   :  { %13710 = vmatprep.mubr.msk.f32.mxu0 %vm234_vm0, %v15992_v31  ;;  %13724 = vmatprep.mubr.msk.f32.mxu1 %vm234_vm0, %v15994_v30 }
  0xb7   :  { %13730 = vmatpush3.msra.mxu0 %v15608_v1  ;;  %13744 = vmatpush3.msra.mxu1 %v15608_v1 }
  0xb8   :  { %13711 = vmatmul.mubr.msk.f32.gmra.mxu0 %vm234_vm0, %v16000_v29  ;;  %13725 = vmatmul.mubr.msk.f32.gmra.mxu1 %vm234_vm0, %v16002_v28 }
  0xb9   :  { %13731 = vmatprep.subr.mxu0 %v15614_v2  ;;  %13745 = vmatprep.subr.mxu1 %v15614_v2 }
  0xba   :  { %13732 = vmatpush3.msra.mxu0 %v15614_v2  ;;  %13746 = vmatpush3.msra.mxu1 %v15614_v2 }
  0xbb   :  { %13733 = vmatprep.subr.mxu0 %v15620_v3  ;;  %13747 = vmatprep.subr.mxu1 %v15620_v3 }
  0xbc   :  { %13734 = vmatpush3.msra.mxu0 %v15620_v3  ;;  %13735 = vmatprep.mubr.msk.f32.mxu0 %vm234_vm0, %v15824_v40 }
  0xbd   :  { %13748 = vmatpush3.msra.mxu1 %v15620_v3  ;;  %13749 = vmatprep.mubr.msk.f32.mxu1 %vm234_vm0, %v15828_v41 }
  0xbe   :  { %13736 = vmatmul.mubr.msk.f32.vlgmr.msra.gmra.mxu0 %vm234_vm0, %v15832_v42  ;;  %13750 = vmatmul.mubr.msk.f32.vlgmr.msra.gmra.mxu1 %vm234_vm0, %v15834_v43 }
  0xbf   :  { %13755 = vmatprep.subr.mxu0 %v15606_v0  ;;  %13769 = vmatprep.subr.mxu1 %v15606_v0 }
  0xc0   :  { %13756 = vmatpush3.msra.mxu0 %v15606_v0  ;;  %13770 = vmatpush3.msra.mxu1 %v15606_v0 }
  0xc1   :  { %13757 = vmatprep.subr.mxu0 %v15608_v1  ;;  %13771 = vmatprep.subr.mxu1 %v15608_v1 }
  0xc2   :  { %13738 = vmatprep.mubr.msk.f32.mxu0 %vm234_vm0, %v15848_v44  ;;  %13752 = vmatprep.mubr.msk.f32.mxu1 %vm234_vm0, %v15850_v45 }
  0xc3   :  { %13758 = vmatpush3.msra.mxu0 %v15608_v1  ;;  %13772 = vmatpush3.msra.mxu1 %v15608_v1 }
  0xc4   :  { %13739 = vmatmul.mubr.msk.f32.gmra.mxu0 %vm234_vm0, %v15856_v46  ;;  %13753 = vmatmul.mubr.msk.f32.gmra.mxu1 %vm234_vm0, %v15858_v47 }
  0xc5   :  { %13759 = vmatprep.subr.mxu0 %v15614_v2  ;;  %13773 = vmatprep.subr.mxu1 %v15614_v2 }
  0xc6   :  { %13760 = vmatpush3.msra.mxu0 %v15614_v2  ;;  %13774 = vmatpush3.msra.mxu1 %v15614_v2 }
  0xc7   :  { %13761 = vmatprep.subr.mxu0 %v15620_v3  ;;  %13775 = vmatprep.subr.mxu1 %v15620_v3 }
  0xc8   :  { %13762 = vmatpush3.msra.mxu0 %v15620_v3  ;;  %13763 = vmatprep.mubr.msk.f32.mxu0 %vm234_vm0, %v15872_v48 }
  0xc9   :  { %13776 = vmatpush3.msra.mxu1 %v15620_v3  ;;  %13777 = vmatprep.mubr.msk.f32.mxu1 %vm234_vm0, %v15876_v49 }
  0xca   :  { %13764 = vmatmul.mubr.msk.f32.vlgmr.msra.gmra.mxu0 %vm234_vm0, %v15880_v50  ;;  %13778 = vmatmul.mubr.msk.f32.vlgmr.msra.gmra.mxu1 %vm234_vm0, %v15882_v51 }
  0xcb   :  { %13783 = vmatprep.subr.mxu0 %v15606_v0  ;;  %13797 = vmatprep.subr.mxu1 %v15606_v0 }
  0xcc   :  { %13784 = vmatpush3.msra.mxu0 %v15606_v0  ;;  %13798 = vmatpush3.msra.mxu1 %v15606_v0 }
  0xcd   :  { %13785 = vmatprep.subr.mxu0 %v15608_v1  ;;  %13799 = vmatprep.subr.mxu1 %v15608_v1 }
  0xce   :  { %13766 = vmatprep.mubr.msk.f32.mxu0 %vm234_vm0, %v15896_v52  ;;  %13780 = vmatprep.mubr.msk.f32.mxu1 %vm234_vm0, %v15898_v53 }
  0xcf   :  { %13786 = vmatpush3.msra.mxu0 %v15608_v1  ;;  %13800 = vmatpush3.msra.mxu1 %v15608_v1 }
  0xd0   :  { %13767 = vmatmul.mubr.msk.f32.gmra.mxu0 %vm234_vm0, %v15904_v54  ;;  %13781 = vmatmul.mubr.msk.f32.gmra.mxu1 %vm234_vm0, %v15906_v55 }
  0xd1   :  { %13787 = vmatprep.subr.mxu0 %v15614_v2  ;;  %13801 = vmatprep.subr.mxu1 %v15614_v2 }
  0xd2   :  { %13788 = vmatpush3.msra.mxu0 %v15614_v2  ;;  %13802 = vmatpush3.msra.mxu1 %v15614_v2 }
  0xd3   :  { %13789 = vmatprep.subr.mxu0 %v15620_v3  ;;  %13803 = vmatprep.subr.mxu1 %v15620_v3 }
  0xd4   :  { %13790 = vmatpush3.msra.mxu0 %v15620_v3  ;;  %13791 = vmatprep.mubr.msk.f32.mxu0 %vm234_vm0, %v15920_v56 }
  0xd5   :  { %13804 = vmatpush3.msra.mxu1 %v15620_v3  ;;  %13805 = vmatprep.mubr.msk.f32.mxu1 %vm234_vm0, %v15924_v57 }
  0xd6   :  { %13792 = vmatmul.mubr.msk.f32.vlgmr.msra.gmra.mxu0 %vm234_vm0, %v15928_v58  ;;  %13806 = vmatmul.mubr.msk.f32.vlgmr.msra.gmra.mxu1 %vm234_vm0, %v15930_v59 }
  0xd7   :  { %13811 = vmatprep.subr.mxu0 %v15606_v0  ;;  %13825 = vmatprep.subr.mxu1 %v15606_v0 }
  0xd8   :  { %13812 = vmatpush3.msra.mxu0 %v15606_v0  ;;  %13826 = vmatpush3.msra.mxu1 %v15606_v0  ;;  %v19538_v0 = vld [vmem:[#allocation23_spill] sm:$0xff] }
  0xd9   :  { %13813 = vmatprep.subr.mxu0 %v15608_v1  ;;  %13827 = vmatprep.subr.mxu1 %v15608_v1 }
  0xda   :  { %13794 = vmatprep.mubr.msk.f32.mxu0 %vm234_vm0, %v15944_v60  ;;  %13808 = vmatprep.mubr.msk.f32.mxu1 %vm234_vm0, %v15946_v61  ;;  %v16344_v61 = vld [vmem:[#allocation2 + $0x8] sm:$0xff] }
  0xdb   :  { %13814 = vmatpush3.msra.mxu0 %v15608_v1  ;;  %13828 = vmatpush3.msra.mxu1 %v15608_v1  ;;  %v19539_v1 = vld [vmem:[#allocation24_spill] sm:$0xff] }
  0xdc   :  { %13795 = vmatmul.mubr.msk.f32.gmra.mxu0 %vm234_vm0, %v15952_v62  ;;  %13809 = vmatmul.mubr.msk.f32.gmra.mxu1 %vm234_vm0, %v15954_v63  ;;  %19547 = vst [vmem:[#allocation24_spill] sm:$0xff] %v16344_v61  ;;  %v16348_v62 = vld [vmem:[#allocation2 + $0x10] sm:$0xff] }
  0xdd   :  { %13815 = vmatprep.subr.mxu0 %v15614_v2  ;;  %13829 = vmatprep.subr.mxu1 %v15614_v2 }
  0xde   :  { %13816 = vmatpush3.msra.mxu0 %v15614_v2  ;;  %13830 = vmatpush3.msra.mxu1 %v15614_v2  ;;  %v19540_v2 = vld [vmem:[#allocation25_spill] sm:$0xff] }
  0xdf   :  { %13817 = vmatprep.subr.mxu0 %v15620_v3  ;;  %13831 = vmatprep.subr.mxu1 %v15620_v3  ;;  %19548 = vst [vmem:[#allocation25_spill] sm:$0xff] %v16348_v62 }
  0xe0   :  { %13818 = vmatpush3.msra.mxu0 %v15620_v3  ;;  %13819 = vmatprep.mubr.msk.f32.mxu0 %vm234_vm0, %v15968_v37 }
  0xe1   :  { %13832 = vmatpush3.msra.mxu1 %v15620_v3  ;;  %13833 = vmatprep.mubr.msk.f32.mxu1 %vm234_vm0, %v15972_v36  ;;  %v19541_v3 = vld [vmem:[#allocation26_spill] sm:$0xff] }
  0xe2   :  { %13820 = vmatmul.mubr.msk.f32.vlgmr.msra.gmra.mxu0 %vm234_vm0, %v15976_v35  ;;  %13834 = vmatmul.mubr.msk.f32.vlgmr.msra.gmra.mxu1 %vm234_vm0, %v15978_v34 }
  0xe3   :  { %13839 = vmatprep.subr.mxu0 %v15783_v32  ;;  %13853 = vmatprep.subr.mxu1 %v15783_v32 }
  0xe4   :  { %13840 = vmatpush3.msra.mxu0 %v15783_v32  ;;  %13854 = vmatpush3.msra.mxu1 %v15783_v32 }
  0xe5   :  { %13841 = vmatprep.subr.mxu0 %v15792_v33  ;;  %13855 = vmatprep.subr.mxu1 %v15792_v33 }
  0xe6   :  { %13822 = vmatprep.mubr.msk.f32.mxu0 %vm234_vm0, %v15992_v31  ;;  %13836 = vmatprep.mubr.msk.f32.mxu1 %vm234_vm0, %v15994_v30 }
  0xe7   :  { %13842 = vmatpush3.msra.mxu0 %v15792_v33  ;;  %13856 = vmatpush3.msra.mxu1 %v15792_v33 }
  0xe8   :  { %13823 = vmatmul.mubr.msk.f32.gmra.mxu0 %vm234_vm0, %v16000_v29  ;;  %13837 = vmatmul.mubr.msk.f32.gmra.mxu1 %vm234_vm0, %v16002_v28 }
  0xe9   :  { %13843 = vmatprep.subr.mxu0 %v15812_v38  ;;  %13857 = vmatprep.subr.mxu1 %v15812_v38 }
  0xea   :  { %13844 = vmatpush3.msra.mxu0 %v15812_v38  ;;  %13858 = vmatpush3.msra.mxu1 %v15812_v38 }
  0xeb   :  { %13845 = vmatprep.subr.mxu0 %v15820_v39  ;;  %13859 = vmatprep.subr.mxu1 %v15820_v39 }
  0xec   :  { %13846 = vmatpush3.msra.mxu0 %v15820_v39  ;;  %13847 = vmatprep.mubr.msk.f32.mxu0 %vm234_vm0, %v15624_v4  ;;  %v19542_v4 = vld [vmem:[#allocation27_spill] sm:$0xff] }
  0xed   :  { %13860 = vmatpush3.msra.mxu1 %v15820_v39  ;;  %13861 = vmatprep.mubr.msk.f32.mxu1 %vm234_vm0, %v15628_v5  ;;  %v19543_v5 = vld [vmem:[#allocation28_spill] sm:$0xff] }
  0xee   :  { %13848 = vmatmul.mubr.msk.f32.vlgmr.msra.gmra.mxu0 %vm234_vm0, %v15632_v6  ;;  %13862 = vmatmul.mubr.msk.f32.vlgmr.msra.gmra.mxu1 %vm234_vm0, %v15634_v7  ;;  %v16258_v6 = vld [vmem:[#allocation2] sm:$0xff]  ;;  %v19545_v7 = vld [vmem:[#allocation29_spill] sm:$0xff] }
  0xef   :  { %13867 = vmatprep.subr.mxu0 %v15783_v32  ;;  %13881 = vmatprep.subr.mxu1 %v15783_v32  ;;  %19544 = vst [vmem:[#allocation23_spill] sm:$0xff] %v16258_v6 }
  0xf0   :  { %13868 = vmatpush3.msra.mxu0 %v15783_v32  ;;  %13882 = vmatpush3.msra.mxu1 %v15783_v32 }
  0xf1   :  { %13869 = vmatprep.subr.mxu0 %v15792_v33  ;;  %13883 = vmatprep.subr.mxu1 %v15792_v33 }
  0xf2   :  { %13850 = vmatprep.mubr.msk.f32.mxu0 %vm234_vm0, %v15648_v8  ;;  %13864 = vmatprep.mubr.msk.f32.mxu1 %vm234_vm0, %v15650_v9  ;;  %v19546_v8 = vld [vmem:[#allocation30_spill] sm:$0xff] }
  0xf3   :  { %13870 = vmatpush3.msra.mxu0 %v15792_v33  ;;  %13884 = vmatpush3.msra.mxu1 %v15792_v33 }
  0xf4   :  { %13851 = vmatmul.mubr.msk.f32.gmra.mxu0 %vm234_vm0, %v15656_v10  ;;  %13865 = vmatmul.mubr.msk.f32.gmra.mxu1 %vm234_vm0, %v15658_v11 }
  0xf5   :  { %13871 = vmatprep.subr.mxu0 %v15812_v38  ;;  %13885 = vmatprep.subr.mxu1 %v15812_v38 }
  0xf6   :  { %13872 = vmatpush3.msra.mxu0 %v15812_v38  ;;  %13886 = vmatpush3.msra.mxu1 %v15812_v38 }
  0xf7   :  { %13873 = vmatprep.subr.mxu0 %v15820_v39  ;;  %13887 = vmatprep.subr.mxu1 %v15820_v39 }
  0xf8   :  { %13874 = vmatpush3.msra.mxu0 %v15820_v39  ;;  %13875 = vmatprep.mubr.msk.f32.mxu0 %vm234_vm0, %v15672_v12 }
  0xf9   :  { %13888 = vmatpush3.msra.mxu1 %v15820_v39  ;;  %13889 = vmatprep.mubr.msk.f32.mxu1 %vm234_vm0, %v15676_v13 }
  0xfa   :  { %13876 = vmatmul.mubr.msk.f32.vlgmr.msra.gmra.mxu0 %vm234_vm0, %v15680_v14  ;;  %13890 = vmatmul.mubr.msk.f32.vlgmr.msra.gmra.mxu1 %vm234_vm0, %v15682_v15 }
  0xfb   :  { %13895 = vmatprep.subr.mxu0 %v15783_v32  ;;  %13909 = vmatprep.subr.mxu1 %v15783_v32 }
  0xfc   :  { %13896 = vmatpush3.msra.mxu0 %v15783_v32  ;;  %13910 = vmatpush3.msra.mxu1 %v15783_v32 }
  0xfd   :  { %13897 = vmatprep.subr.mxu0 %v15792_v33  ;;  %13911 = vmatprep.subr.mxu1 %v15792_v33 }
  0xfe   :  { %13878 = vmatprep.mubr.msk.f32.mxu0 %vm234_vm0, %v15696_v16  ;;  %13892 = vmatprep.mubr.msk.f32.mxu1 %vm234_vm0, %v15698_v17 }
  0xff   :  { %13898 = vmatpush3.msra.mxu0 %v15792_v33  ;;  %13912 = vmatpush3.msra.mxu1 %v15792_v33 }
 0x100   :  { %13879 = vmatmul.mubr.msk.f32.gmra.mxu0 %vm234_vm0, %v15704_v18  ;;  %13893 = vmatmul.mubr.msk.f32.gmra.mxu1 %vm234_vm0, %v15706_v19 }
 0x101   :  { %13899 = vmatprep.subr.mxu0 %v15812_v38  ;;  %13913 = vmatprep.subr.mxu1 %v15812_v38 }
 0x102   :  { %13900 = vmatpush3.msra.mxu0 %v15812_v38  ;;  %13914 = vmatpush3.msra.mxu1 %v15812_v38 }
 0x103   :  { %13901 = vmatprep.subr.mxu0 %v15820_v39  ;;  %13915 = vmatprep.subr.mxu1 %v15820_v39 }
 0x104   :  { %13902 = vmatpush3.msra.mxu0 %v15820_v39  ;;  %13903 = vmatprep.mubr.msk.f32.mxu0 %vm234_vm0, %v15720_v20 }
 0x105   :  { %13916 = vmatpush3.msra.mxu1 %v15820_v39  ;;  %13917 = vmatprep.mubr.msk.f32.mxu1 %vm234_vm0, %v15724_v21 }
 0x106   :  { %13904 = vmatmul.mubr.msk.f32.vlgmr.msra.gmra.mxu0 %vm234_vm0, %v15728_v22  ;;  %13918 = vmatmul.mubr.msk.f32.vlgmr.msra.gmra.mxu1 %vm234_vm0, %v15730_v23 }
 0x107   :  { %13923 = vmatprep.subr.mxu0 %v15783_v32  ;;  %13937 = vmatprep.subr.mxu1 %v15783_v32 }
 0x108   :  { %13924 = vmatpush3.msra.mxu0 %v15783_v32  ;;  %13938 = vmatpush3.msra.mxu1 %v15783_v32 }
 0x109   :  { %13925 = vmatprep.subr.mxu0 %v15792_v33  ;;  %13939 = vmatprep.subr.mxu1 %v15792_v33 }
 0x10a   :  { %13906 = vmatprep.mubr.msk.f32.mxu0 %vm234_vm0, %v15744_v24  ;;  %13920 = vmatprep.mubr.msk.f32.mxu1 %vm234_vm0, %v15746_v25 }
 0x10b   :  { %13926 = vmatpush3.msra.mxu0 %v15792_v33  ;;  %13940 = vmatpush3.msra.mxu1 %v15792_v33 }
 0x10c   :  { %13907 = vmatmul.mubr.msk.f32.gmra.mxu0 %vm234_vm0, %v15752_v26  ;;  %13921 = vmatmul.mubr.msk.f32.gmra.mxu1 %vm234_vm0, %v15754_v27 }
 0x10d   :  { %13927 = vmatprep.subr.mxu0 %v15812_v38  ;;  %13941 = vmatprep.subr.mxu1 %v15812_v38 }
 0x10e   :  { %13928 = vmatpush3.msra.mxu0 %v15812_v38  ;;  %13942 = vmatpush3.msra.mxu1 %v15812_v38 }
 0x10f   :  { %13929 = vmatprep.subr.mxu0 %v15820_v39  ;;  %13943 = vmatprep.subr.mxu1 %v15820_v39 }
 0x110   :  { %13930 = vmatpush3.msra.mxu0 %v15820_v39  ;;  %13931 = vmatprep.mubr.msk.f32.mxu0 %vm234_vm0, %v19538_v0 }
 0x111   :  { %13944 = vmatpush3.msra.mxu1 %v15820_v39  ;;  %13945 = vmatprep.mubr.msk.f32.mxu1 %vm234_vm0, %v19539_v1 }
 0x112   :  { %13932 = vmatmul.mubr.msk.f32.vlgmr.msra.gmra.mxu0 %vm234_vm0, %v19540_v2  ;;  %13946 = vmatmul.mubr.msk.f32.vlgmr.msra.gmra.mxu1 %vm234_vm0, %v19541_v3 }
 0x113   :  { %13934 = vmatprep.mubr.msk.f32.mxu0 %vm234_vm0, %v19542_v4  ;;  %13948 = vmatprep.mubr.msk.f32.mxu1 %vm234_vm0, %v19543_v5 }
 0x116   :  { %13935 = vmatmul.mubr.msk.f32.gmra.mxu0 %vm234_vm0, %v19545_v7  ;;  %13949 = vmatmul.mubr.msk.f32.gmra.mxu1 %vm234_vm0, %v19546_v8 }
 0x117   :  { %13959 = vmatprep.mubr.msk.f32.mxu0 %vm234_vm0, %v16258_v6  ;;  %13973 = vmatprep.mubr.msk.f32.mxu1 %vm234_vm0, %v16258_v6 }
 0x11e   :  { %v13513_v9 = vpop.f32.mrf.mxu0  ;;  %v13527_v10 = vpop.f32.mrf.mxu1 }
 0x120   :  { %v313_v11 = vpop.f32.mrf.mxu0  ;;  %v410_v12 = vpop.f32.mrf.mxu1 }
 0x124   :  { %v13516_v13 = vpop.f32.mrf.mxu0  ;;  %v13530_v14 = vpop.f32.mrf.mxu1 }
 0x126   :  { %v323_v15 = vpop.f32.mrf.mxu0  ;;  %v420_v16 = vpop.f32.mrf.mxu1 }
 0x12a   :  { %v16268_v17 = vpop.f32.mrf.mxu0  ;;  %v16270_v18 = vpop.f32.mrf.mxu1 }
 0x12c   :  { %v16272_v19 = vpop.f32.mrf.mxu0  ;;  %v16274_v20 = vpop.f32.mrf.mxu1 }
 0x130   :  { %v16276_v21 = vpop.f32.mrf.mxu0  ;;  %v16278_v22 = vpop.f32.mrf.mxu1 }
 0x132   :  { %v16280_v23 = vpop.f32.mrf.mxu0  ;;  %v16282_v24 = vpop.f32.mrf.mxu1 }
 0x136   :  { %v16284_v25 = vpop.f32.mrf.mxu0  ;;  %v16286_v26 = vpop.f32.mrf.mxu1 }
 0x138   :  { %v16288_v27 = vpop.f32.mrf.mxu0  ;;  %v16290_v28 = vpop.f32.mrf.mxu1 }
 0x13c   :  { %v16292_v29 = vpop.f32.mrf.mxu0  ;;  %v16294_v30 = vpop.f32.mrf.mxu1 }
 0x13e   :  { %v16296_v31 = vpop.f32.mrf.mxu0  ;;  %v16298_v32 = vpop.f32.mrf.mxu1 }
 0x142   :  { %v16300_v33 = vpop.f32.mrf.mxu0  ;;  %v16302_v34 = vpop.f32.mrf.mxu1 }
 0x144   :  { %v16304_v35 = vpop.f32.mrf.mxu0  ;;  %v16306_v36 = vpop.f32.mrf.mxu1 }
 0x148   :  { %v16308_v37 = vpop.f32.mrf.mxu0  ;;  %v16310_v38 = vpop.f32.mrf.mxu1 }
 0x14a   :  { %v16312_v39 = vpop.f32.mrf.mxu0  ;;  %v16314_v40 = vpop.f32.mrf.mxu1 }
 0x14e   :  { %v13625_v41 = vpop.f32.mrf.mxu0  ;;  %v13639_v42 = vpop.f32.mrf.mxu1 }
 0x14f   :  { %v16328_v53 = vsub.f32 %v13513_v9, %v13625_v41  ;;  %v16330_v54 = vsub.f32 %v13527_v10, %v13639_v42  ;;  %v16384_v10 = vld [vmem:[#allocation2 + $0x18] sm:$0xff] }
 0x150   :  { %v1089_v43 = vpop.f32.mrf.mxu0  ;;  %v1186_v44 = vpop.f32.mrf.mxu1  ;;  %19549 = vst [vmem:[#allocation26_spill] sm:$0xff] %v16384_v10 }
 0x151   :  { %v16336_v57 = vsub.f32 %v313_v11, %v1089_v43  ;;  %v16338_v58 = vsub.f32 %v410_v12, %v1186_v44 }
 0x154   :  { %v13628_v45 = vpop.f32.mrf.mxu0  ;;  %v13642_v46 = vpop.f32.mrf.mxu1 }
 0x155   :  { %v16316_v47 = vsub.f32 %v13516_v13, %v13628_v45  ;;  %v16318_v48 = vsub.f32 %v13530_v14, %v13642_v46 }
 0x156   :  { %v1099_v49 = vpop.f32.mrf.mxu0  ;;  %v1196_v50 = vpop.f32.mrf.mxu1 }
 0x157   :  { %v16320_v51 = vsub.f32 %v323_v15, %v1099_v49  ;;  %v16322_v52 = vsub.f32 %v420_v16, %v1196_v50  ;;  %13951 = vmatprep.subr.mxu0 %v16316_v47  ;;  %13965 = vmatprep.subr.mxu1 %v16318_v48 }
 0x158   :  { %13952 = vmatpush3.msra.mxu0 %v16316_v47  ;;  %13966 = vmatpush3.msra.mxu1 %v16318_v48 }
 0x159   :  { %13953 = vmatprep.subr.mxu0 %v16320_v51  ;;  %13967 = vmatprep.subr.mxu1 %v16322_v52 }
 0x15a   :  { %v13653_v55 = vpop.f32.mrf.mxu0  ;;  %v13667_v56 = vpop.f32.mrf.mxu1  ;;  %13954 = vmatpush3.msra.mxu0 %v16320_v51  ;;  %13968 = vmatpush3.msra.mxu1 %v16322_v52 }
 0x15b   :  { %13955 = vmatprep.subr.mxu0 %v16328_v53  ;;  %13969 = vmatprep.subr.mxu1 %v16330_v54  ;;  %v16377_v8 = vsub.f32 %v16268_v17, %v13653_v55  ;;  %v16380_v9 = vsub.f32 %v16270_v18, %v13667_v56 }
 0x15c   :  { %v1283_v59 = vpop.f32.mrf.mxu0  ;;  %v1380_v60 = vpop.f32.mrf.mxu1  ;;  %13956 = vmatpush3.msra.mxu0 %v16328_v53  ;;  %13970 = vmatpush3.msra.mxu1 %v16330_v54 }
 0x15d   :  { %13957 = vmatprep.subr.mxu0 %v16336_v57  ;;  %13971 = vmatprep.subr.mxu1 %v16338_v58  ;;  %v16391_v13 = vsub.f32 %v16272_v19, %v1283_v59  ;;  %v16394_v14 = vsub.f32 %v16274_v20, %v1380_v60 }
 0x15e   :  { %13958 = vmatpush3.msra.mxu0 %v16336_v57  ;;  %13972 = vmatpush3.msra.mxu1 %v16338_v58 }
 0x15f   :  { %13960 = vmatmul.mubr.msk.f32.vlgmr.msra.gmra.mxu0 %vm234_vm0, %v16344_v61  ;;  %13974 = vmatmul.mubr.msk.f32.vlgmr.msra.gmra.mxu1 %vm234_vm0, %v16344_v61 }
 0x160   :  { %v13656_v63 = vpop.f32.mrf.mxu0  ;;  %v13670_v0 = vpop.f32.mrf.mxu1  ;;  %13962 = vmatprep.mubr.msk.f32.mxu0 %vm234_vm0, %v16348_v62  ;;  %13976 = vmatprep.mubr.msk.f32.mxu1 %vm234_vm0, %v16348_v62 }
 0x161   :  { %v16361_v1 = vsub.f32 %v16276_v21, %v13656_v63  ;;  %v16364_v2 = vsub.f32 %v16278_v22, %v13670_v0  ;;  %v16538_v63 = vld [vmem:[#allocation2 + $0x20] sm:$0xff] }
 0x162   :  { %v1293_v3 = vpop.f32.mrf.mxu0  ;;  %v1390_v4 = vpop.f32.mrf.mxu1 }
 0x163   :  { %v16367_v5 = vsub.f32 %v16280_v23, %v1293_v3  ;;  %v16370_v7 = vsub.f32 %v16282_v24, %v1390_v4  ;;  %13979 = vmatprep.subr.mxu0 %v16361_v1  ;;  %13993 = vmatprep.subr.mxu1 %v16364_v2 }
 0x164   :  { %13980 = vmatpush3.msra.mxu0 %v16361_v1  ;;  %13994 = vmatpush3.msra.mxu1 %v16364_v2 }
 0x165   :  { %13981 = vmatprep.subr.mxu0 %v16367_v5  ;;  %13995 = vmatprep.subr.mxu1 %v16370_v7 }
 0x166   :  { %v13681_v11 = vpop.f32.mrf.mxu0  ;;  %v13695_v12 = vpop.f32.mrf.mxu1  ;;  %13982 = vmatpush3.msra.mxu0 %v16367_v5  ;;  %13996 = vmatpush3.msra.mxu1 %v16370_v7 }
 0x167   :  { %13983 = vmatprep.subr.mxu0 %v16377_v8  ;;  %13997 = vmatprep.subr.mxu1 %v16380_v9 }
 0x168   :  { %v1477_v15 = vpop.f32.mrf.mxu0  ;;  %v1574_v16 = vpop.f32.mrf.mxu1  ;;  %13963 = vmatmul.mubr.msk.f32.gmra.mxu0 %vm234_vm0, %v16384_v10  ;;  %13977 = vmatmul.mubr.msk.f32.gmra.mxu1 %vm234_vm0, %v16384_v10 }
 0x169   :  { %13984 = vmatpush3.msra.mxu0 %v16377_v8  ;;  %13998 = vmatpush3.msra.mxu1 %v16380_v9 }
 0x16a   :  { %13985 = vmatprep.subr.mxu0 %v16391_v13  ;;  %13999 = vmatprep.subr.mxu1 %v16394_v14 }
 0x16b   :  { %13986 = vmatpush3.msra.mxu0 %v16391_v13  ;;  %14000 = vmatpush3.msra.mxu1 %v16394_v14 }
 0x16c   :  { %v13684_v17 = vpop.f32.mrf.mxu0  ;;  %v13698_v18 = vpop.f32.mrf.mxu1  ;;  %13987 = vmatprep.mubr.msk.f32.mxu0 %vm234_vm0, %v16258_v6  ;;  %14001 = vmatprep.mubr.msk.f32.mxu1 %vm234_vm0, %v16258_v6 }
 0x16d   :  { %v16411_v19 = vsub.f32 %v16292_v29, %v13684_v17  ;;  %v16414_v20 = vsub.f32 %v16294_v30, %v13698_v18  ;;  %13988 = vmatmul.mubr.msk.f32.vlgmr.msra.gmra.mxu0 %vm234_vm0, %v16344_v61  ;;  %14002 = vmatmul.mubr.msk.f32.vlgmr.msra.gmra.mxu1 %vm234_vm0, %v16344_v61  ;;  %v16435_v29 = vsub.f32 %v16284_v25, %v13681_v11 }
 0x16e   :  { %v1487_v21 = vpop.f32.mrf.mxu0  ;;  %v1584_v22 = vpop.f32.mrf.mxu1  ;;  %13990 = vmatprep.mubr.msk.f32.mxu0 %vm234_vm0, %v16348_v62  ;;  %14004 = vmatprep.mubr.msk.f32.mxu1 %vm234_vm0, %v16348_v62  ;;  %v16438_v30 = vsub.f32 %v16286_v26, %v13695_v12  ;;  %v16447_v25 = vsub.f32 %v16288_v27, %v1477_v15  ;;  %v16450_v26 = vsub.f32 %v16290_v28, %v1574_v16 }
 0x16f   :  { %v16425_v23 = vsub.f32 %v16296_v31, %v1487_v21  ;;  %v16428_v24 = vsub.f32 %v16298_v32, %v1584_v22  ;;  %14007 = vmatprep.subr.mxu0 %v16411_v19  ;;  %14021 = vmatprep.subr.mxu1 %v16414_v20  ;;  %19552 = vst [vmem:[#allocation29_spill] sm:$0xff] %v16435_v29 }
 0x170   :  { %14008 = vmatpush3.msra.mxu0 %v16411_v19  ;;  %14022 = vmatpush3.msra.mxu1 %v16414_v20  ;;  %19553 = vst [vmem:[#allocation30_spill] sm:$0xff] %v16438_v30  ;;  %19554 = vst [vmem:[#allocation31_spill] sm:$0xff] %v16447_v25 }
 0x171   :  { %19550 = vst [vmem:[#allocation27_spill] sm:$0xff] %v16425_v23  ;;  %19551 = vst [vmem:[#allocation28_spill] sm:$0xff] %v16428_v24  ;;  %14009 = vmatprep.subr.mxu0 %v16425_v23  ;;  %14023 = vmatprep.subr.mxu1 %v16428_v24 }
 0x172   :  { %v13709_v31 = vpop.f32.mrf.mxu0  ;;  %v13723_v32 = vpop.f32.mrf.mxu1  ;;  %14010 = vmatpush3.msra.mxu0 %v16425_v23  ;;  %14024 = vmatpush3.msra.mxu1 %v16428_v24  ;;  %19555 = vst [vmem:[#allocation32_spill] sm:$0xff] %v16450_v26 }
 0x173   :  { %14011 = vmatprep.subr.mxu0 %v16435_v29  ;;  %14025 = vmatprep.subr.mxu1 %v16438_v30  ;;  %v16491_v49 = vsub.f32 %v16300_v33, %v13709_v31  ;;  %v16494_v50 = vsub.f32 %v16302_v34, %v13723_v32 }
 0x174   :  { %v1671_v41 = vpop.f32.mrf.mxu0  ;;  %v1768_v42 = vpop.f32.mrf.mxu1  ;;  %13991 = vmatmul.mubr.msk.f32.gmra.mxu0 %vm234_vm0, %v16384_v10  ;;  %14005 = vmatmul.mubr.msk.f32.gmra.mxu1 %vm234_vm0, %v16384_v10 }
 0x175   :  { %14012 = vmatpush3.msra.mxu0 %v16435_v29  ;;  %14026 = vmatpush3.msra.mxu1 %v16438_v30  ;;  %19560 = vst [vmem:[#allocation37_spill] sm:$0xff] %v16491_v49  ;;  %19561 = vst [vmem:[#allocation38_spill] sm:$0xff] %v16494_v50  ;;  %v16505_v55 = vsub.f32 %v16304_v35, %v1671_v41  ;;  %v16508_v33 = vsub.f32 %v16306_v36, %v1768_v42 }
 0x176   :  { %14013 = vmatprep.subr.mxu0 %v16447_v25  ;;  %14027 = vmatprep.subr.mxu1 %v16450_v26 }
 0x177   :  { %14014 = vmatpush3.msra.mxu0 %v16447_v25  ;;  %14028 = vmatpush3.msra.mxu1 %v16450_v26  ;;  %19562 = vst [vmem:[#allocation39_spill] sm:$0xff] %v16505_v55  ;;  %19563 = vst [vmem:[#allocation40_spill] sm:$0xff] %v16508_v33 }
 0x178   :  { %v13712_v27 = vpop.f32.mrf.mxu0  ;;  %v13726_v28 = vpop.f32.mrf.mxu1  ;;  %14015 = vmatprep.mubr.msk.f32.mxu0 %vm234_vm0, %v16258_v6  ;;  %14029 = vmatprep.mubr.msk.f32.mxu1 %vm234_vm0, %v16258_v6 }
 0x179   :  { %v16467_v43 = vsub.f32 %v16308_v37, %v13712_v27  ;;  %v16470_v44 = vsub.f32 %v16310_v38, %v13726_v28  ;;  %14016 = vmatmul.mubr.msk.f32.vlgmr.msra.gmra.mxu0 %vm234_vm0, %v16344_v61  ;;  %14030 = vmatmul.mubr.msk.f32.vlgmr.msra.gmra.mxu1 %vm234_vm0, %v16344_v61 }
 0x17a   :  { %v1681_v45 = vpop.f32.mrf.mxu0  ;;  %v1778_v46 = vpop.f32.mrf.mxu1  ;;  %14018 = vmatprep.mubr.msk.f32.mxu0 %vm234_vm0, %v16348_v62  ;;  %14032 = vmatprep.mubr.msk.f32.mxu1 %vm234_vm0, %v16348_v62 }
 0x17b   :  { %19556 = vst [vmem:[#allocation33_spill] sm:$0xff] %v16467_v43  ;;  %19557 = vst [vmem:[#allocation34_spill] sm:$0xff] %v16470_v44  ;;  %v16481_v37 = vsub.f32 %v16312_v39, %v1681_v45  ;;  %v16484_v38 = vsub.f32 %v16314_v40, %v1778_v46  ;;  %14035 = vmatprep.subr.mxu0 %v16467_v43  ;;  %14049 = vmatprep.subr.mxu1 %v16470_v44 }
 0x17c   :  { %14036 = vmatpush3.msra.mxu0 %v16467_v43  ;;  %14050 = vmatpush3.msra.mxu1 %v16470_v44 }
 0x17d   :  { %19558 = vst [vmem:[#allocation35_spill] sm:$0xff] %v16481_v37  ;;  %19559 = vst [vmem:[#allocation36_spill] sm:$0xff] %v16484_v38  ;;  %14037 = vmatprep.subr.mxu0 %v16481_v37  ;;  %14051 = vmatprep.subr.mxu1 %v16484_v38 }
 0x17e   :  { %v16498_v39 = vpop.f32.mrf.mxu0  ;;  %v16500_v40 = vpop.f32.mrf.mxu1  ;;  %14038 = vmatpush3.msra.mxu0 %v16481_v37  ;;  %14052 = vmatpush3.msra.mxu1 %v16484_v38 }
 0x17f   :  { %14039 = vmatprep.subr.mxu0 %v16491_v49  ;;  %14053 = vmatprep.subr.mxu1 %v16494_v50 }
 0x180   :  { %v16512_v34 = vpop.f32.mrf.mxu0  ;;  %v16514_v56 = vpop.f32.mrf.mxu1  ;;  %14040 = vmatpush3.msra.mxu0 %v16491_v49  ;;  %14054 = vmatpush3.msra.mxu1 %v16494_v50 }
 0x181   :  { %14041 = vmatprep.subr.mxu0 %v16505_v55  ;;  %14055 = vmatprep.subr.mxu1 %v16508_v33 }
 0x182   :  { %14042 = vmatpush3.msra.mxu0 %v16505_v55  ;;  %14056 = vmatpush3.msra.mxu1 %v16508_v33 }
 0x183   :  { %14019 = vmatmul.mubr.msk.f32.gmra.mxu0 %vm234_vm0, %v16384_v10  ;;  %14033 = vmatmul.mubr.msk.f32.gmra.mxu1 %vm234_vm0, %v16384_v10 }
 0x184   :  { %v13740_v35 = vpop.f32.mrf.mxu0  ;;  %v13754_v36 = vpop.f32.mrf.mxu1  ;;  %14043 = vmatprep.mubr.msk.f32.mxu0 %vm234_vm0, %v16258_v6  ;;  %14057 = vmatprep.mubr.msk.f32.mxu1 %vm234_vm0, %v16258_v6 }
 0x186   :  { %v1895_v59 = vpop.f32.mrf.mxu0  ;;  %v1980_v60 = vpop.f32.mrf.mxu1 }
 0x187   :  { %14044 = vmatmul.mubr.msk.f32.vlgmr.msra.gmra.mxu0 %vm234_vm0, %v16344_v61  ;;  %14058 = vmatmul.mubr.msk.f32.vlgmr.msra.gmra.mxu1 %vm234_vm0, %v16344_v61 }
 0x188   :  { %14046 = vmatprep.mubr.msk.f32.mxu0 %vm234_vm0, %v16348_v62  ;;  %14060 = vmatprep.mubr.msk.f32.mxu1 %vm234_vm0, %v16348_v62 }
 0x18a   :  { %v16540_v0 = vpop.f32.mrf.mxu0  ;;  %v16542_v3 = vpop.f32.mrf.mxu1 }
 0x18b   :  { %14047 = vmatmul.mubr.msk.f32.gmra.mxu0 %vm234_vm0, %v16384_v10  ;;  %14061 = vmatmul.mubr.msk.f32.gmra.mxu1 %vm234_vm0, %v16384_v10 }
 0x18c   :  { %v16548_v4 = vpop.f32.mrf.mxu0  ;;  %v16550_v11 = vpop.f32.mrf.mxu1  ;;  %14071 = vmatprep.mubr.msk.f32.mxu0 %vm234_vm0, %v16538_v63  ;;  %14085 = vmatprep.mubr.msk.f32.mxu1 %vm234_vm0, %v16538_v63 }
 0x190   :  { %v16556_v12 = vpop.f32.mrf.mxu0  ;;  %v16558_v15 = vpop.f32.mrf.mxu1 }
 0x192   :  { %v16560_v16 = vpop.f32.mrf.mxu0  ;;  %v16562_v17 = vpop.f32.mrf.mxu1 }
 0x196   :  { %v16564_v18 = vpop.f32.mrf.mxu0  ;;  %v16566_v21 = vpop.f32.mrf.mxu1 }
 0x198   :  { %v16568_v22 = vpop.f32.mrf.mxu0  ;;  %v16570_v31 = vpop.f32.mrf.mxu1 }
 0x19c   :  { %v16572_v32 = vpop.f32.mrf.mxu0  ;;  %v16574_v41 = vpop.f32.mrf.mxu1 }
 0x19e   :  { %v16576_v42 = vpop.f32.mrf.mxu0  ;;  %v16578_v27 = vpop.f32.mrf.mxu1 }
 0x1a2   :  { %v16580_v28 = vpop.f32.mrf.mxu0  ;;  %v16582_v45 = vpop.f32.mrf.mxu1 }
 0x1a4   :  { %v16584_v46 = vpop.f32.mrf.mxu0  ;;  %v16586_v10 = vpop.f32.mrf.mxu1 }
 0x1a8   :  { %v16588_v62 = vpop.f32.mrf.mxu0  ;;  %v16590_v61 = vpop.f32.mrf.mxu1 }
 0x1aa   :  { %v16592_v6 = vpop.f32.mrf.mxu0  ;;  %v16594_v33 = vpop.f32.mrf.mxu1 }
 0x1ae   :  { %v13849_v55 = vpop.f32.mrf.mxu0  ;;  %v13863_v50 = vpop.f32.mrf.mxu1 }
 0x1af   :  { %v16609_v23 = vadd.f32 %v13849_v55, %v16498_v39 }
 0x1b0   :  { %v2565_v49 = vpop.f32.mrf.mxu0  ;;  %v2650_v38 = vpop.f32.mrf.mxu1 }
 0x1b4   :  { %v13852_v37 = vpop.f32.mrf.mxu0  ;;  %v13866_v44 = vpop.f32.mrf.mxu1 }
 0x1b5   :  { %v16596_v43 = vadd.f32 %v13852_v37, %v13740_v35  ;;  %v16598_v26 = vadd.f32 %v13866_v44, %v13754_v36  ;;  %v16612_v44 = vadd.f32 %v13863_v50, %v16500_v40  ;;  %v16619_v37 = vadd.f32 %v2565_v49, %v16512_v34  ;;  %v16628_v40 = vld [vmem:[#allocation2 + $0x28] sm:$0xff]  ;;  %v16632_v49 = vld [vmem:[#allocation2 + $0x30] sm:$0xff] }
 0x1b6   :  { %v2575_v25 = vpop.f32.mrf.mxu0  ;;  %v2660_v30 = vpop.f32.mrf.mxu1  ;;  %v16622_v35 = vadd.f32 %v2650_v38, %v16514_v56 }
 0x1b7   :  { %v16600_v29 = vadd.f32 %v2575_v25, %v1895_v59  ;;  %v16602_v24 = vadd.f32 %v2660_v30, %v1980_v60  ;;  %14063 = vmatprep.subr.mxu0 %v16596_v43  ;;  %14077 = vmatprep.subr.mxu1 %v16598_v26 }
 0x1b8   :  { %14064 = vmatpush3.msra.mxu0 %v16596_v43  ;;  %14078 = vmatpush3.msra.mxu1 %v16598_v26  ;;  %19564 = vst [vmem:[#allocation41_spill] sm:$0xff] %v16622_v35 }
 0x1b9   :  { %14065 = vmatprep.subr.mxu0 %v16600_v29  ;;  %14079 = vmatprep.subr.mxu1 %v16602_v24 }
 0x1ba   :  { %v13877_v30 = vpop.f32.mrf.mxu0  ;;  %v13891_v25 = vpop.f32.mrf.mxu1  ;;  %14066 = vmatpush3.msra.mxu0 %v16600_v29  ;;  %14080 = vmatpush3.msra.mxu1 %v16602_v24 }
 0x1bb   :  { %14067 = vmatprep.subr.mxu0 %v16609_v23  ;;  %14081 = vmatprep.subr.mxu1 %v16612_v44 }
 0x1bc   :  { %v2735_v50 = vpop.f32.mrf.mxu0  ;;  %v2820_v39 = vpop.f32.mrf.mxu1  ;;  %14068 = vmatpush3.msra.mxu0 %v16609_v23  ;;  %14082 = vmatpush3.msra.mxu1 %v16612_v44 }
 0x1bd   :  { %14069 = vmatprep.subr.mxu0 %v16619_v37  ;;  %14083 = vmatprep.subr.mxu1 %v16622_v35 }
 0x1be   :  { %14070 = vmatpush3.msra.mxu0 %v16619_v37  ;;  %14084 = vmatpush3.msra.mxu1 %v16622_v35 }
 0x1bf   :  { %14072 = vmatmul.mubr.msk.f32.vlgmr.msra.gmra.mxu0 %vm234_vm0, %v16628_v40  ;;  %14086 = vmatmul.mubr.msk.f32.vlgmr.msra.gmra.mxu1 %vm234_vm0, %v16628_v40 }
 0x1c0   :  { %v13880_v38 = vpop.f32.mrf.mxu0  ;;  %v13894_v55 = vpop.f32.mrf.mxu1  ;;  %14074 = vmatprep.mubr.msk.f32.mxu0 %vm234_vm0, %v16632_v49  ;;  %14088 = vmatprep.mubr.msk.f32.mxu1 %vm234_vm0, %v16632_v49 }
 0x1c1   :  { %v16645_v34 = vadd.f32 %v13880_v38, %v16556_v12  ;;  %v16648_v56 = vadd.f32 %v13894_v55, %v16558_v15  ;;  %v16660_v12 = vld [vmem:[#allocation2 + $0x38] sm:$0xff]  ;;  %v16665_v15 = vadd.f32 %v13877_v30, %v16540_v0  ;;  %v16677_v55 = vadd.f32 %v2735_v50, %v16548_v4 }
 0x1c2   :  { %v2745_v36 = vpop.f32.mrf.mxu0  ;;  %v2830_v59 = vpop.f32.mrf.mxu1  ;;  %v16680_v0 = vadd.f32 %v2820_v39, %v16550_v11 }
 0x1c3   :  { %v16651_v60 = vadd.f32 %v2745_v36, %v16560_v16  ;;  %v16654_v35 = vadd.f32 %v2830_v59, %v16562_v17  ;;  %14091 = vmatprep.subr.mxu0 %v16645_v34  ;;  %14105 = vmatprep.subr.mxu1 %v16648_v56  ;;  %v16668_v16 = vadd.f32 %v13891_v25, %v16542_v3 }
 0x1c4   :  { %14092 = vmatpush3.msra.mxu0 %v16645_v34  ;;  %14106 = vmatpush3.msra.mxu1 %v16648_v56 }
 0x1c5   :  { %14093 = vmatprep.subr.mxu0 %v16651_v60  ;;  %14107 = vmatprep.subr.mxu1 %v16654_v35 }
 0x1c6   :  { %v13905_v17 = vpop.f32.mrf.mxu0  ;;  %v13919_v38 = vpop.f32.mrf.mxu1  ;;  %14094 = vmatpush3.msra.mxu0 %v16651_v60  ;;  %14108 = vmatpush3.msra.mxu1 %v16654_v35 }
 0x1c7   :  { %14075 = vmatmul.mubr.msk.f32.gmra.mxu0 %vm234_vm0, %v16660_v12  ;;  %14089 = vmatmul.mubr.msk.f32.gmra.mxu1 %vm234_vm0, %v16660_v12  ;;  %v16721_v59 = vadd.f32 %v13905_v17, %v16564_v18 }
 0x1c8   :  { %v2905_v3 = vpop.f32.mrf.mxu0  ;;  %v2990_v30 = vpop.f32.mrf.mxu1  ;;  %14095 = vmatprep.subr.mxu0 %v16665_v15  ;;  %14109 = vmatprep.subr.mxu1 %v16668_v16 }
 0x1c9   :  { %14096 = vmatpush3.msra.mxu0 %v16665_v15  ;;  %14110 = vmatpush3.msra.mxu1 %v16668_v16  ;;  %v16736_v18 = vadd.f32 %v2990_v30, %v16570_v31 }
 0x1ca   :  { %14097 = vmatprep.subr.mxu0 %v16677_v55  ;;  %14111 = vmatprep.subr.mxu1 %v16680_v0 }
 0x1cb   :  { %14098 = vmatpush3.msra.mxu0 %v16677_v55  ;;  %14099 = vmatprep.mubr.msk.f32.mxu0 %vm234_vm0, %v16538_v63 }
 0x1cc   :  { %v13908_v4 = vpop.f32.mrf.mxu0  ;;  %v13922_v11 = vpop.f32.mrf.mxu1  ;;  %14112 = vmatpush3.msra.mxu1 %v16680_v0  ;;  %14113 = vmatprep.mubr.msk.f32.mxu1 %vm234_vm0, %v16538_v63 }
 0x1cd   :  { %v16695_v25 = vadd.f32 %v13908_v4, %v16572_v32  ;;  %v16698_v50 = vadd.f32 %v13922_v11, %v16574_v41  ;;  %14100 = vmatmul.mubr.msk.f32.vlgmr.msra.gmra.mxu0 %vm234_vm0, %v16628_v40  ;;  %14114 = vmatmul.mubr.msk.f32.vlgmr.msra.gmra.mxu1 %vm234_vm0, %v16628_v40  ;;  %v16733_v11 = vadd.f32 %v2905_v3, %v16568_v22 }
 0x1ce   :  { %v2915_v39 = vpop.f32.mrf.mxu0  ;;  %v3000_v36 = vpop.f32.mrf.mxu1  ;;  %14102 = vmatprep.mubr.msk.f32.mxu0 %vm234_vm0, %v16632_v49  ;;  %14116 = vmatprep.mubr.msk.f32.mxu1 %vm234_vm0, %v16632_v49 }
 0x1cf   :  { %v16709_v32 = vadd.f32 %v2915_v39, %v16576_v42  ;;  %v16712_v41 = vadd.f32 %v3000_v36, %v16578_v27  ;;  %14119 = vmatprep.subr.mxu0 %v16695_v25  ;;  %14133 = vmatprep.subr.mxu1 %v16698_v50  ;;  %v16724_v42 = vadd.f32 %v13919_v38, %v16566_v21 }
 0x1d0   :  { %14120 = vmatpush3.msra.mxu0 %v16695_v25  ;;  %14134 = vmatpush3.msra.mxu1 %v16698_v50 }
 0x1d1   :  { %14121 = vmatprep.subr.mxu0 %v16709_v32  ;;  %14135 = vmatprep.subr.mxu1 %v16712_v41 }
 0x1d2   :  { %v13933_v27 = vpop.f32.mrf.mxu0  ;;  %v13947_v4 = vpop.f32.mrf.mxu1  ;;  %14122 = vmatpush3.msra.mxu0 %v16709_v32  ;;  %14136 = vmatpush3.msra.mxu1 %v16712_v41 }
 0x1d3   :  { %14103 = vmatmul.mubr.msk.f32.gmra.mxu0 %vm234_vm0, %v16660_v12  ;;  %14117 = vmatmul.mubr.msk.f32.gmra.mxu1 %vm234_vm0, %v16660_v12 }
 0x1d4   :  { %v3075_v21 = vpop.f32.mrf.mxu0  ;;  %v3160_v17 = vpop.f32.mrf.mxu1  ;;  %14123 = vmatprep.subr.mxu0 %v16721_v59  ;;  %14137 = vmatprep.subr.mxu1 %v16724_v42 }
 0x1d5   :  { %14124 = vmatpush3.msra.mxu0 %v16721_v59  ;;  %14138 = vmatpush3.msra.mxu1 %v16724_v42 }
 0x1d6   :  { %v13936_v38 = vpop.f32.mrf.mxu0  ;;  %v13950_v39 = vpop.f32.mrf.mxu1  ;;  %14125 = vmatprep.subr.mxu0 %v16733_v11  ;;  %14139 = vmatprep.subr.mxu1 %v16736_v18 }
 0x1d7   :  { %v16745_v22 = vadd.f32 %v13936_v38, %v16588_v62  ;;  %v16748_v31 = vadd.f32 %v13950_v39, %v16590_v61  ;;  %14126 = vmatpush3.msra.mxu0 %v16733_v11  ;;  %14127 = vmatprep.mubr.msk.f32.mxu0 %vm234_vm0, %v16538_v63  ;;  %v16780_v61 = vadd.f32 %v13947_v4, %v16582_v45  ;;  %v17124_v4 = vld [vmem:[#allocation8 + $0x8] sm:$0xff] }
 0x1d8   :  { %v3085_v3 = vpop.f32.mrf.mxu0  ;;  %v3170_v30 = vpop.f32.mrf.mxu1  ;;  %14140 = vmatpush3.msra.mxu1 %v16736_v18  ;;  %14141 = vmatprep.mubr.msk.f32.mxu1 %vm234_vm0, %v16538_v63  ;;  %v16792_v38 = vadd.f32 %v3160_v17, %v16586_v10  ;;  %v19579_v10 = vld [vmem:[#allocation41_spill] sm:$0xff] }
 0x1d9   :  { %v16757_v36 = vadd.f32 %v3085_v3, %v16592_v6  ;;  %v16760_v62 = vadd.f32 %v3170_v30, %v16594_v33  ;;  %14128 = vmatmul.mubr.msk.f32.vlgmr.msra.gmra.mxu0 %vm234_vm0, %v16628_v40  ;;  %14142 = vmatmul.mubr.msk.f32.vlgmr.msra.gmra.mxu1 %vm234_vm0, %v16628_v40  ;;  %v16777_v6 = vadd.f32 %v13933_v27, %v16580_v28  ;;  %v15308_v28 = vld [vmem:[#allocation2 + $0x10] sm:$0xff] }
 0x1da   :  { %14147 = vmatprep.subr.mxu0 %v16745_v22  ;;  %14161 = vmatprep.subr.mxu1 %v16748_v31  ;;  %v16789_v33 = vadd.f32 %v3075_v21, %v16584_v46  ;;  %v17134_v21 = vld [vmem:[#allocation8] sm:$0xff] }
 0x1db   :  { %14148 = vmatpush3.msra.mxu0 %v16745_v22  ;;  %14162 = vmatpush3.msra.mxu1 %v16748_v31 }
 0x1dc   :  { %14149 = vmatprep.subr.mxu0 %v16757_v36  ;;  %14163 = vmatprep.subr.mxu1 %v16760_v62 }
 0x1dd   :  { %14130 = vmatprep.mubr.msk.f32.mxu0 %vm234_vm0, %v16632_v49  ;;  %14144 = vmatprep.mubr.msk.f32.mxu1 %vm234_vm0, %v16632_v49 }
 0x1de   :  { %14150 = vmatpush3.msra.mxu0 %v16757_v36  ;;  %14164 = vmatpush3.msra.mxu1 %v16760_v62 }
 0x1df   :  { %14131 = vmatmul.mubr.msk.f32.gmra.mxu0 %vm234_vm0, %v16660_v12  ;;  %14145 = vmatmul.mubr.msk.f32.gmra.mxu1 %vm234_vm0, %v16660_v12 }
 0x1e0   :  { %14151 = vmatprep.subr.mxu0 %v16777_v6  ;;  %14165 = vmatprep.subr.mxu1 %v16780_v61 }
 0x1e1   :  { %14152 = vmatpush3.msra.mxu0 %v16777_v6  ;;  %14166 = vmatpush3.msra.mxu1 %v16780_v61 }
 0x1e2   :  { %14153 = vmatprep.subr.mxu0 %v16789_v33  ;;  %14167 = vmatprep.subr.mxu1 %v16792_v38 }
 0x1e3   :  { %14154 = vmatpush3.msra.mxu0 %v16789_v33  ;;  %14155 = vmatprep.mubr.msk.f32.mxu0 %vm234_vm0, %v16538_v63 }
 0x1e4   :  { %14168 = vmatpush3.msra.mxu1 %v16792_v38  ;;  %14169 = vmatprep.mubr.msk.f32.mxu1 %vm234_vm0, %v16538_v63 }
 0x1e5   :  { %14156 = vmatmul.mubr.msk.f32.vlgmr.msra.gmra.mxu0 %vm234_vm0, %v16628_v40  ;;  %14170 = vmatmul.mubr.msk.f32.vlgmr.msra.gmra.mxu1 %vm234_vm0, %v16628_v40 }
 0x1e6   :  { %14175 = vmatprep.subr.mxu0 %v16316_v47  ;;  %14189 = vmatprep.subr.mxu1 %v16318_v48 }
 0x1e7   :  { %14176 = vmatpush3.msra.mxu0 %v16316_v47  ;;  %14190 = vmatpush3.msra.mxu1 %v16318_v48  ;;  %v19565_v47 = vld [vmem:[#allocation27_spill] sm:$0xff]  ;;  %v19566_v48 = vld [vmem:[#allocation28_spill] sm:$0xff] }
 0x1e8   :  { %14177 = vmatprep.subr.mxu0 %v16320_v51  ;;  %14191 = vmatprep.subr.mxu1 %v16322_v52 }
 0x1e9   :  { %14158 = vmatprep.mubr.msk.f32.mxu0 %vm234_vm0, %v16632_v49  ;;  %14172 = vmatprep.mubr.msk.f32.mxu1 %vm234_vm0, %v16632_v49 }
 0x1ea   :  { %14178 = vmatpush3.msra.mxu0 %v16320_v51  ;;  %14192 = vmatpush3.msra.mxu1 %v16322_v52  ;;  %v19567_v51 = vld [vmem:[#allocation29_spill] sm:$0xff]  ;;  %v19568_v52 = vld [vmem:[#allocation30_spill] sm:$0xff] }
 0x1eb   :  { %14159 = vmatmul.mubr.msk.f32.gmra.mxu0 %vm234_vm0, %v16660_v12  ;;  %14173 = vmatmul.mubr.msk.f32.gmra.mxu1 %vm234_vm0, %v16660_v12 }
 0x1ec   :  { %14179 = vmatprep.subr.mxu0 %v16328_v53  ;;  %14193 = vmatprep.subr.mxu1 %v16330_v54 }
 0x1ed   :  { %14180 = vmatpush3.msra.mxu0 %v16328_v53  ;;  %14194 = vmatpush3.msra.mxu1 %v16330_v54  ;;  %v19569_v53 = vld [vmem:[#allocation31_spill] sm:$0xff]  ;;  %v19570_v54 = vld [vmem:[#allocation32_spill] sm:$0xff] }
 0x1ee   :  { %14181 = vmatprep.subr.mxu0 %v16336_v57  ;;  %14195 = vmatprep.subr.mxu1 %v16338_v58 }
 0x1ef   :  { %14182 = vmatpush3.msra.mxu0 %v16336_v57  ;;  %14183 = vmatprep.mubr.msk.f32.mxu0 %vm234_vm0, %v16538_v63  ;;  %v19571_v57 = vld [vmem:[#allocation33_spill] sm:$0xff] }
 0x1f0   :  { %14196 = vmatpush3.msra.mxu1 %v16338_v58  ;;  %14197 = vmatprep.mubr.msk.f32.mxu1 %vm234_vm0, %v16538_v63  ;;  %v19572_v58 = vld [vmem:[#allocation34_spill] sm:$0xff] }
 0x1f1   :  { %14184 = vmatmul.mubr.msk.f32.vlgmr.msra.gmra.mxu0 %vm234_vm0, %v16628_v40  ;;  %14198 = vmatmul.mubr.msk.f32.vlgmr.msra.gmra.mxu1 %vm234_vm0, %v16628_v40 }
 0x1f2   :  { %14203 = vmatprep.subr.mxu0 %v16361_v1  ;;  %14217 = vmatprep.subr.mxu1 %v16364_v2 }
 0x1f3   :  { %14204 = vmatpush3.msra.mxu0 %v16361_v1  ;;  %14218 = vmatpush3.msra.mxu1 %v16364_v2  ;;  %v19573_v1 = vld [vmem:[#allocation35_spill] sm:$0xff]  ;;  %v19574_v2 = vld [vmem:[#allocation36_spill] sm:$0xff] }
 0x1f4   :  { %14205 = vmatprep.subr.mxu0 %v16367_v5  ;;  %14219 = vmatprep.subr.mxu1 %v16370_v7 }
 0x1f5   :  { %14186 = vmatprep.mubr.msk.f32.mxu0 %vm234_vm0, %v16632_v49  ;;  %14200 = vmatprep.mubr.msk.f32.mxu1 %vm234_vm0, %v16632_v49 }
 0x1f6   :  { %14206 = vmatpush3.msra.mxu0 %v16367_v5  ;;  %14220 = vmatpush3.msra.mxu1 %v16370_v7  ;;  %v19575_v5 = vld [vmem:[#allocation37_spill] sm:$0xff]  ;;  %v19576_v7 = vld [vmem:[#allocation38_spill] sm:$0xff] }
 0x1f7   :  { %14187 = vmatmul.mubr.msk.f32.gmra.mxu0 %vm234_vm0, %v16660_v12  ;;  %14201 = vmatmul.mubr.msk.f32.gmra.mxu1 %vm234_vm0, %v16660_v12 }
 0x1f8   :  { %14207 = vmatprep.subr.mxu0 %v16377_v8  ;;  %14221 = vmatprep.subr.mxu1 %v16380_v9 }
 0x1f9   :  { %14208 = vmatpush3.msra.mxu0 %v16377_v8  ;;  %14222 = vmatpush3.msra.mxu1 %v16380_v9  ;;  %v19577_v8 = vld [vmem:[#allocation39_spill] sm:$0xff]  ;;  %v19578_v9 = vld [vmem:[#allocation40_spill] sm:$0xff] }
 0x1fa   :  { %14209 = vmatprep.subr.mxu0 %v16391_v13  ;;  %14223 = vmatprep.subr.mxu1 %v16394_v14 }
 0x1fb   :  { %14210 = vmatpush3.msra.mxu0 %v16391_v13  ;;  %14211 = vmatprep.mubr.msk.f32.mxu0 %vm234_vm0, %v16538_v63  ;;  %v19580_v13 = vld [vmem:[#allocation23_spill] sm:$0xff] }
 0x1fc   :  { %14224 = vmatpush3.msra.mxu1 %v16394_v14  ;;  %14225 = vmatprep.mubr.msk.f32.mxu1 %vm234_vm0, %v16538_v63  ;;  %v19581_v14 = vld [vmem:[#allocation24_spill] sm:$0xff] }
 0x1fd   :  { %14212 = vmatmul.mubr.msk.f32.vlgmr.msra.gmra.mxu0 %vm234_vm0, %v16628_v40  ;;  %14226 = vmatmul.mubr.msk.f32.vlgmr.msra.gmra.mxu1 %vm234_vm0, %v16628_v40 }
 0x1fe   :  { %14231 = vmatprep.subr.mxu0 %v16411_v19  ;;  %14245 = vmatprep.subr.mxu1 %v16414_v20 }
 0x1ff   :  { %14232 = vmatpush3.msra.mxu0 %v16411_v19  ;;  %14246 = vmatpush3.msra.mxu1 %v16414_v20  ;;  %v19582_v19 = vld [vmem:[#allocation25_spill] sm:$0xff]  ;;  %v19583_v20 = vld [vmem:[#allocation26_spill] sm:$0xff] }
 0x200   :  { %14233 = vmatprep.subr.mxu0 %v19565_v47  ;;  %14247 = vmatprep.subr.mxu1 %v19566_v48 }
 0x201   :  { %14214 = vmatprep.mubr.msk.f32.mxu0 %vm234_vm0, %v16632_v49  ;;  %14228 = vmatprep.mubr.msk.f32.mxu1 %vm234_vm0, %v16632_v49 }
 0x202   :  { %14234 = vmatpush3.msra.mxu0 %v19565_v47  ;;  %14248 = vmatpush3.msra.mxu1 %v19566_v48 }
 0x203   :  { %14215 = vmatmul.mubr.msk.f32.gmra.mxu0 %vm234_vm0, %v16660_v12  ;;  %14229 = vmatmul.mubr.msk.f32.gmra.mxu1 %vm234_vm0, %v16660_v12 }
 0x204   :  { %14235 = vmatprep.subr.mxu0 %v19567_v51  ;;  %14249 = vmatprep.subr.mxu1 %v19568_v52 }
 0x205   :  { %14236 = vmatpush3.msra.mxu0 %v19567_v51  ;;  %14250 = vmatpush3.msra.mxu1 %v19568_v52 }
 0x206   :  { %14237 = vmatprep.subr.mxu0 %v19569_v53  ;;  %14251 = vmatprep.subr.mxu1 %v19570_v54 }
 0x207   :  { %14238 = vmatpush3.msra.mxu0 %v19569_v53  ;;  %14239 = vmatprep.mubr.msk.f32.mxu0 %vm234_vm0, %v16538_v63 }
 0x208   :  { %14252 = vmatpush3.msra.mxu1 %v19570_v54  ;;  %14253 = vmatprep.mubr.msk.f32.mxu1 %vm234_vm0, %v16538_v63 }
 0x209   :  { %14240 = vmatmul.mubr.msk.f32.vlgmr.msra.gmra.mxu0 %vm234_vm0, %v16628_v40  ;;  %14254 = vmatmul.mubr.msk.f32.vlgmr.msra.gmra.mxu1 %vm234_vm0, %v16628_v40 }
 0x20a   :  { %14259 = vmatprep.subr.mxu0 %v19571_v57  ;;  %14273 = vmatprep.subr.mxu1 %v19572_v58 }
 0x20b   :  { %14260 = vmatpush3.msra.mxu0 %v19571_v57  ;;  %14274 = vmatpush3.msra.mxu1 %v19572_v58 }
 0x20c   :  { %14261 = vmatprep.subr.mxu0 %v19573_v1  ;;  %14275 = vmatprep.subr.mxu1 %v19574_v2 }
 0x20d   :  { %14242 = vmatprep.mubr.msk.f32.mxu0 %vm234_vm0, %v16632_v49  ;;  %14256 = vmatprep.mubr.msk.f32.mxu1 %vm234_vm0, %v16632_v49 }
 0x20e   :  { %14262 = vmatpush3.msra.mxu0 %v19573_v1  ;;  %14276 = vmatpush3.msra.mxu1 %v19574_v2 }
 0x20f   :  { %14243 = vmatmul.mubr.msk.f32.gmra.mxu0 %vm234_vm0, %v16660_v12  ;;  %14257 = vmatmul.mubr.msk.f32.gmra.mxu1 %vm234_vm0, %v16660_v12 }
 0x210   :  { %14263 = vmatprep.subr.mxu0 %v19575_v5  ;;  %14277 = vmatprep.subr.mxu1 %v19576_v7 }
 0x211   :  { %14264 = vmatpush3.msra.mxu0 %v19575_v5  ;;  %14278 = vmatpush3.msra.mxu1 %v19576_v7 }
 0x212   :  { %14265 = vmatprep.subr.mxu0 %v19577_v8  ;;  %14279 = vmatprep.subr.mxu1 %v19578_v9 }
 0x213   :  { %14266 = vmatpush3.msra.mxu0 %v19577_v8  ;;  %14267 = vmatprep.mubr.msk.f32.mxu0 %vm234_vm0, %v16538_v63 }
 0x214   :  { %14280 = vmatpush3.msra.mxu1 %v19578_v9  ;;  %14281 = vmatprep.mubr.msk.f32.mxu1 %vm234_vm0, %v16538_v63 }
 0x215   :  { %14268 = vmatmul.mubr.msk.f32.vlgmr.msra.gmra.mxu0 %vm234_vm0, %v16628_v40  ;;  %14282 = vmatmul.mubr.msk.f32.vlgmr.msra.gmra.mxu1 %vm234_vm0, %v16628_v40 }
 0x216   :  { %14287 = vmatprep.subr.mxu0 %v16596_v43  ;;  %14301 = vmatprep.subr.mxu1 %v16598_v26 }
 0x217   :  { %14288 = vmatpush3.msra.mxu0 %v16596_v43  ;;  %14302 = vmatpush3.msra.mxu1 %v16598_v26  ;;  %v15307_v26 = vld [vmem:[#allocation2 + $0x8] sm:$0xff] }
 0x218   :  { %14289 = vmatprep.subr.mxu0 %v16600_v29  ;;  %14303 = vmatprep.subr.mxu1 %v16602_v24 }
 0x219   :  { %14270 = vmatprep.mubr.msk.f32.mxu0 %vm234_vm0, %v16632_v49  ;;  %14284 = vmatprep.mubr.msk.f32.mxu1 %vm234_vm0, %v16632_v49 }
 0x21a   :  { %14290 = vmatpush3.msra.mxu0 %v16600_v29  ;;  %14304 = vmatpush3.msra.mxu1 %v16602_v24 }
 0x21b   :  { %14271 = vmatmul.mubr.msk.f32.gmra.mxu0 %vm234_vm0, %v16660_v12  ;;  %14285 = vmatmul.mubr.msk.f32.gmra.mxu1 %vm234_vm0, %v16660_v12 }
 0x21c   :  { %14291 = vmatprep.subr.mxu0 %v16609_v23  ;;  %14305 = vmatprep.subr.mxu1 %v16612_v44 }
 0x21d   :  { %14292 = vmatpush3.msra.mxu0 %v16609_v23  ;;  %14306 = vmatpush3.msra.mxu1 %v16612_v44  ;;  %v15306_v23 = vld [vmem:[#allocation2] sm:$0xff] }
 0x21e   :  { %14293 = vmatprep.subr.mxu0 %v16619_v37  ;;  %14307 = vmatprep.subr.mxu1 %v19579_v10 }
 0x21f   :  { %14294 = vmatpush3.msra.mxu0 %v16619_v37  ;;  %14295 = vmatprep.mubr.msk.f32.mxu0 %vm234_vm0, %v19580_v13  ;;  %v17050_v24 = vpop.f32.mrf.mxu0  ;;  %v17052_v29 = vpop.f32.mrf.mxu1 }
 0x220   :  { %14308 = vmatpush3.msra.mxu1 %v19579_v10  ;;  %14309 = vmatprep.mubr.msk.f32.mxu1 %vm234_vm0, %v19580_v13 }
 0x221   :  { %14296 = vmatmul.mubr.msk.f32.vlgmr.msra.gmra.mxu0 %vm234_vm0, %v19581_v14  ;;  %14310 = vmatmul.mubr.msk.f32.vlgmr.msra.gmra.mxu1 %vm234_vm0, %v19581_v14  ;;  %v17062_v43 = vpop.f32.mrf.mxu0  ;;  %v17064_v63 = vpop.f32.mrf.mxu1 }
 0x222   :  { %14315 = vmatprep.subr.mxu0 %v16645_v34  ;;  %14329 = vmatprep.subr.mxu1 %v16648_v56 }
 0x223   :  { %14316 = vmatpush3.msra.mxu0 %v16645_v34  ;;  %14330 = vmatpush3.msra.mxu1 %v16648_v56 }
 0x224   :  { %14317 = vmatprep.subr.mxu0 %v16651_v60  ;;  %14331 = vmatprep.subr.mxu1 %v16654_v35 }
 0x225   :  { %14298 = vmatprep.mubr.msk.f32.mxu0 %vm234_vm0, %v19582_v19  ;;  %14312 = vmatprep.mubr.msk.f32.mxu1 %vm234_vm0, %v19582_v19 }
 0x226   :  { %14318 = vmatpush3.msra.mxu0 %v16651_v60  ;;  %14332 = vmatpush3.msra.mxu1 %v16654_v35 }
 0x227   :  { %14299 = vmatmul.mubr.msk.f32.gmra.mxu0 %vm234_vm0, %v19583_v20  ;;  %14313 = vmatmul.mubr.msk.f32.gmra.mxu1 %vm234_vm0, %v19583_v20 }
 0x228   :  { %14319 = vmatprep.subr.mxu0 %v16665_v15  ;;  %14333 = vmatprep.subr.mxu1 %v16668_v16  ;;  %v17072_v45 = vpop.f32.mrf.mxu0  ;;  %v17074_v46 = vpop.f32.mrf.mxu1 }
 0x229   :  { %14320 = vmatpush3.msra.mxu0 %v16665_v15  ;;  %14334 = vmatpush3.msra.mxu1 %v16668_v16 }
 0x22a   :  { %14321 = vmatprep.subr.mxu0 %v16677_v55  ;;  %14335 = vmatprep.subr.mxu1 %v16680_v0  ;;  %v17076_v44 = vpop.f32.mrf.mxu0  ;;  %v17078_v37 = vpop.f32.mrf.mxu1 }
 0x22b   :  { %14322 = vmatpush3.msra.mxu0 %v16677_v55  ;;  %14323 = vmatprep.mubr.msk.f32.mxu0 %vm234_vm0, %v15306_v23 }
 0x22c   :  { %14336 = vmatpush3.msra.mxu1 %v16680_v0  ;;  %14337 = vmatprep.mubr.msk.f32.mxu1 %vm234_vm0, %v15306_v23 }
 0x22d   :  { %14324 = vmatmul.mubr.msk.f32.vlgmr.msra.gmra.mxu0 %vm234_vm0, %v19581_v14  ;;  %14338 = vmatmul.mubr.msk.f32.vlgmr.msra.gmra.mxu1 %vm234_vm0, %v19581_v14  ;;  %v17080_v35 = vpop.f32.mrf.mxu0  ;;  %v17082_v40 = vpop.f32.mrf.mxu1 }
 0x22e   :  { %14343 = vmatprep.subr.mxu0 %v16695_v25  ;;  %14357 = vmatprep.subr.mxu1 %v16698_v50 }
 0x22f   :  { %14344 = vmatpush3.msra.mxu0 %v16695_v25  ;;  %14358 = vmatpush3.msra.mxu1 %v16698_v50  ;;  %v17084_v49 = vpop.f32.mrf.mxu0  ;;  %v17086_v34 = vpop.f32.mrf.mxu1 }
 0x230   :  { %14345 = vmatprep.subr.mxu0 %v16709_v32  ;;  %14359 = vmatprep.subr.mxu1 %v16712_v41 }
 0x231   :  { %14326 = vmatprep.mubr.msk.f32.mxu0 %vm234_vm0, %v19582_v19  ;;  %14340 = vmatprep.mubr.msk.f32.mxu1 %vm234_vm0, %v19582_v19 }
 0x232   :  { %14346 = vmatpush3.msra.mxu0 %v16709_v32  ;;  %14360 = vmatpush3.msra.mxu1 %v16712_v41  ;;  %v17108_v41 = vld [vmem:[#allocation8 + $0x18] sm:$0xff] }
 0x233   :  { %14327 = vmatmul.mubr.msk.f32.gmra.mxu0 %vm234_vm0, %v19583_v20  ;;  %14341 = vmatmul.mubr.msk.f32.gmra.mxu1 %vm234_vm0, %v19583_v20 }
 0x234   :  { %14347 = vmatprep.subr.mxu0 %v16721_v59  ;;  %14361 = vmatprep.subr.mxu1 %v16724_v42  ;;  %v17088_v56 = vpop.f32.mrf.mxu0  ;;  %v17090_v60 = vpop.f32.mrf.mxu1 }
 0x235   :  { %14348 = vmatpush3.msra.mxu0 %v16721_v59  ;;  %14362 = vmatpush3.msra.mxu1 %v16724_v42  ;;  %v17114_v59 = vld [vmem:[#allocation8 + $0x10] sm:$0xff] }
 0x236   :  { %14349 = vmatprep.subr.mxu0 %v16733_v11  ;;  %14363 = vmatprep.subr.mxu1 %v16736_v18  ;;  %v17092_v12 = vpop.f32.mrf.mxu0  ;;  %v17094_v15 = vpop.f32.mrf.mxu1 }
 0x237   :  { %14350 = vmatpush3.msra.mxu0 %v16733_v11  ;;  %14351 = vmatprep.mubr.msk.f32.mxu0 %vm234_vm0, %v15306_v23 }
 0x238   :  { %14364 = vmatpush3.msra.mxu1 %v16736_v18  ;;  %14365 = vmatprep.mubr.msk.f32.mxu1 %vm234_vm0, %v15306_v23 }
 0x239   :  { %14352 = vmatmul.mubr.msk.f32.vlgmr.msra.gmra.mxu0 %vm234_vm0, %v19581_v14  ;;  %14366 = vmatmul.mubr.msk.f32.vlgmr.msra.gmra.mxu1 %vm234_vm0, %v19581_v14  ;;  %v17096_v16 = vpop.f32.mrf.mxu0  ;;  %v17098_v55 = vpop.f32.mrf.mxu1 }
 0x23a   :  { %14371 = vmatprep.subr.mxu0 %v16745_v22  ;;  %14385 = vmatprep.subr.mxu1 %v16748_v31  ;;  %19584 = vst [vmem:[#allocation27_spill] sm:$0xff] %v17096_v16  ;;  %19585 = vst [vmem:[#allocation28_spill] sm:$0xff] %v17098_v55 }
 0x23b   :  { %14372 = vmatpush3.msra.mxu0 %v16745_v22  ;;  %14386 = vmatpush3.msra.mxu1 %v16748_v31  ;;  %v17100_v0 = vpop.f32.mrf.mxu0  ;;  %v17102_v25 = vpop.f32.mrf.mxu1 }
 0x23c   :  { %14373 = vmatprep.subr.mxu0 %v16757_v36  ;;  %14387 = vmatprep.subr.mxu1 %v16760_v62  ;;  %19586 = vst [vmem:[#allocation29_spill] sm:$0xff] %v17100_v0  ;;  %19587 = vst [vmem:[#allocation30_spill] sm:$0xff] %v17102_v25 }
 0x23d   :  { %14354 = vmatprep.mubr.msk.f32.mxu0 %vm234_vm0, %v19582_v19  ;;  %14368 = vmatprep.mubr.msk.f32.mxu1 %vm234_vm0, %v19582_v19 }
 0x23e   :  { %14374 = vmatpush3.msra.mxu0 %v16757_v36  ;;  %14388 = vmatpush3.msra.mxu1 %v16760_v62 }
 0x23f   :  { %14355 = vmatmul.mubr.msk.f32.gmra.mxu0 %vm234_vm0, %v19583_v20  ;;  %14369 = vmatmul.mubr.msk.f32.gmra.mxu1 %vm234_vm0, %v19583_v20 }
 0x240   :  { %14375 = vmatprep.subr.mxu0 %v16777_v6  ;;  %14389 = vmatprep.subr.mxu1 %v16780_v61 }
 0x241   :  { %14376 = vmatpush3.msra.mxu0 %v16777_v6  ;;  %14390 = vmatpush3.msra.mxu1 %v16780_v61 }
 0x242   :  { %14377 = vmatprep.subr.mxu0 %v16789_v33  ;;  %14391 = vmatprep.subr.mxu1 %v16792_v38 }
 0x243   :  { %14378 = vmatpush3.msra.mxu0 %v16789_v33  ;;  %14379 = vmatprep.mubr.msk.f32.mxu0 %vm234_vm0, %v15306_v23  ;;  %v17104_v50 = vpop.f32.mrf.mxu0  ;;  %v17106_v32 = vpop.f32.mrf.mxu1 }
 0x244   :  { %14392 = vmatpush3.msra.mxu1 %v16792_v38  ;;  %14393 = vmatprep.mubr.msk.f32.mxu1 %vm234_vm0, %v15306_v23  ;;  %19588 = vst [vmem:[#allocation31_spill] sm:$0xff] %v17104_v50  ;;  %19589 = vst [vmem:[#allocation32_spill] sm:$0xff] %v17106_v32 }
 0x245   :  { %14380 = vmatmul.mubr.msk.f32.vlgmr.msra.gmra.mxu0 %vm234_vm0, %v15307_v26  ;;  %14394 = vmatmul.mubr.msk.f32.vlgmr.msra.gmra.mxu1 %vm234_vm0, %v15307_v26  ;;  %v17116_v42 = vpop.f32.mrf.mxu0  ;;  %v17118_v27 = vpop.f32.mrf.mxu1 }
 0x246   :  { %14382 = vmatprep.mubr.msk.f32.mxu0 %vm234_vm0, %v15308_v28  ;;  %14396 = vmatprep.mubr.msk.f32.mxu1 %vm234_vm0, %v15308_v28  ;;  %19590 = vst [vmem:[#allocation33_spill] sm:$0xff] %v17116_v42  ;;  %19591 = vst [vmem:[#allocation34_spill] sm:$0xff] %v17118_v27 }
 0x247   :  { %14399 = vmatprep.subr.mxu0 %v17108_v41  ;;  %14413 = vmatprep.subr.mxu1 %v17108_v41  ;;  %v17128_v11 = vpop.f32.mrf.mxu0  ;;  %v17130_v18 = vpop.f32.mrf.mxu1 }
 0x248   :  { %14400 = vmatpush3.msra.mxu0 %v17108_v41  ;;  %14414 = vmatpush3.msra.mxu1 %v17108_v41  ;;  %19592 = vst [vmem:[#allocation35_spill] sm:$0xff] %v17128_v11  ;;  %19593 = vst [vmem:[#allocation36_spill] sm:$0xff] %v17130_v18 }
 0x249   :  { %14383 = vmatmul.mubr.msk.f32.gmra.mxu0 %vm234_vm0, %v19583_v20  ;;  %14397 = vmatmul.mubr.msk.f32.gmra.mxu1 %vm234_vm0, %v19583_v20  ;;  %v17140_v17 = vpop.f32.mrf.mxu0  ;;  %v17142_v39 = vpop.f32.mrf.mxu1 }
 0x24a   :  { %14401 = vmatprep.subr.mxu0 %v17114_v59  ;;  %14415 = vmatprep.subr.mxu1 %v17114_v59  ;;  %19594 = vst [vmem:[#allocation37_spill] sm:$0xff] %v17140_v17  ;;  %19595 = vst [vmem:[#allocation38_spill] sm:$0xff] %v17142_v39 }
 0x24b   :  { %14402 = vmatpush3.msra.mxu0 %v17114_v59  ;;  %14416 = vmatpush3.msra.mxu1 %v17114_v59  ;;  %v17146_v22 = vpop.f32.mrf.mxu0  ;;  %v17148_v31 = vpop.f32.mrf.mxu1 }
 0x24c   :  { %14403 = vmatprep.subr.mxu0 %v17124_v4  ;;  %14417 = vmatprep.subr.mxu1 %v17124_v4  ;;  %19596 = vst [vmem:[#allocation39_spill] sm:$0xff] %v17146_v22  ;;  %19597 = vst [vmem:[#allocation40_spill] sm:$0xff] %v17148_v31 }
 0x24d   :  { %14404 = vmatpush3.msra.mxu0 %v17124_v4  ;;  %14418 = vmatpush3.msra.mxu1 %v17124_v4  ;;  %v17150_v3 = vpop.f32.mrf.mxu0  ;;  %v17152_v30 = vpop.f32.mrf.mxu1 }
 0x24e   :  { %14405 = vmatprep.subr.mxu0 %v17134_v21  ;;  %14419 = vmatprep.subr.mxu1 %v17134_v21  ;;  %19598 = vst [vmem:[#allocation41_spill] sm:$0xff] %v17150_v3  ;;  %19599 = vst [vmem:[#allocation23_spill] sm:$0xff] %v17152_v30 }
 0x24f   :  { %14406 = vmatpush3.msra.mxu0 %v17134_v21  ;;  %14420 = vmatpush3.msra.mxu1 %v17134_v21 }
 0x250   :  { %14427 = vmatprep.subr.mxu0 %v17108_v41  ;;  %14441 = vmatprep.subr.mxu1 %v17108_v41 }
 0x27f   :  { %v17154_v36 = vpop.f32.mrf.mxu0  ;;  %v17156_v62 = vpop.f32.mrf.mxu1 }
 0x281   :  { %v17158_v6 = vpop.f32.mrf.mxu0  ;;  %v17160_v61 = vpop.f32.mrf.mxu1 }
 0x287   :  { %v17162_v33 = vpop.f32.mrf.mxu0  ;;  %v17164_v38 = vpop.f32.mrf.mxu1 }
 0x289   :  { %v17166_v47 = vpop.f32.mrf.mxu0  ;;  %v17168_v48 = vpop.f32.mrf.mxu1 }
 0x28d   :  { %v17170_v51 = vpop.f32.mrf.mxu0  ;;  %v17172_v52 = vpop.f32.mrf.mxu1 }
 0x28f   :  { %v17174_v53 = vpop.f32.mrf.mxu0  ;;  %v17176_v54 = vpop.f32.mrf.mxu1 }
 0x293   :  { %v17178_v57 = vpop.f32.mrf.mxu0  ;;  %v17180_v58 = vpop.f32.mrf.mxu1 }
 0x295   :  { %v17182_v1 = vpop.f32.mrf.mxu0  ;;  %v17184_v2 = vpop.f32.mrf.mxu1 }
 0x299   :  { %v17186_v5 = vpop.f32.mrf.mxu0  ;;  %v17188_v7 = vpop.f32.mrf.mxu1 }
 0x29a   :  { %19600 = vst [vmem:[#allocation24_spill] sm:$0xff] %v17186_v5  ;;  %19601 = vst [vmem:[#allocation25_spill] sm:$0xff] %v17188_v7 }
 0x29b   :  { %v17190_v8 = vpop.f32.mrf.mxu0  ;;  %v17192_v9 = vpop.f32.mrf.mxu1 }
 0x29c   :  { %19602 = vst [vmem:[#allocation26_spill] sm:$0xff] %v17190_v8  ;;  %19603 = vst [vmem:[#allocation42_spill] sm:$0xff] %v17192_v9 }
 0x29f   :  { %v17194_v10 = vpop.f32.mrf.mxu0  ;;  %v17196_v13 = vpop.f32.mrf.mxu1 }
 0x2a0   :  { %19604 = vst [vmem:[#allocation43_spill] sm:$0xff] %v17194_v10  ;;  %19605 = vst [vmem:[#allocation44_spill] sm:$0xff] %v17196_v13 }
 0x2a1   :  { %v17198_v14 = vpop.f32.mrf.mxu0  ;;  %v17200_v19 = vpop.f32.mrf.mxu1 }
 0x2a2   :  { %19606 = vst [vmem:[#allocation45_spill] sm:$0xff] %v17198_v14  ;;  %19607 = vst [vmem:[#allocation46_spill] sm:$0xff] %v17200_v19 }
 0x2a5   :  { %v17202_v20 = vpop.f32.mrf.mxu0  ;;  %v17204_v23 = vpop.f32.mrf.mxu1 }
 0x2a6   :  { %19608 = vst [vmem:[#allocation47_spill] sm:$0xff] %v17202_v20  ;;  %19609 = vst [vmem:[#allocation48_spill] sm:$0xff] %v17204_v23 }
 0x2a7   :  { %v17206_v26 = vpop.f32.mrf.mxu0  ;;  %v17208_v28 = vpop.f32.mrf.mxu1 }
 0x2a8   :  { %19610 = vst [vmem:[#allocation49_spill] sm:$0xff] %v17206_v26  ;;  %19611 = vst [vmem:[#allocation50_spill] sm:$0xff] %v17208_v28 }
 0x2ab   :  { %v17210_v31 = vpop.f32.mrf.mxu0  ;;  %v17212_v22 = vpop.f32.mrf.mxu1 }
 0x2ac   :  { %19612 = vst [vmem:[#allocation51_spill] sm:$0xff] %v17210_v31  ;;  %19613 = vst [vmem:[#allocation52_spill] sm:$0xff] %v17212_v22 }
 0x2ad   :  { %v17214_v30 = vpop.f32.mrf.mxu0  ;;  %v17216_v3 = vpop.f32.mrf.mxu1 }
 0x2ae   :  { %19614 = vst [vmem:[#allocation53_spill] sm:$0xff] %v17214_v30  ;;  %19615 = vst [vmem:[#allocation54_spill] sm:$0xff] %v17216_v3 }
 0x2b1   :  { %v14185_v18 = vpop.f32.mrf.mxu0  ;;  %v14199_v39 = vpop.f32.mrf.mxu1 }
 0x2b3   :  { %v4661_v11 = vpop.f32.mrf.mxu0  ;;  %v4746_v17 = vpop.f32.mrf.mxu1 }
 0x2b7   :  { %v14188_v32 = vpop.f32.mrf.mxu0  ;;  %v14202_v20 = vpop.f32.mrf.mxu1 }
 0x2b9   :  { %v17218_v13 = vpop.f32.mrf.mxu0  ;;  %v17220_v23 = vpop.f32.mrf.mxu1 }
 0x2bd   :  { %v17222_v26 = vpop.f32.mrf.mxu0  ;;  %v17224_v28 = vpop.f32.mrf.mxu1 }
 0x2bf   :  { %v17226_v31 = vpop.f32.mrf.mxu0  ;;  %v17228_v22 = vpop.f32.mrf.mxu1 }
 0x2c3   :  { %v17230_v30 = vpop.f32.mrf.mxu0  ;;  %v17232_v3 = vpop.f32.mrf.mxu1 }
 0x2c5   :  { %v17234_v50 = vpop.f32.mrf.mxu0  ;;  %v17236_v10 = vpop.f32.mrf.mxu1 }
 0x2c9   :  { %v17238_v27 = vpop.f32.mrf.mxu0  ;;  %v17240_v19 = vpop.f32.mrf.mxu1 }
 0x2ca   :  { %19616 = vst [vmem:[#allocation55_spill] sm:$0xff] %v17238_v27  ;;  %19617 = vst [vmem:[#allocation56_spill] sm:$0xff] %v17240_v19 }
 0x2cb   :  { %v17242_v42 = vpop.f32.mrf.mxu0  ;;  %v17244_v14 = vpop.f32.mrf.mxu1 }
 0x2cc   :  { %19618 = vst [vmem:[#allocation57_spill] sm:$0xff] %v17242_v42  ;;  %19619 = vst [vmem:[#allocation58_spill] sm:$0xff] %v17244_v14 }
 0x2cf   :  { %v17246_v55 = vpop.f32.mrf.mxu0  ;;  %v17248_v7 = vpop.f32.mrf.mxu1 }
 0x2d0   :  { %19620 = vst [vmem:[#allocation59_spill] sm:$0xff] %v17246_v55  ;;  %19621 = vst [vmem:[#allocation60_spill] sm:$0xff] %v17248_v7 }
 0x2d1   :  { %v17250_v25 = vpop.f32.mrf.mxu0  ;;  %v17252_v9 = vpop.f32.mrf.mxu1 }
 0x2d2   :  { %19622 = vst [vmem:[#allocation61_spill] sm:$0xff] %v17250_v25  ;;  %19623 = vst [vmem:[#allocation62_spill] sm:$0xff] %v17252_v9  ;;  %v17272_v9 = vsub.f32 %v17062_v43, %v17158_v6  ;;  %v17290_v43 = vsub.f32 %v17052_v29, %v17156_v62  ;;  %v17294_v6 = vld [vmem:[#allocation10 + $0x28] sm:$0xff] }
 0x2d4   :  { %19632 = vst [vmem:[#allocation71_spill] sm:$0xff] %v17272_v9  ;;  %19637 = vst [vmem:[#allocation76_spill] sm:$0xff] %v17290_v43 }
 0x2d5   :  { %v17254_v0 = vpop.f32.mrf.mxu0  ;;  %v17256_v8 = vpop.f32.mrf.mxu1 }
 0x2d6   :  { %19624 = vst [vmem:[#allocation63_spill] sm:$0xff] %v17254_v0  ;;  %19625 = vst [vmem:[#allocation64_spill] sm:$0xff] %v17256_v8  ;;  %v17276_v8 = vld [vmem:[#allocation10] sm:$0xff] }
 0x2d7   :  { %v17258_v16 = vpop.f32.mrf.mxu0  ;;  %v17260_v27 = vpop.f32.mrf.mxu1 }
 0x2d8   :  { %19626 = vst [vmem:[#allocation65_spill] sm:$0xff] %v17258_v16  ;;  %19627 = vst [vmem:[#allocation66_spill] sm:$0xff] %v17260_v27  ;;  %v17280_v27 = vsub.f32 %v17064_v63, %v17160_v61  ;;  %v17330_v16 = vld [vmem:[#allocation10 + $0x10] sm:$0xff] }
 0x2da   :  { %19634 = vst [vmem:[#allocation73_spill] sm:$0xff] %v17280_v27  ;;  %v5959_v29 = vmul.f32 %v17280_v27, %v17276_v8 }
 0x2db   :  { %v17262_v19 = vpop.f32.mrf.mxu0  ;;  %v17264_v5 = vpop.f32.mrf.mxu1 }
 0x2dc   :  { %19628 = vst [vmem:[#allocation67_spill] sm:$0xff] %v17262_v19  ;;  %19629 = vst [vmem:[#allocation68_spill] sm:$0xff] %v17264_v5 }
 0x2dd   :  { %v17266_v14 = vpop.f32.mrf.mxu0  ;;  %v17268_v55 = vpop.f32.mrf.mxu1 }
 0x2de   :  { %19630 = vst [vmem:[#allocation69_spill] sm:$0xff] %v17266_v14  ;;  %19631 = vst [vmem:[#allocation70_spill] sm:$0xff] %v17268_v55  ;;  %v17286_v55 = vsub.f32 %v17050_v24, %v17154_v36 }
 0x2e0   :  { %19636 = vst [vmem:[#allocation75_spill] sm:$0xff] %v17286_v55 }
 0x2e1   :  { %v14297_v7 = vpop.f32.mrf.mxu0  ;;  %v14311_v25 = vpop.f32.mrf.mxu1 }
 0x2e2   :  { %v17274_v0 = vadd.f32 %v14297_v7, %v14185_v18  ;;  %v17282_v19 = vadd.f32 %v14311_v25, %v14199_v39  ;;  %v17292_v18 = vld [vmem:[#allocation10 + $0x8] sm:$0xff]  ;;  %v17300_v25 = vld [vmem:[#allocation10 + $0x20] sm:$0xff]  ;;  %v5955_v39 = vmul.f32 %v17272_v9, %v17276_v8 }
 0x2e3   :  { %v5341_v5 = vpop.f32.mrf.mxu0  ;;  %v5426_v14 = vpop.f32.mrf.mxu1 }
 0x2e4   :  { %19633 = vst [vmem:[#allocation72_spill] sm:$0xff] %v17274_v0  ;;  %19635 = vst [vmem:[#allocation74_spill] sm:$0xff] %v17282_v19  ;;  %v17296_v7 = vadd.f32 %v5341_v5, %v4661_v11  ;;  %v17298_v63 = vadd.f32 %v5426_v14, %v4746_v17  ;;  %v5988_v24 = vmul.f32 %v17274_v0, %v17294_v6 }
 0x2e5   :  { %v5992_v36 = vmul.f32 %v17282_v19, %v17294_v6  ;;  %v5956_v5 = vmul.f32 %v17286_v55, %v17292_v18  ;;  %v5960_v14 = vmul.f32 %v17290_v43, %v17292_v18  ;;  %v17320_v0 = vsub.f32 %v17076_v44, %v17166_v47 }
 0x2e6   :  { %19638 = vst [vmem:[#allocation77_spill] sm:$0xff] %v17296_v7  ;;  %19639 = vst [vmem:[#allocation78_spill] sm:$0xff] %v17298_v63  ;;  %v5987_v11 = vmul.f32 %v17296_v7, %v17300_v25  ;;  %v5991_v17 = vmul.f32 %v17298_v63, %v17300_v25  ;;  %v17324_v19 = vsub.f32 %v17078_v37, %v17168_v48 }
 0x2e7   :  { %v14300_v62 = vpop.f32.mrf.mxu0  ;;  %v14314_v61 = vpop.f32.mrf.mxu1  ;;  %v17332_v55 = vsub.f32 %v5956_v5, %v5988_v24  ;;  %v17338_v44 = vsub.f32 %v5960_v14, %v5992_v36  ;;  %v17356_v48 = vsub.f32 %v17074_v46, %v17164_v38  ;;  %v17393_v5 = vsub.f32 %v17084_v49, %v17174_v53 }
 0x2e8   :  { %v17326_v27 = vsub.f32 %v5955_v39, %v5987_v11  ;;  %v17328_v9 = vsub.f32 %v5959_v29, %v5991_v17  ;;  %v17334_v42 = vadd.f32 %v14300_v62, %v14188_v32  ;;  %v17336_v43 = vadd.f32 %v14314_v61, %v14202_v20  ;;  %v17358_v20 = vld [vmem:[#allocation10 + $0x30] sm:$0xff] }
 0x2e9   :  { %v5351_v63 = vpop.f32.mrf.mxu0  ;;  %v5436_v7 = vpop.f32.mrf.mxu1  ;;  %19642 = vst [vmem:[#allocation81_spill] sm:$0xff] %v17332_v55  ;;  %19643 = vst [vmem:[#allocation82_spill] sm:$0xff] %v17338_v44  ;;  %v17352_v32 = vsub.f32 %v17072_v45, %v17162_v33  ;;  %v5961_v45 = vmul.f32 %v17324_v19, %v17330_v16 }
 0x2ea   :  { %19640 = vst [vmem:[#allocation79_spill] sm:$0xff] %v17326_v27  ;;  %19641 = vst [vmem:[#allocation80_spill] sm:$0xff] %v17328_v9  ;;  %v17341_v47 = vadd.f32 %v5351_v63, %v17218_v13  ;;  %v17344_v37 = vadd.f32 %v5436_v7, %v17220_v23  ;;  %14407 = vmatprep.mubr.msk.f32.mxu0 %vm234_vm0, %v17326_v27  ;;  %14421 = vmatprep.mubr.msk.f32.mxu1 %vm234_vm0, %v17328_v9  ;;  %v17362_v13 = vld [vmem:[#allocation10 + $0x18] sm:$0xff] }
 0x2eb   :  { %14408 = vmatmul.mubr.msk.f32.vlgmr.msra.gmra.mxu0 %vm234_vm0, %v17332_v55  ;;  %v17364_v23 = vld [vmem:[#allocation10 + $0x38] sm:$0xff]  ;;  %v5957_v7 = vmul.f32 %v17320_v0, %v17330_v16  ;;  %14422 = vmatmul.mubr.msk.f32.vlgmr.msra.gmra.mxu1 %vm234_vm0, %v17338_v44  ;;  %v5958_v62 = vmul.f32 %v17352_v32, %v17362_v13  ;;  %v5962_v61 = vmul.f32 %v17356_v48, %v17362_v13  ;;  %v19671_v44 = vld [vmem:[#allocation56_spill] sm:$0xff] }
 0x2ec   :  { %v5989_v33 = vmul.f32 %v17341_v47, %v17358_v20  ;;  %v5993_v46 = vmul.f32 %v17344_v37, %v17358_v20  ;;  %v5990_v39 = vmul.f32 %v17334_v42, %v17364_v23  ;;  %v5994_v24 = vmul.f32 %v17336_v43, %v17364_v23  ;;  %14428 = vmatpush3.msra.mxu0 %v17108_v41  ;;  %v19682_v27 = vld [vmem:[#allocation34_spill] sm:$0xff] }
 0x2ed   :  { %v14325_v38 = vpop.f32.mrf.mxu0  ;;  %v14339_v63 = vpop.f32.mrf.mxu1  ;;  %14442 = vmatpush3.msra.mxu1 %v17108_v41  ;;  %14429 = vmatprep.subr.mxu0 %v17114_v59 }
 0x2ee   :  { %v17382_v29 = vsub.f32 %v5957_v7, %v5989_v33  ;;  %v17384_v36 = vsub.f32 %v5961_v45, %v5993_v46  ;;  %14443 = vmatprep.subr.mxu1 %v17114_v59  ;;  %v17408_v45 = vsub.f32 %v17086_v34, %v17176_v54  ;;  %v17410_v49 = vsub.f32 %v5958_v62, %v5990_v39 }
 0x2ef   :  { %v5511_v11 = vpop.f32.mrf.mxu0  ;;  %v5596_v17 = vpop.f32.mrf.mxu1  ;;  %v17412_v53 = vsub.f32 %v5962_v61, %v5994_v24  ;;  %14430 = vmatpush3.msra.mxu0 %v17114_v59  ;;  %14444 = vmatpush3.msra.mxu1 %v17114_v59  ;;  %v5963_v34 = vmul.f32 %v17393_v5, %v17276_v8 }
 0x2f0   :  { %19644 = vst [vmem:[#allocation83_spill] sm:$0xff] %v17382_v29  ;;  %19645 = vst [vmem:[#allocation84_spill] sm:$0xff] %v17384_v36  ;;  %v17397_v14 = vadd.f32 %v5511_v11, %v17226_v31  ;;  %v17400_v7 = vadd.f32 %v5596_v17, %v17228_v22  ;;  %14410 = vmatprep.mubr.msk.f32.mxu0 %vm234_vm0, %v17382_v29  ;;  %14424 = vmatprep.mubr.msk.f32.mxu1 %vm234_vm0, %v17384_v36 }
 0x2f1   :  { %19646 = vst [vmem:[#allocation85_spill] sm:$0xff] %v17410_v49  ;;  %19647 = vst [vmem:[#allocation86_spill] sm:$0xff] %v17412_v53  ;;  %v17415_v31 = vadd.f32 %v14325_v38, %v17222_v26  ;;  %v17419_v22 = vadd.f32 %v14339_v63, %v17224_v28  ;;  %14411 = vmatmul.mubr.msk.f32.gmra.mxu0 %vm234_vm0, %v17410_v49  ;;  %14425 = vmatmul.mubr.msk.f32.gmra.mxu1 %vm234_vm0, %v17412_v53  ;;  %v19663_v53 = vld [vmem:[#allocation42_spill] sm:$0xff] }
 0x2f2   :  { %v5995_v33 = vmul.f32 %v17397_v14, %v17300_v25  ;;  %v5999_v54 = vmul.f32 %v17400_v7, %v17300_v25  ;;  %v17434_v26 = vsub.f32 %v17080_v35, %v17170_v51  ;;  %v17438_v28 = vsub.f32 %v17082_v40, %v17172_v52  ;;  %14431 = vmatprep.subr.mxu0 %v17124_v4  ;;  %v19664_v49 = vld [vmem:[#allocation30_spill] sm:$0xff] }
 0x2f3   :  { %v14328_v46 = vpop.f32.mrf.mxu0  ;;  %v14342_v11 = vpop.f32.mrf.mxu1  ;;  %v5967_v39 = vmul.f32 %v17408_v45, %v17276_v8  ;;  %v5996_v24 = vmul.f32 %v17415_v31, %v17294_v6  ;;  %14445 = vmatprep.subr.mxu1 %v17124_v4  ;;  %v6000_v35 = vmul.f32 %v17419_v22, %v17294_v6  ;;  %14432 = vmatpush3.msra.mxu0 %v17124_v4 }
 0x2f4   :  { %v17445_v17 = vsub.f32 %v5963_v34, %v5995_v33  ;;  %14446 = vmatpush3.msra.mxu1 %v17124_v4  ;;  %14433 = vmatprep.subr.mxu0 %v17134_v21  ;;  %v5964_v62 = vmul.f32 %v17434_v26, %v17292_v18  ;;  %v5968_v61 = vmul.f32 %v17438_v28, %v17292_v18 }
 0x2f5   :  { %v5521_v38 = vpop.f32.mrf.mxu0  ;;  %v5606_v63 = vpop.f32.mrf.mxu1  ;;  %v17458_v52 = vsub.f32 %v5967_v39, %v5999_v54  ;;  %14447 = vmatprep.subr.mxu1 %v17134_v21  ;;  %14434 = vmatpush3.msra.mxu0 %v17134_v21  ;;  %v17490_v39 = vadd.f32 %v14342_v11, %v17232_v3  ;;  %v17508_v3 = vsub.f32 %v17090_v60, %v17180_v58 }
 0x2f6   :  { %19648 = vst [vmem:[#allocation87_spill] sm:$0xff] %v17445_v17  ;;  %v17451_v40 = vadd.f32 %v5521_v38, %v17234_v50  ;;  %v17454_v51 = vadd.f32 %v5606_v63, %v17236_v10  ;;  %v17467_v50 = vsub.f32 %v17092_v12, %v17182_v1  ;;  %v17471_v10 = vsub.f32 %v17094_v15, %v17184_v2 }
 0x2f7   :  { %19649 = vst [vmem:[#allocation88_spill] sm:$0xff] %v17458_v52  ;;  %14435 = vmatprep.mubr.msk.f32.mxu0 %vm234_vm0, %v17445_v17  ;;  %v17477_v54 = vsub.f32 %v5964_v62, %v5996_v24  ;;  %v17479_v38 = vsub.f32 %v5968_v61, %v6000_v35  ;;  %14448 = vmatpush3.msra.mxu1 %v17134_v21  ;;  %v19654_v62 = vld [vmem:[#allocation57_spill] sm:$0xff] }
 0x2f8   :  { %v5997_v12 = vmul.f32 %v17451_v40, %v17358_v20  ;;  %v6001_v15 = vmul.f32 %v17454_v51, %v17358_v20  ;;  %v17487_v63 = vadd.f32 %v14328_v46, %v17230_v30  ;;  %14449 = vmatprep.mubr.msk.f32.mxu1 %vm234_vm0, %v17458_v52  ;;  %v5965_v24 = vmul.f32 %v17467_v50, %v17330_v16 }
 0x2f9   :  { %v14353_v33 = vpop.f32.mrf.mxu0  ;;  %v14367_v34 = vpop.f32.mrf.mxu1  ;;  %19650 = vst [vmem:[#allocation89_spill] sm:$0xff] %v17477_v54  ;;  %19651 = vst [vmem:[#allocation90_spill] sm:$0xff] %v17479_v38  ;;  %v5969_v35 = vmul.f32 %v17471_v10, %v17330_v16  ;;  %14436 = vmatmul.mubr.msk.f32.vlgmr.msra.gmra.mxu0 %vm234_vm0, %v17477_v54  ;;  %14450 = vmatmul.mubr.msk.f32.vlgmr.msra.gmra.mxu1 %vm234_vm0, %v17479_v38  ;;  %v17504_v30 = vsub.f32 %v17088_v56, %v17178_v57  ;;  %v19655_v57 = vld [vmem:[#allocation58_spill] sm:$0xff] }
 0x2fa   :  { %14455 = vmatprep.subr.mxu0 %v17108_v41  ;;  %v17511_v46 = vsub.f32 %v5965_v24, %v5997_v12  ;;  %14469 = vmatprep.subr.mxu1 %v17108_v41  ;;  %v5998_v56 = vmul.f32 %v17487_v63, %v17364_v23  ;;  %v6002_v60 = vmul.f32 %v17490_v39, %v17364_v23  ;;  %v19657_v12 = vld [vmem:[#allocation24_spill] sm:$0xff]  ;;  %v19660_v24 = vld [vmem:[#allocation26_spill] sm:$0xff] }
 0x2fb   :  { %v5681_v1 = vpop.f32.mrf.mxu0  ;;  %v5766_v2 = vpop.f32.mrf.mxu1  ;;  %v17513_v11 = vsub.f32 %v5969_v35, %v6001_v15  ;;  %14456 = vmatpush3.msra.mxu0 %v17108_v41  ;;  %14470 = vmatpush3.msra.mxu1 %v17108_v41  ;;  %v19658_v15 = vld [vmem:[#allocation27_spill] sm:$0xff]  ;;  %v19661_v35 = vld [vmem:[#allocation29_spill] sm:$0xff]  ;;  %v17543_v36 = vsub.f32 %v19664_v49, %v19663_v53  ;;  %v17554_v55 = vadd.f32 %v14367_v34, %v19671_v44 }
 0x2fc   :  { %19652 = vst [vmem:[#allocation91_spill] sm:$0xff] %v17511_v46  ;;  %v17516_v61 = vadd.f32 %v5681_v1, %v19654_v62  ;;  %v17524_v58 = vadd.f32 %v5766_v2, %v19655_v57  ;;  %v17530_v1 = vsub.f32 %v19658_v15, %v19657_v12  ;;  %v17534_v62 = vsub.f32 %v19661_v35, %v19660_v24  ;;  %v19666_v12 = vld [vmem:[#allocation55_spill] sm:$0xff]  ;;  %v19668_v24 = vld [vmem:[#allocation25_spill] sm:$0xff]  ;;  %v19669_v35 = vld [vmem:[#allocation28_spill] sm:$0xff] }
 0x2fd   :  { %19653 = vst [vmem:[#allocation92_spill] sm:$0xff] %v17513_v11  ;;  %14457 = vmatprep.subr.mxu0 %v17114_v59  ;;  %v5966_v2 = vmul.f32 %v17504_v30, %v17362_v13  ;;  %v5970_v57 = vmul.f32 %v17508_v3, %v17362_v13  ;;  %19665 = vst [vmem:[#allocation27_spill] sm:$0xff] %v17543_v36  ;;  %v17546_v15 = vadd.f32 %v14353_v33, %v19666_v12  ;;  %v19675_v44 = vld [vmem:[#allocation61_spill] sm:$0xff] }
 0x2fe   :  { %19656 = vst [vmem:[#allocation57_spill] sm:$0xff] %v17524_v58  ;;  %19659 = vst [vmem:[#allocation58_spill] sm:$0xff] %v17530_v1  ;;  %14471 = vmatprep.subr.mxu1 %v17114_v59  ;;  %v17551_v29 = vsub.f32 %v19669_v35, %v19668_v24  ;;  %v6003_v9 = vmul.f32 %v17516_v61, %v17300_v25  ;;  %14438 = vmatprep.mubr.msk.f32.mxu0 %vm234_vm0, %v17511_v46  ;;  %v19679_v46 = vld [vmem:[#allocation33_spill] sm:$0xff] }
 0x2ff   :  { %v14356_v38 = vpop.f32.mrf.mxu0  ;;  %v14370_v54 = vpop.f32.mrf.mxu1  ;;  %19662 = vst [vmem:[#allocation24_spill] sm:$0xff] %v17534_v62  ;;  %19667 = vst [vmem:[#allocation26_spill] sm:$0xff] %v17546_v15  ;;  %14452 = vmatprep.mubr.msk.f32.mxu1 %vm234_vm0, %v17513_v11  ;;  %v17562_v49 = vsub.f32 %v5966_v2, %v5998_v56  ;;  %v17564_v53 = vsub.f32 %v5970_v57, %v6002_v60  ;;  %v6007_v33 = vmul.f32 %v17524_v58, %v17300_v25  ;;  %v19677_v56 = vld [vmem:[#allocation62_spill] sm:$0xff]  ;;  %v19678_v11 = vld [vmem:[#allocation45_spill] sm:$0xff] }
 0x300   :  { %19670 = vst [vmem:[#allocation29_spill] sm:$0xff] %v17551_v29  ;;  %19672 = vst [vmem:[#allocation42_spill] sm:$0xff] %v17554_v55  ;;  %14458 = vmatpush3.msra.mxu0 %v17114_v59  ;;  %v5972_v12 = vmul.f32 %v17530_v1, %v17292_v18  ;;  %v5971_v24 = vmul.f32 %v17534_v62, %v17276_v8  ;;  %14472 = vmatpush3.msra.mxu1 %v17114_v59  ;;  %v19686_v62 = vld [vmem:[#allocation59_spill] sm:$0xff] }
 0x301   :  { %v5691_v52 = vpop.f32.mrf.mxu0  ;;  %v5776_v17 = vpop.f32.mrf.mxu1  ;;  %19673 = vst [vmem:[#allocation30_spill] sm:$0xff] %v17562_v49  ;;  %19674 = vst [vmem:[#allocation55_spill] sm:$0xff] %v17564_v53  ;;  %v5975_v35 = vmul.f32 %v17543_v36, %v17276_v8  ;;  %14439 = vmatmul.mubr.msk.f32.gmra.mxu0 %vm234_vm0, %v17562_v49  ;;  %14453 = vmatmul.mubr.msk.f32.gmra.mxu1 %vm234_vm0, %v17564_v53  ;;  %v17606_v53 = vadd.f32 %v14356_v38, %v19686_v62  ;;  %v19693_v38 = vld [vmem:[#allocation44_spill] sm:$0xff] }
 0x302   :  { %v17570_v34 = vadd.f32 %v5691_v52, %v19675_v44  ;;  %v17578_v2 = vadd.f32 %v5776_v17, %v19677_v56  ;;  %v17584_v52 = vsub.f32 %v19679_v46, %v19678_v11  ;;  %v6004_v44 = vmul.f32 %v17546_v15, %v17294_v6  ;;  %v19681_v56 = vld [vmem:[#allocation46_spill] sm:$0xff]  ;;  %14459 = vmatprep.subr.mxu0 %v17124_v4  ;;  %v19694_v62 = vld [vmem:[#allocation32_spill] sm:$0xff] }
 0x303   :  { %v5976_v17 = vmul.f32 %v17551_v29, %v17292_v18  ;;  %v17596_v1 = vsub.f32 %v19682_v27, %v19681_v56  ;;  %v6008_v46 = vmul.f32 %v17554_v55, %v17294_v6  ;;  %v17600_v11 = vsub.f32 %v5971_v24, %v6003_v9  ;;  %19687 = vst [vmem:[#allocation45_spill] sm:$0xff] %v17606_v53  ;;  %v19688_v27 = vld [vmem:[#allocation43_spill] sm:$0xff]  ;;  %v19691_v24 = vld [vmem:[#allocation60_spill] sm:$0xff] }
 0x304   :  { %19676 = vst [vmem:[#allocation25_spill] sm:$0xff] %v17570_v34  ;;  %19680 = vst [vmem:[#allocation28_spill] sm:$0xff] %v17584_v52  ;;  %v17603_v49 = vsub.f32 %v5975_v35, %v6007_v33  ;;  %v6005_v29 = vmul.f32 %v17570_v34, %v17358_v20  ;;  %14473 = vmatprep.subr.mxu1 %v17124_v4  ;;  %14460 = vmatpush3.msra.mxu0 %v17124_v4  ;;  %v19689_v56 = vld [vmem:[#allocation31_spill] sm:$0xff] }
 0x305   :  { %v14381_v60 = vpop.f32.mrf.mxu0  ;;  %v14395_v57 = vpop.f32.mrf.mxu1  ;;  %19683 = vst [vmem:[#allocation56_spill] sm:$0xff] %v17596_v1  ;;  %19684 = vst [vmem:[#allocation61_spill] sm:$0xff] %v17600_v11  ;;  %v17614_v9 = vsub.f32 %v19689_v56, %v19688_v27  ;;  %v17617_v55 = vadd.f32 %v14370_v54, %v19691_v24  ;;  %v6009_v33 = vmul.f32 %v17578_v2, %v17358_v20  ;;  %14474 = vmatpush3.msra.mxu1 %v17124_v4 }
 0x306   :  { %19685 = vst [vmem:[#allocation62_spill] sm:$0xff] %v17603_v49  ;;  %14461 = vmatprep.subr.mxu0 %v17134_v21  ;;  %v17625_v35 = vsub.f32 %v19694_v62, %v19693_v38  ;;  %v5973_v34 = vmul.f32 %v17584_v52, %v17330_v16  ;;  %v17629_v58 = vsub.f32 %v5972_v12, %v6004_v44  ;;  %v19699_v38 = vld [vmem:[#allocation65_spill] sm:$0xff] }
 0x307   :  { %v5851_v15 = vpop.f32.mrf.mxu0  ;;  %v5936_v36 = vpop.f32.mrf.mxu1  ;;  %19690 = vst [vmem:[#allocation33_spill] sm:$0xff] %v17614_v9  ;;  %19692 = vst [vmem:[#allocation46_spill] sm:$0xff] %v17617_v55  ;;  %14475 = vmatprep.subr.mxu1 %v17134_v21  ;;  %14462 = vmatpush3.msra.mxu0 %v17134_v21  ;;  %v5977_v27 = vmul.f32 %v17596_v1, %v17330_v16  ;;  %v17635_v56 = vsub.f32 %v5976_v17, %v6008_v46 }
 0x308   :  { %19695 = vst [vmem:[#allocation34_spill] sm:$0xff] %v17625_v35  ;;  %19696 = vst [vmem:[#allocation59_spill] sm:$0xff] %v17629_v58  ;;  %14463 = vmatprep.mubr.msk.f32.mxu0 %vm234_vm0, %v17600_v11  ;;  %14476 = vmatpush3.msra.mxu1 %v17134_v21  ;;  %v6006_v12 = vmul.f32 %v17606_v53, %v17364_v23  ;;  %v17642_v44 = vsub.f32 %v5973_v34, %v6005_v29  ;;  %v19701_v11 = vld [vmem:[#allocation66_spill] sm:$0xff]  ;;  %v19702_v34 = vld [vmem:[#allocation49_spill] sm:$0xff] }
 0x309   :  { %v14384_v54 = vpop.f32.mrf.mxu0  ;;  %19697 = vst [vmem:[#allocation43_spill] sm:$0xff] %v17635_v56  ;;  %v14398_v24 = vpop.f32.mrf.mxu1  ;;  %14477 = vmatprep.mubr.msk.f32.mxu1 %vm234_vm0, %v17603_v49  ;;  %v17647_v62 = vadd.f32 %v5851_v15, %v19699_v38  ;;  %14464 = vmatmul.mubr.msk.f32.vlgmr.msra.gmra.mxu0 %vm234_vm0, %v17629_v58  ;;  %v6010_v17 = vmul.f32 %v17617_v55, %v17364_v23  ;;  %v19703_v38 = vld [vmem:[#allocation37_spill] sm:$0xff]  ;;  %v19707_v49 = vld [vmem:[#allocation38_spill] sm:$0xff] }
 0x30a   :  { %19698 = vst [vmem:[#allocation31_spill] sm:$0xff] %v17642_v44  ;;  %v17653_v46 = vsub.f32 %v5977_v27, %v6009_v33  ;;  %v17656_v1 = vadd.f32 %v5936_v36, %v19701_v11  ;;  %14478 = vmatmul.mubr.msk.f32.vlgmr.msra.gmra.mxu1 %vm234_vm0, %v17635_v56  ;;  %14483 = vmatprep.subr.mxu0 %v17108_v41  ;;  %v19704_v11 = vld [vmem:[#allocation47_spill] sm:$0xff]  ;;  %v19706_v56 = vld [vmem:[#allocation50_spill] sm:$0xff] }
 0x30b   :  { %v5974_v29 = vmul.f32 %v17614_v9, %v17362_v13  ;;  %v5978_v15 = vmul.f32 %v17625_v35, %v17362_v13  ;;  %v17667_v58 = vsub.f32 %v19703_v38, %v19702_v34  ;;  %14497 = vmatprep.subr.mxu1 %v17108_v41  ;;  %14484 = vmatpush3.msra.mxu0 %v17108_v41  ;;  %v5861_v36 = vpop.f32.mrf.mxu0  ;;  %v19705_v33 = vld [vmem:[#allocation35_spill] sm:$0xff]  ;;  %v5946_v34 = vpop.f32.mrf.mxu1  ;;  %v19710_v35 = vld [vmem:[#allocation64_spill] sm:$0xff] }
 0x30c   :  { %19700 = vst [vmem:[#allocation60_spill] sm:$0xff] %v17653_v46  ;;  %v17673_v27 = vsub.f32 %v19705_v33, %v19704_v11  ;;  %v17677_v55 = vsub.f32 %v19707_v49, %v19706_v56  ;;  %v19708_v9 = vld [vmem:[#allocation63_spill] sm:$0xff]  ;;  %14498 = vmatpush3.msra.mxu1 %v17108_v41  ;;  %14485 = vmatprep.subr.mxu0 %v17114_v59  ;;  %v19719_v33 = vld [vmem:[#allocation53_spill] sm:$0xff] }
 0x30d   :  { %v17680_v53 = vadd.f32 %v14381_v60, %v19708_v9  ;;  %v17684_v38 = vsub.f32 %v5974_v29, %v6006_v12  ;;  %v17687_v52 = vadd.f32 %v14395_v57, %v19710_v35  ;;  %v6011_v11 = vmul.f32 %v17647_v62, %v17300_v25  ;;  %14499 = vmatprep.subr.mxu1 %v17114_v59  ;;  %v19712_v60 = vld [vmem:[#allocation69_spill] sm:$0xff]  ;;  %v19714_v9 = vld [vmem:[#allocation48_spill] sm:$0xff] }
 0x30e   :  { %14466 = vmatprep.mubr.msk.f32.mxu0 %vm234_vm0, %v17642_v44  ;;  %v17694_v49 = vsub.f32 %v5978_v15, %v6010_v17  ;;  %v6015_v41 = vmul.f32 %v17656_v1, %v17300_v25  ;;  %14480 = vmatprep.mubr.msk.f32.mxu1 %vm234_vm0, %v17653_v46  ;;  %v17702_v57 = vadd.f32 %v5861_v36, %v19712_v60  ;;  %v19715_v35 = vld [vmem:[#allocation36_spill] sm:$0xff]  ;;  %v19717_v17 = vld [vmem:[#allocation70_spill] sm:$0xff]  ;;  %v19720_v46 = vld [vmem:[#allocation41_spill] sm:$0xff] }
 0x30f   :  { %19709 = vst [vmem:[#allocation44_spill] sm:$0xff] %v17684_v38  ;;  %14486 = vmatpush3.msra.mxu0 %v17114_v59  ;;  %v17706_v56 = vsub.f32 %v19715_v35, %v19714_v9  ;;  %v5979_v12 = vmul.f32 %v17667_v58, %v17276_v8  ;;  %14500 = vmatpush3.msra.mxu1 %v17114_v59  ;;  %v19722_v60 = vld [vmem:[#allocation23_spill] sm:$0xff] }
 0x310   :  { %19711 = vst [vmem:[#allocation32_spill] sm:$0xff] %v17694_v49  ;;  %19713 = vst [vmem:[#allocation65_spill] sm:$0xff] %v17702_v57  ;;  %v17712_v29 = vadd.f32 %v5946_v34, %v19717_v17  ;;  %v5983_v15 = vmul.f32 %v17677_v55, %v17276_v8  ;;  %v17718_v44 = vsub.f32 %v19720_v46, %v19719_v33  ;;  %14467 = vmatmul.mubr.msk.f32.gmra.mxu0 %vm234_vm0, %v17684_v38  ;;  %v19721_v34 = vld [vmem:[#allocation54_spill] sm:$0xff]  ;;  %v19725_v33 = vld [vmem:[#allocation67_spill] sm:$0xff] }
 0x311   :  { %19716 = vst [vmem:[#allocation66_spill] sm:$0xff] %v17706_v56  ;;  %v6012_v36 = vmul.f32 %v17680_v53, %v17294_v6  ;;  %14481 = vmatmul.mubr.msk.f32.gmra.mxu1 %vm234_vm0, %v17694_v49  ;;  %v5980_v59 = vmul.f32 %v17673_v27, %v17292_v18  ;;  %v17730_v9 = vsub.f32 %v19722_v60, %v19721_v34  ;;  %v19726_v60 = vld [vmem:[#allocation68_spill] sm:$0xff] }
 0x312   :  { %19718 = vst [vmem:[#allocation49_spill] sm:$0xff] %v17712_v29  ;;  %v6016_v46 = vmul.f32 %v17687_v52, %v17294_v6  ;;  %v17734_v35 = vsub.f32 %v5979_v12, %v6011_v11  ;;  %14487 = vmatprep.subr.mxu0 %v17124_v4  ;;  %v17737_v17 = vsub.f32 %v5983_v15, %v6015_v41  ;;  %v19728_v12 = vld [vmem:[#allocation39_spill] sm:$0xff] }
 0x313   :  { %v17740_v38 = vadd.f32 %v14384_v54, %v19725_v33  ;;  %v6013_v49 = vmul.f32 %v17702_v57, %v17358_v20  ;;  %14501 = vmatprep.subr.mxu1 %v17124_v4  ;;  %14488 = vmatpush3.msra.mxu0 %v17124_v4  ;;  %v5984_v34 = vmul.f32 %v17706_v56, %v17292_v18  ;;  %v19727_v54 = vld [vmem:[#allocation51_spill] sm:$0xff] }
 0x314   :  { %19723 = vst [vmem:[#allocation37_spill] sm:$0xff] %v17734_v35  ;;  %19724 = vst [vmem:[#allocation47_spill] sm:$0xff] %v17737_v17  ;;  %v17749_v11 = vadd.f32 %v14398_v24, %v19726_v60  ;;  %v6017_v41 = vmul.f32 %v17712_v29, %v17358_v20  ;;  %14502 = vmatpush3.msra.mxu1 %v17124_v4  ;;  %14489 = vmatprep.subr.mxu0 %v17134_v21  ;;  %v17765_v24 = vld [vmem:[#allocation8 + $0x38] sm:$0xff]  ;;  %v19730_v60 = vld [vmem:[#allocation52_spill] sm:$0xff] }
 0x315   :  { %v17757_v15 = vsub.f32 %v19728_v12, %v19727_v54  ;;  %v5981_v33 = vmul.f32 %v17718_v44, %v17330_v16  ;;  %v17761_v57 = vsub.f32 %v5980_v59, %v6012_v36  ;;  %14503 = vmatprep.subr.mxu1 %v17134_v21  ;;  %14490 = vmatpush3.msra.mxu0 %v17134_v21  ;;  %v19731_v29 = vld [vmem:[#allocation40_spill] sm:$0xff]  ;;  %v19735_v12 = vld [vmem:[#allocation77_spill] sm:$0xff] }
 0x316   :  { %v17769_v4 = vsub.f32 %v19731_v29, %v19730_v60  ;;  %v5985_v56 = vmul.f32 %v17730_v9, %v17330_v16  ;;  %v17773_v54 = vsub.f32 %v5984_v34, %v6016_v46  ;;  %14491 = vmatprep.mubr.msk.f32.mxu0 %vm234_vm0, %v17734_v35  ;;  %14504 = vmatpush3.msra.mxu1 %v17134_v21  ;;  %v17786_v29 = vld [vmem:[#allocation8 + $0x30] sm:$0xff] }
 0x317   :  { %19729 = vst [vmem:[#allocation35_spill] sm:$0xff] %v17761_v57  ;;  %v6014_v36 = vmul.f32 %v17740_v38, %v17364_v23  ;;  %v17780_v59 = vsub.f32 %v5981_v33, %v6013_v49  ;;  %14505 = vmatprep.mubr.msk.f32.mxu1 %vm234_vm0, %v17737_v17  ;;  %14492 = vmatmul.mubr.msk.f32.vlgmr.msra.gmra.mxu0 %vm234_vm0, %v17761_v57  ;;  %v19738_v57 = vld [vmem:[#allocation71_spill] sm:$0xff] }
 0x318   :  { %19732 = vst [vmem:[#allocation50_spill] sm:$0xff] %v17773_v54  ;;  %v6018_v46 = vmul.f32 %v17749_v11, %v17364_v23  ;;  %v17790_v34 = vsub.f32 %v5985_v56, %v6017_v41  ;;  %14506 = vmatmul.mubr.msk.f32.vlgmr.msra.gmra.mxu1 %vm234_vm0, %v17773_v54  ;;  %14511 = vmatprep.subr.mxu0 %v17765_v24  ;;  %v19736_v56 = vld [vmem:[#allocation78_spill] sm:$0xff]  ;;  %v17812_v54 = vld [vmem:[#allocation8 + $0x28] sm:$0xff] }
 0x319   :  { %19733 = vst [vmem:[#allocation38_spill] sm:$0xff] %v17780_v59  ;;  %v5982_v21 = vmul.f32 %v17757_v15, %v17362_v13  ;;  %14525 = vmatprep.subr.mxu1 %v17765_v24  ;;  %14512 = vmatpush3.msra.mxu0 %v17765_v24  ;;  %v5986_v49 = vmul.f32 %v17769_v4, %v17362_v13 }
 0x31a   :  { %19734 = vst [vmem:[#allocation63_spill] sm:$0xff] %v17790_v34  ;;  %v6051_v33 = vmul.f32 %v19735_v12, %v17276_v8  ;;  %14526 = vmatpush3.msra.mxu1 %v17765_v24  ;;  %14513 = vmatprep.subr.mxu0 %v17786_v29  ;;  %v6055_v41 = vmul.f32 %v19736_v56, %v17276_v8  ;;  %v19740_v56 = vld [vmem:[#allocation72_spill] sm:$0xff] }
 0x31b   :  { %v17807_v60 = vsub.f32 %v5982_v21, %v6014_v36  ;;  %14527 = vmatprep.subr.mxu1 %v17786_v29  ;;  %14494 = vmatprep.mubr.msk.f32.mxu0 %vm234_vm0, %v17780_v59  ;;  %v6083_v17 = vmul.f32 %v19738_v57, %v17300_v25  ;;  %v17816_v12 = vsub.f32 %v5986_v49, %v6018_v46  ;;  %v19739_v36 = vld [vmem:[#allocation73_spill] sm:$0xff]  ;;  %v19741_v57 = vld [vmem:[#allocation74_spill] sm:$0xff] }
 0x31c   :  { %14508 = vmatprep.mubr.msk.f32.mxu1 %vm234_vm0, %v17790_v34  ;;  %14514 = vmatpush3.msra.mxu0 %v17786_v29  ;;  %v6087_v21 = vmul.f32 %v19739_v36, %v17300_v25  ;;  %v6052_v35 = vmul.f32 %v19740_v56, %v17292_v18  ;;  %v6056_v46 = vmul.f32 %v19741_v57, %v17292_v18  ;;  %v17835_v34 = vld [vmem:[#allocation8 + $0x20] sm:$0xff] }
 0x31d   :  { %19737 = vst [vmem:[#allocation64_spill] sm:$0xff] %v17807_v60  ;;  %14528 = vmatpush3.msra.mxu1 %v17786_v29  ;;  %14495 = vmatmul.mubr.msk.f32.gmra.mxu0 %vm234_vm0, %v17807_v60  ;;  %v17830_v49 = vadd.f32 %v6083_v17, %v6051_v33  ;;  %v19742_v36 = vld [vmem:[#allocation75_spill] sm:$0xff]  ;;  %v6053_v60 = vmul.f32 %v17341_v47, %v17330_v16  ;;  %v19743_v17 = vld [vmem:[#allocation76_spill] sm:$0xff] }
 0x31e   :  { %14509 = vmatmul.mubr.msk.f32.gmra.mxu1 %vm234_vm0, %v17816_v12  ;;  %14515 = vmatprep.subr.mxu0 %v17812_v54  ;;  %v6084_v56 = vmul.f32 %v19742_v36, %v17294_v6  ;;  %v17839_v59 = vadd.f32 %v6087_v21, %v6055_v41  ;;  %v6088_v33 = vmul.f32 %v19743_v17, %v17294_v6 }
 0x31f   :  { %14529 = vmatprep.subr.mxu1 %v17812_v54  ;;  %14516 = vmatpush3.msra.mxu0 %v17812_v54  ;;  %v6057_v57 = vmul.f32 %v17344_v37, %v17330_v16  ;;  %v6085_v41 = vmul.f32 %v17320_v0, %v17358_v20  ;;  %v6089_v47 = vmul.f32 %v17324_v19, %v17358_v20 }
 0x320   :  { %14519 = vmatprep.mubr.msk.f32.mxu0 %vm234_vm0, %v17830_v49  ;;  %14530 = vmatpush3.msra.mxu1 %v17812_v54  ;;  %v17854_v21 = vadd.f32 %v6084_v56, %v6052_v35  ;;  %v17861_v36 = vadd.f32 %v6088_v33, %v6056_v46  ;;  %v6054_v37 = vmul.f32 %v17334_v42, %v17362_v13 }
 0x321   :  { %14533 = vmatprep.mubr.msk.f32.mxu1 %vm234_vm0, %v17839_v59  ;;  %14517 = vmatprep.subr.mxu0 %v17835_v34  ;;  %v17867_v0 = vadd.f32 %v6085_v41, %v6053_v60  ;;  %v6058_v35 = vmul.f32 %v17336_v43, %v17362_v13  ;;  %v17874_v19 = vadd.f32 %v6089_v47, %v6057_v57 }
 0x322   :  { %14531 = vmatprep.subr.mxu1 %v17835_v34  ;;  %14518 = vmatpush3.msra.mxu0 %v17835_v34  ;;  %v6086_v42 = vmul.f32 %v17352_v32, %v17364_v23  ;;  %v6090_v60 = vmul.f32 %v17356_v48, %v17364_v23  ;;  %v6059_v43 = vmul.f32 %v17397_v14, %v17276_v8 }
 0x323   :  { %14532 = vmatpush3.msra.mxu1 %v17835_v34  ;;  %14520 = vmatmul.mubr.msk.f32.vlgmr.msra.gmra.mxu0 %vm234_vm0, %v17854_v21  ;;  %v6063_v32 = vmul.f32 %v17400_v7, %v17276_v8  ;;  %v6091_v48 = vmul.f32 %v17393_v5, %v17300_v25  ;;  %v6095_v14 = vmul.f32 %v17408_v45, %v17300_v25 }
 0x324   :  { %14534 = vmatmul.mubr.msk.f32.vlgmr.msra.gmra.mxu1 %vm234_vm0, %v17861_v36  ;;  %14539 = vmatprep.subr.mxu0 %v17765_v24  ;;  %v17891_v46 = vadd.f32 %v6086_v42, %v6054_v37  ;;  %v17899_v56 = vadd.f32 %v6090_v60, %v6058_v35  ;;  %v6060_v17 = vmul.f32 %v17415_v31, %v17292_v18  ;;  %v19745_v60 = vld [vmem:[#allocation24_spill] sm:$0xff] }
 0x325   :  { %14553 = vmatprep.subr.mxu1 %v17765_v24  ;;  %14522 = vmatprep.mubr.msk.f32.mxu0 %vm234_vm0, %v17867_v0  ;;  %v6064_v5 = vmul.f32 %v17419_v22, %v17292_v18  ;;  %v17912_v7 = vadd.f32 %v6091_v48, %v6059_v43  ;;  %v6092_v45 = vmul.f32 %v17434_v26, %v17294_v6  ;;  %v19747_v48 = vld [vmem:[#allocation26_spill] sm:$0xff] }
 0x326   :  { %14536 = vmatprep.mubr.msk.f32.mxu1 %vm234_vm0, %v17874_v19  ;;  %14540 = vmatpush3.msra.mxu0 %v17765_v24  ;;  %v17919_v33 = vadd.f32 %v6095_v14, %v6063_v32  ;;  %v6061_v31 = vmul.f32 %v17451_v40, %v17330_v16  ;;  %v6096_v22 = vmul.f32 %v17438_v28, %v17294_v6 }
 0x327   :  { %14554 = vmatpush3.msra.mxu1 %v17765_v24  ;;  %14541 = vmatprep.subr.mxu0 %v17786_v29  ;;  %v6065_v57 = vmul.f32 %v17454_v51, %v17330_v16  ;;  %v6093_v26 = vmul.f32 %v17467_v50, %v17358_v20  ;;  %v17934_v41 = vadd.f32 %v6092_v45, %v6060_v17  ;;  %v19748_v17 = vld [vmem:[#allocation42_spill] sm:$0xff] }
 0x328   :  { %14555 = vmatprep.subr.mxu1 %v17786_v29  ;;  %14542 = vmatpush3.msra.mxu0 %v17786_v29  ;;  %v6097_v28 = vmul.f32 %v17471_v10, %v17358_v20  ;;  %v17941_v40 = vadd.f32 %v6096_v22, %v6064_v5  ;;  %v6062_v51 = vmul.f32 %v17487_v63, %v17362_v13 }
 0x329   :  { %14556 = vmatpush3.msra.mxu1 %v17786_v29  ;;  %14523 = vmatmul.mubr.msk.f32.gmra.mxu0 %vm234_vm0, %v17891_v46  ;;  %v17947_v50 = vadd.f32 %v6093_v26, %v6061_v31  ;;  %v6066_v47 = vmul.f32 %v17490_v39, %v17362_v13  ;;  %v6094_v63 = vmul.f32 %v17504_v30, %v17364_v23  ;;  %v19744_v30 = vld [vmem:[#allocation57_spill] sm:$0xff]  ;;  %v19749_v31 = vld [vmem:[#allocation58_spill] sm:$0xff] }
 0x32a   :  { %14537 = vmatmul.mubr.msk.f32.gmra.mxu1 %vm234_vm0, %v17899_v56  ;;  %14543 = vmatprep.subr.mxu0 %v17812_v54  ;;  %v17954_v10 = vadd.f32 %v6097_v28, %v6065_v57  ;;  %v6098_v37 = vmul.f32 %v17508_v3, %v17364_v23  ;;  %v6067_v39 = vmul.f32 %v17516_v61, %v17276_v8  ;;  %v19746_v61 = vld [vmem:[#allocation27_spill] sm:$0xff]  ;;  %v19750_v26 = vld [vmem:[#allocation25_spill] sm:$0xff] }
 0x32b   :  { %14557 = vmatprep.subr.mxu1 %v17812_v54  ;;  %14544 = vmatpush3.msra.mxu0 %v17812_v54  ;;  %v17971_v35 = vadd.f32 %v6094_v63, %v6062_v51  ;;  %v6071_v42 = vmul.f32 %v19744_v30, %v17276_v8  ;;  %v6099_v3 = vmul.f32 %v19745_v60, %v17300_v25  ;;  %v19751_v51 = vld [vmem:[#allocation29_spill] sm:$0xff] }
 0x32c   :  { %14547 = vmatprep.mubr.msk.f32.mxu0 %vm234_vm0, %v17912_v7  ;;  %14558 = vmatpush3.msra.mxu1 %v17812_v54  ;;  %v17979_v43 = vadd.f32 %v6098_v37, %v6066_v47  ;;  %v6103_v32 = vmul.f32 %v19746_v61, %v17300_v25  ;;  %v6068_v14 = vmul.f32 %v19747_v48, %v17292_v18  ;;  %v19752_v37 = vld [vmem:[#allocation28_spill] sm:$0xff]  ;;  %v19755_v48 = vld [vmem:[#allocation46_spill] sm:$0xff] }
 0x32d   :  { %14561 = vmatprep.mubr.msk.f32.mxu1 %vm234_vm0, %v17919_v33  ;;  %14545 = vmatprep.subr.mxu0 %v17835_v34  ;;  %v6072_v5 = vmul.f32 %v19748_v17, %v17292_v18  ;;  %v17992_v45 = vadd.f32 %v6099_v3, %v6067_v39  ;;  %v6100_v22 = vmul.f32 %v19749_v31, %v17294_v6 }
 0x32e   :  { %14559 = vmatprep.subr.mxu1 %v17835_v34  ;;  %14546 = vmatpush3.msra.mxu0 %v17835_v34  ;;  %v17999_v57 = vadd.f32 %v6103_v32, %v6071_v42  ;;  %v6069_v28 = vmul.f32 %v19750_v26, %v17330_v16  ;;  %v6104_v47 = vmul.f32 %v19751_v51, %v17294_v6  ;;  %v19753_v42 = vld [vmem:[#allocation56_spill] sm:$0xff] }
 0x32f   :  { %14560 = vmatpush3.msra.mxu1 %v17835_v34  ;;  %14548 = vmatmul.mubr.msk.f32.vlgmr.msra.gmra.mxu0 %vm234_vm0, %v17934_v41  ;;  %v6073_v63 = vmul.f32 %v17578_v2, %v17330_v16  ;;  %v6101_v39 = vmul.f32 %v19752_v37, %v17358_v20  ;;  %v18014_v30 = vadd.f32 %v6100_v22, %v6068_v14  ;;  %v19754_v2 = vld [vmem:[#allocation45_spill] sm:$0xff]  ;;  %v19757_v22 = vld [vmem:[#allocation34_spill] sm:$0xff] }
 0x330   :  { %14562 = vmatmul.mubr.msk.f32.vlgmr.msra.gmra.mxu1 %vm234_vm0, %v17941_v40  ;;  %14567 = vmatprep.subr.mxu0 %v17765_v24  ;;  %v6105_v60 = vmul.f32 %v19753_v42, %v17358_v20  ;;  %v18021_v3 = vadd.f32 %v6104_v47, %v6072_v5  ;;  %v6070_v61 = vmul.f32 %v19754_v2, %v17362_v13  ;;  %v19756_v5 = vld [vmem:[#allocation33_spill] sm:$0xff] }
 0x331   :  { %14581 = vmatprep.subr.mxu1 %v17765_v24  ;;  %14550 = vmatprep.mubr.msk.f32.mxu0 %vm234_vm0, %v17947_v50  ;;  %v18027_v32 = vadd.f32 %v6101_v39, %v6069_v28  ;;  %v6074_v14 = vmul.f32 %v19755_v48, %v17362_v13  ;;  %v6102_v31 = vmul.f32 %v19756_v5, %v17364_v23  ;;  %v19760_v42 = vld [vmem:[#allocation49_spill] sm:$0xff]  ;;  %v19783_v5 = vld [vmem:[#allocation44_spill] sm:$0xff] }
 0x332   :  { %14564 = vmatprep.mubr.msk.f32.mxu1 %vm234_vm0, %v17954_v10  ;;  %14568 = vmatpush3.msra.mxu0 %v17765_v24  ;;  %v18034_v17 = vadd.f32 %v6105_v60, %v6073_v63  ;;  %v6106_v26 = vmul.f32 %v19757_v22, %v17364_v23  ;;  %v6075_v28 = vmul.f32 %v17647_v62, %v17276_v8  ;;  %v19786_v22 = vld [vmem:[#allocation47_spill] sm:$0xff] }
 0x333   :  { %14582 = vmatpush3.msra.mxu1 %v17765_v24  ;;  %14569 = vmatprep.subr.mxu0 %v17786_v29  ;;  %v18051_v51 = vadd.f32 %v6102_v31, %v6070_v61  ;;  %v6079_v47 = vmul.f32 %v17656_v1, %v17276_v8  ;;  %v6107_v63 = vmul.f32 %v17667_v58, %v17300_v25  ;;  %v19758_v1 = vld [vmem:[#allocation65_spill] sm:$0xff]  ;;  %v19784_v31 = vld [vmem:[#allocation32_spill] sm:$0xff] }
 0x334   :  { %14583 = vmatprep.subr.mxu1 %v17786_v29  ;;  %14570 = vmatpush3.msra.mxu0 %v17786_v29  ;;  %v18059_v37 = vadd.f32 %v6106_v26, %v6074_v14  ;;  %v6111_v62 = vmul.f32 %v17677_v55, %v17300_v25  ;;  %v6076_v39 = vmul.f32 %v17680_v53, %v17292_v18  ;;  %v18134_v14 = vld [vmem:[#allocation8 + $0x10] sm:$0xff]  ;;  %v19788_v26 = vld [vmem:[#allocation50_spill] sm:$0xff] }
 0x335   :  { %14584 = vmatpush3.msra.mxu1 %v17786_v29  ;;  %14551 = vmatmul.mubr.msk.f32.gmra.mxu0 %vm234_vm0, %v17971_v35  ;;  %v6080_v8 = vmul.f32 %v17687_v52, %v17292_v18  ;;  %v18072_v58 = vadd.f32 %v6107_v63, %v6075_v28  ;;  %v6108_v55 = vmul.f32 %v17673_v27, %v17294_v6  ;;  %v19759_v18 = vld [vmem:[#allocation66_spill] sm:$0xff] }
 0x336   :  { %14565 = vmatmul.mubr.msk.f32.gmra.mxu1 %vm234_vm0, %v17979_v43  ;;  %14571 = vmatprep.subr.mxu0 %v17812_v54  ;;  %v18079_v25 = vadd.f32 %v6111_v62, %v6079_v47  ;;  %v6077_v53 = vmul.f32 %v19758_v1, %v17330_v16  ;;  %v6112_v52 = vmul.f32 %v19759_v18, %v17294_v6  ;;  %v19789_v28 = vld [vmem:[#allocation38_spill] sm:$0xff]  ;;  %v19792_v47 = vld [vmem:[#allocation64_spill] sm:$0xff] }
 0x337   :  { %14585 = vmatprep.subr.mxu1 %v17812_v54  ;;  %14572 = vmatpush3.msra.mxu0 %v17812_v54  ;;  %v6081_v60 = vmul.f32 %v19760_v42, %v17330_v16  ;;  %v6109_v27 = vmul.f32 %v17718_v44, %v17358_v20  ;;  %v18094_v2 = vadd.f32 %v6108_v55, %v6076_v39 }
 0x338   :  { %14575 = vmatprep.mubr.msk.f32.mxu0 %vm234_vm0, %v17992_v45  ;;  %14586 = vmatpush3.msra.mxu1 %v17812_v54  ;;  %v6113_v6 = vmul.f32 %v17730_v9, %v17358_v20  ;;  %v18101_v61 = vadd.f32 %v6112_v52, %v6080_v8  ;;  %v6078_v16 = vmul.f32 %v17740_v38, %v17362_v13  ;;  %v18118_v9 = vld [vmem:[#allocation8 + $0x18] sm:$0xff] }
 0x339   :  { %14589 = vmatprep.mubr.msk.f32.mxu1 %vm234_vm0, %v17999_v57  ;;  %14573 = vmatprep.subr.mxu0 %v17835_v34  ;;  %v18107_v44 = vadd.f32 %v6109_v27, %v6077_v53  ;;  %v6082_v48 = vmul.f32 %v17749_v11, %v17362_v13  ;;  %v6110_v38 = vmul.f32 %v17757_v15, %v17364_v23 }
 0x33a   :  { %14587 = vmatprep.subr.mxu1 %v17835_v34  ;;  %14574 = vmatpush3.msra.mxu0 %v17835_v34  ;;  %v18114_v20 = vadd.f32 %v6113_v6, %v6081_v60  ;;  %v6114_v13 = vmul.f32 %v17769_v4, %v17364_v23  ;;  %v18146_v23 = vld [vmem:[#allocation8 + $0x8] sm:$0xff]  ;;  %v18156_v4 = vld [vmem:[#allocation8] sm:$0xff] }
 0x33b   :  { %14588 = vmatpush3.msra.mxu1 %v17835_v34  ;;  %14576 = vmatmul.mubr.msk.f32.vlgmr.msra.gmra.mxu0 %vm234_vm0, %v18014_v30  ;;  %v18131_v11 = vadd.f32 %v6110_v38, %v6078_v16 }
 0x33c   :  { %14590 = vmatmul.mubr.msk.f32.vlgmr.msra.gmra.mxu1 %vm234_vm0, %v18021_v3  ;;  %14595 = vmatprep.subr.mxu0 %v17765_v24  ;;  %v18137_v15 = vadd.f32 %v6114_v13, %v6082_v48 }
 0x33d   :  { %14609 = vmatprep.subr.mxu1 %v17765_v24  ;;  %14578 = vmatprep.mubr.msk.f32.mxu0 %vm234_vm0, %v18027_v32 }
 0x33e   :  { %14592 = vmatprep.mubr.msk.f32.mxu1 %vm234_vm0, %v18034_v17  ;;  %14596 = vmatpush3.msra.mxu0 %v17765_v24 }
 0x33f   :  { %14610 = vmatpush3.msra.mxu1 %v17765_v24  ;;  %14597 = vmatprep.subr.mxu0 %v17786_v29 }
 0x340   :  { %14611 = vmatprep.subr.mxu1 %v17786_v29  ;;  %14598 = vmatpush3.msra.mxu0 %v17786_v29 }
 0x341   :  { %14612 = vmatpush3.msra.mxu1 %v17786_v29  ;;  %14579 = vmatmul.mubr.msk.f32.gmra.mxu0 %vm234_vm0, %v18051_v51 }
 0x342   :  { %14593 = vmatmul.mubr.msk.f32.gmra.mxu1 %vm234_vm0, %v18059_v37  ;;  %14599 = vmatprep.subr.mxu0 %v17812_v54 }
 0x343   :  { %14613 = vmatprep.subr.mxu1 %v17812_v54  ;;  %14600 = vmatpush3.msra.mxu0 %v17812_v54 }
 0x344   :  { %14603 = vmatprep.mubr.msk.f32.mxu0 %vm234_vm0, %v18072_v58  ;;  %14614 = vmatpush3.msra.mxu1 %v17812_v54 }
 0x345   :  { %14617 = vmatprep.mubr.msk.f32.mxu1 %vm234_vm0, %v18079_v25  ;;  %14601 = vmatprep.subr.mxu0 %v17835_v34 }
 0x346   :  { %14615 = vmatprep.subr.mxu1 %v17835_v34  ;;  %14602 = vmatpush3.msra.mxu0 %v17835_v34 }
 0x347   :  { %14616 = vmatpush3.msra.mxu1 %v17835_v34  ;;  %14604 = vmatmul.mubr.msk.f32.vlgmr.msra.gmra.mxu0 %vm234_vm0, %v18094_v2 }
 0x348   :  { %14618 = vmatmul.mubr.msk.f32.vlgmr.msra.gmra.mxu1 %vm234_vm0, %v18101_v61  ;;  %14623 = vmatprep.subr.mxu0 %v18118_v9 }
 0x349   :  { %14637 = vmatprep.subr.mxu1 %v18118_v9  ;;  %14606 = vmatprep.mubr.msk.f32.mxu0 %vm234_vm0, %v18107_v44 }
 0x34a   :  { %14620 = vmatprep.mubr.msk.f32.mxu1 %vm234_vm0, %v18114_v20  ;;  %14624 = vmatpush3.msra.mxu0 %v18118_v9 }
 0x34b   :  { %14638 = vmatpush3.msra.mxu1 %v18118_v9  ;;  %14625 = vmatprep.subr.mxu0 %v18134_v14 }
 0x34c   :  { %14639 = vmatprep.subr.mxu1 %v18134_v14  ;;  %14626 = vmatpush3.msra.mxu0 %v18134_v14 }
 0x34d   :  { %14640 = vmatpush3.msra.mxu1 %v18134_v14  ;;  %14607 = vmatmul.mubr.msk.f32.gmra.mxu0 %vm234_vm0, %v18131_v11 }
 0x34e   :  { %14621 = vmatmul.mubr.msk.f32.gmra.mxu1 %vm234_vm0, %v18137_v15  ;;  %14627 = vmatprep.subr.mxu0 %v18146_v23 }
 0x34f   :  { %14641 = vmatprep.subr.mxu1 %v18146_v23  ;;  %14628 = vmatpush3.msra.mxu0 %v18146_v23 }
 0x350   :  { %14631 = vmatprep.mubr.msk.f32.mxu0 %vm234_vm0, %v17830_v49  ;;  %14642 = vmatpush3.msra.mxu1 %v18146_v23  ;;  %v19762_v49 = vld [vmem:[#allocation80_spill] sm:$0xff] }
 0x351   :  { %14645 = vmatprep.mubr.msk.f32.mxu1 %vm234_vm0, %v17839_v59  ;;  %14629 = vmatprep.subr.mxu0 %v18156_v4  ;;  %v19761_v59 = vld [vmem:[#allocation79_spill] sm:$0xff] }
 0x352   :  { %14643 = vmatprep.subr.mxu1 %v18156_v4  ;;  %14630 = vmatpush3.msra.mxu0 %v18156_v4 }
 0x353   :  { %14644 = vmatpush3.msra.mxu1 %v18156_v4  ;;  %14632 = vmatmul.mubr.msk.f32.vlgmr.msra.gmra.mxu0 %vm234_vm0, %v17854_v21  ;;  %v19763_v21 = vld [vmem:[#allocation81_spill] sm:$0xff] }
 0x354   :  { %14646 = vmatmul.mubr.msk.f32.vlgmr.msra.gmra.mxu1 %vm234_vm0, %v17861_v36  ;;  %14651 = vmatprep.subr.mxu0 %v18118_v9  ;;  %v19764_v36 = vld [vmem:[#allocation82_spill] sm:$0xff] }
 0x355   :  { %14665 = vmatprep.subr.mxu1 %v18118_v9  ;;  %14634 = vmatprep.mubr.msk.f32.mxu0 %vm234_vm0, %v17867_v0  ;;  %v19765_v0 = vld [vmem:[#allocation83_spill] sm:$0xff] }
 0x356   :  { %14648 = vmatprep.mubr.msk.f32.mxu1 %vm234_vm0, %v17874_v19  ;;  %14652 = vmatpush3.msra.mxu0 %v18118_v9  ;;  %v19766_v19 = vld [vmem:[#allocation84_spill] sm:$0xff] }
 0x357   :  { %14666 = vmatpush3.msra.mxu1 %v18118_v9  ;;  %14653 = vmatprep.subr.mxu0 %v18134_v14 }
 0x358   :  { %14667 = vmatprep.subr.mxu1 %v18134_v14  ;;  %14654 = vmatpush3.msra.mxu0 %v18134_v14 }
 0x359   :  { %14668 = vmatpush3.msra.mxu1 %v18134_v14  ;;  %14635 = vmatmul.mubr.msk.f32.gmra.mxu0 %vm234_vm0, %v17891_v46  ;;  %v19767_v46 = vld [vmem:[#allocation85_spill] sm:$0xff] }
 0x35a   :  { %14649 = vmatmul.mubr.msk.f32.gmra.mxu1 %vm234_vm0, %v17899_v56  ;;  %14655 = vmatprep.subr.mxu0 %v18146_v23  ;;  %v19768_v56 = vld [vmem:[#allocation86_spill] sm:$0xff] }
 0x35b   :  { %14669 = vmatprep.subr.mxu1 %v18146_v23  ;;  %14656 = vmatpush3.msra.mxu0 %v18146_v23 }
 0x35c   :  { %14659 = vmatprep.mubr.msk.f32.mxu0 %vm234_vm0, %v17912_v7  ;;  %14670 = vmatpush3.msra.mxu1 %v18146_v23  ;;  %v19769_v7 = vld [vmem:[#allocation87_spill] sm:$0xff] }
 0x35d   :  { %14673 = vmatprep.mubr.msk.f32.mxu1 %vm234_vm0, %v17919_v33  ;;  %14657 = vmatprep.subr.mxu0 %v18156_v4  ;;  %v19770_v33 = vld [vmem:[#allocation88_spill] sm:$0xff] }
 0x35e   :  { %14671 = vmatprep.subr.mxu1 %v18156_v4  ;;  %14658 = vmatpush3.msra.mxu0 %v18156_v4 }
 0x35f   :  { %14672 = vmatpush3.msra.mxu1 %v18156_v4  ;;  %14660 = vmatmul.mubr.msk.f32.vlgmr.msra.gmra.mxu0 %vm234_vm0, %v17934_v41  ;;  %v19771_v41 = vld [vmem:[#allocation89_spill] sm:$0xff] }
 0x360   :  { %14674 = vmatmul.mubr.msk.f32.vlgmr.msra.gmra.mxu1 %vm234_vm0, %v17941_v40  ;;  %14679 = vmatprep.subr.mxu0 %v18118_v9  ;;  %v19772_v40 = vld [vmem:[#allocation90_spill] sm:$0xff] }
 0x361   :  { %14693 = vmatprep.subr.mxu1 %v18118_v9  ;;  %14662 = vmatprep.mubr.msk.f32.mxu0 %vm234_vm0, %v17947_v50  ;;  %v19773_v50 = vld [vmem:[#allocation91_spill] sm:$0xff] }
 0x362   :  { %14676 = vmatprep.mubr.msk.f32.mxu1 %vm234_vm0, %v17954_v10  ;;  %14680 = vmatpush3.msra.mxu0 %v18118_v9  ;;  %v19774_v10 = vld [vmem:[#allocation92_spill] sm:$0xff] }
 0x363   :  { %14694 = vmatpush3.msra.mxu1 %v18118_v9  ;;  %14681 = vmatprep.subr.mxu0 %v18134_v14 }
 0x364   :  { %14695 = vmatprep.subr.mxu1 %v18134_v14  ;;  %14682 = vmatpush3.msra.mxu0 %v18134_v14 }
 0x365   :  { %14696 = vmatpush3.msra.mxu1 %v18134_v14  ;;  %14663 = vmatmul.mubr.msk.f32.gmra.mxu0 %vm234_vm0, %v17971_v35  ;;  %v19775_v35 = vld [vmem:[#allocation30_spill] sm:$0xff] }
 0x366   :  { %14677 = vmatmul.mubr.msk.f32.gmra.mxu1 %vm234_vm0, %v17979_v43  ;;  %14683 = vmatprep.subr.mxu0 %v18146_v23  ;;  %v19776_v43 = vld [vmem:[#allocation55_spill] sm:$0xff] }
 0x367   :  { %14697 = vmatprep.subr.mxu1 %v18146_v23  ;;  %14684 = vmatpush3.msra.mxu0 %v18146_v23 }
 0x368   :  { %14687 = vmatprep.mubr.msk.f32.mxu0 %vm234_vm0, %v17992_v45  ;;  %14698 = vmatpush3.msra.mxu1 %v18146_v23  ;;  %v19777_v45 = vld [vmem:[#allocation61_spill] sm:$0xff] }
 0x369   :  { %14701 = vmatprep.mubr.msk.f32.mxu1 %vm234_vm0, %v17999_v57  ;;  %14685 = vmatprep.subr.mxu0 %v18156_v4  ;;  %v19778_v57 = vld [vmem:[#allocation62_spill] sm:$0xff] }
 0x36a   :  { %14699 = vmatprep.subr.mxu1 %v18156_v4  ;;  %14686 = vmatpush3.msra.mxu0 %v18156_v4 }
 0x36b   :  { %14700 = vmatpush3.msra.mxu1 %v18156_v4  ;;  %14688 = vmatmul.mubr.msk.f32.vlgmr.msra.gmra.mxu0 %vm234_vm0, %v18014_v30  ;;  %v19779_v30 = vld [vmem:[#allocation59_spill] sm:$0xff] }
 0x36c   :  { %14702 = vmatmul.mubr.msk.f32.vlgmr.msra.gmra.mxu1 %vm234_vm0, %v18021_v3  ;;  %14707 = vmatprep.subr.mxu0 %v18118_v9  ;;  %v19780_v3 = vld [vmem:[#allocation43_spill] sm:$0xff] }
 0x36d   :  { %14721 = vmatprep.subr.mxu1 %v18118_v9  ;;  %14690 = vmatprep.mubr.msk.f32.mxu0 %vm234_vm0, %v18027_v32  ;;  %v19781_v32 = vld [vmem:[#allocation31_spill] sm:$0xff] }
 0x36e   :  { %14704 = vmatprep.mubr.msk.f32.mxu1 %vm234_vm0, %v18034_v17  ;;  %14708 = vmatpush3.msra.mxu0 %v18118_v9  ;;  %v19782_v17 = vld [vmem:[#allocation60_spill] sm:$0xff] }
 0x36f   :  { %14722 = vmatpush3.msra.mxu1 %v18118_v9  ;;  %14709 = vmatprep.subr.mxu0 %v18134_v14 }
 0x370   :  { %14723 = vmatprep.subr.mxu1 %v18134_v14  ;;  %14710 = vmatpush3.msra.mxu0 %v18134_v14 }
 0x371   :  { %14724 = vmatpush3.msra.mxu1 %v18134_v14  ;;  %14691 = vmatmul.mubr.msk.f32.gmra.mxu0 %vm234_vm0, %v18051_v51  ;;  %v18394_v51 = vld [vmem:[#allocation7] sm:$0xff] }
 0x372   :  { %14705 = vmatmul.mubr.msk.f32.gmra.mxu1 %vm234_vm0, %v18059_v37  ;;  %14711 = vmatprep.subr.mxu0 %v18146_v23  ;;  %19791 = vst [vmem:[#allocation69_spill] sm:$0xff] %v18394_v51 }
 0x373   :  { %14725 = vmatprep.subr.mxu1 %v18146_v23  ;;  %14712 = vmatpush3.msra.mxu0 %v18146_v23 }
 0x374   :  { %14715 = vmatprep.mubr.msk.f32.mxu0 %vm234_vm0, %v18072_v58  ;;  %14726 = vmatpush3.msra.mxu1 %v18146_v23 }
 0x375   :  { %14729 = vmatprep.mubr.msk.f32.mxu1 %vm234_vm0, %v18079_v25  ;;  %14713 = vmatprep.subr.mxu0 %v18156_v4 }
 0x376   :  { %14727 = vmatprep.subr.mxu1 %v18156_v4  ;;  %14714 = vmatpush3.msra.mxu0 %v18156_v4 }
 0x377   :  { %14728 = vmatpush3.msra.mxu1 %v18156_v4  ;;  %14716 = vmatmul.mubr.msk.f32.vlgmr.msra.gmra.mxu0 %vm234_vm0, %v18094_v2 }
 0x378   :  { %14730 = vmatmul.mubr.msk.f32.vlgmr.msra.gmra.mxu1 %vm234_vm0, %v18101_v61  ;;  %14735 = vmatprep.subr.mxu0 %v17765_v24 }
 0x379   :  { %14749 = vmatprep.subr.mxu1 %v17765_v24  ;;  %14718 = vmatprep.mubr.msk.f32.mxu0 %vm234_vm0, %v18107_v44 }
 0x37a   :  { %14732 = vmatprep.mubr.msk.f32.mxu1 %vm234_vm0, %v18114_v20  ;;  %14736 = vmatpush3.msra.mxu0 %v17765_v24 }
 0x37b   :  { %14750 = vmatpush3.msra.mxu1 %v17765_v24  ;;  %14737 = vmatprep.subr.mxu0 %v17786_v29 }
 0x37c   :  { %14751 = vmatprep.subr.mxu1 %v17786_v29  ;;  %14738 = vmatpush3.msra.mxu0 %v17786_v29 }
 0x37d   :  { %14752 = vmatpush3.msra.mxu1 %v17786_v29  ;;  %14719 = vmatmul.mubr.msk.f32.gmra.mxu0 %vm234_vm0, %v18131_v11 }
 0x37e   :  { %14733 = vmatmul.mubr.msk.f32.gmra.mxu1 %vm234_vm0, %v18137_v15  ;;  %14739 = vmatprep.subr.mxu0 %v17812_v54 }
 0x37f   :  { %14753 = vmatprep.subr.mxu1 %v17812_v54  ;;  %14740 = vmatpush3.msra.mxu0 %v17812_v54 }
 0x380   :  { %14743 = vmatprep.mubr.msk.f32.mxu0 %vm234_vm0, %v19761_v59  ;;  %14754 = vmatpush3.msra.mxu1 %v17812_v54 }
 0x381   :  { %14757 = vmatprep.mubr.msk.f32.mxu1 %vm234_vm0, %v19762_v49  ;;  %14741 = vmatprep.subr.mxu0 %v17835_v34 }
 0x382   :  { %14755 = vmatprep.subr.mxu1 %v17835_v34  ;;  %14742 = vmatpush3.msra.mxu0 %v17835_v34 }
 0x383   :  { %14756 = vmatpush3.msra.mxu1 %v17835_v34  ;;  %14744 = vmatmul.mubr.msk.f32.vlgmr.msra.gmra.mxu0 %vm234_vm0, %v19763_v21 }
 0x384   :  { %14758 = vmatmul.mubr.msk.f32.vlgmr.msra.gmra.mxu1 %vm234_vm0, %v19764_v36  ;;  %14763 = vmatprep.subr.mxu0 %v17765_v24 }
 0x385   :  { %14777 = vmatprep.subr.mxu1 %v17765_v24  ;;  %14746 = vmatprep.mubr.msk.f32.mxu0 %vm234_vm0, %v19765_v0 }
 0x386   :  { %14760 = vmatprep.mubr.msk.f32.mxu1 %vm234_vm0, %v19766_v19  ;;  %14764 = vmatpush3.msra.mxu0 %v17765_v24 }
 0x387   :  { %14778 = vmatpush3.msra.mxu1 %v17765_v24  ;;  %14765 = vmatprep.subr.mxu0 %v17786_v29 }
 0x388   :  { %14779 = vmatprep.subr.mxu1 %v17786_v29  ;;  %14766 = vmatpush3.msra.mxu0 %v17786_v29 }
 0x389   :  { %14780 = vmatpush3.msra.mxu1 %v17786_v29  ;;  %14747 = vmatmul.mubr.msk.f32.gmra.mxu0 %vm234_vm0, %v19767_v46 }
 0x38a   :  { %14761 = vmatmul.mubr.msk.f32.gmra.mxu1 %vm234_vm0, %v19768_v56  ;;  %14767 = vmatprep.subr.mxu0 %v17812_v54 }
 0x38b   :  { %14781 = vmatprep.subr.mxu1 %v17812_v54  ;;  %14768 = vmatpush3.msra.mxu0 %v17812_v54 }
 0x38c   :  { %14771 = vmatprep.mubr.msk.f32.mxu0 %vm234_vm0, %v19769_v7  ;;  %14782 = vmatpush3.msra.mxu1 %v17812_v54 }
 0x38d   :  { %14785 = vmatprep.mubr.msk.f32.mxu1 %vm234_vm0, %v19770_v33  ;;  %14769 = vmatprep.subr.mxu0 %v17835_v34 }
 0x38e   :  { %14783 = vmatprep.subr.mxu1 %v17835_v34  ;;  %14770 = vmatpush3.msra.mxu0 %v17835_v34 }
 0x38f   :  { %14784 = vmatpush3.msra.mxu1 %v17835_v34  ;;  %14772 = vmatmul.mubr.msk.f32.vlgmr.msra.gmra.mxu0 %vm234_vm0, %v19771_v41 }
 0x390   :  { %14786 = vmatmul.mubr.msk.f32.vlgmr.msra.gmra.mxu1 %vm234_vm0, %v19772_v40  ;;  %14791 = vmatprep.subr.mxu0 %v17765_v24 }
 0x391   :  { %14805 = vmatprep.subr.mxu1 %v17765_v24  ;;  %14774 = vmatprep.mubr.msk.f32.mxu0 %vm234_vm0, %v19773_v50 }
 0x392   :  { %14788 = vmatprep.mubr.msk.f32.mxu1 %vm234_vm0, %v19774_v10  ;;  %14792 = vmatpush3.msra.mxu0 %v17765_v24 }
 0x393   :  { %14806 = vmatpush3.msra.mxu1 %v17765_v24  ;;  %14793 = vmatprep.subr.mxu0 %v17786_v29 }
 0x394   :  { %14807 = vmatprep.subr.mxu1 %v17786_v29  ;;  %14794 = vmatpush3.msra.mxu0 %v17786_v29 }
 0x395   :  { %14808 = vmatpush3.msra.mxu1 %v17786_v29  ;;  %14775 = vmatmul.mubr.msk.f32.gmra.mxu0 %vm234_vm0, %v19775_v35 }
 0x396   :  { %14789 = vmatmul.mubr.msk.f32.gmra.mxu1 %vm234_vm0, %v19776_v43  ;;  %14795 = vmatprep.subr.mxu0 %v17812_v54 }
 0x397   :  { %14809 = vmatprep.subr.mxu1 %v17812_v54  ;;  %14796 = vmatpush3.msra.mxu0 %v17812_v54 }
 0x398   :  { %14799 = vmatprep.mubr.msk.f32.mxu0 %vm234_vm0, %v19777_v45  ;;  %14810 = vmatpush3.msra.mxu1 %v17812_v54 }
 0x399   :  { %14813 = vmatprep.mubr.msk.f32.mxu1 %vm234_vm0, %v19778_v57  ;;  %14797 = vmatprep.subr.mxu0 %v17835_v34 }
 0x39a   :  { %14811 = vmatprep.subr.mxu1 %v17835_v34  ;;  %14798 = vmatpush3.msra.mxu0 %v17835_v34 }
 0x39b   :  { %14812 = vmatpush3.msra.mxu1 %v17835_v34  ;;  %14800 = vmatmul.mubr.msk.f32.vlgmr.msra.gmra.mxu0 %vm234_vm0, %v19779_v30 }
 0x39c   :  { %14814 = vmatmul.mubr.msk.f32.vlgmr.msra.gmra.mxu1 %vm234_vm0, %v19780_v3  ;;  %14819 = vmatprep.subr.mxu0 %v17765_v24  ;;  %v18479_v3 = vld [vmem:[#allocation7 + $0x8] sm:$0xff] }
 0x39d   :  { %14833 = vmatprep.subr.mxu1 %v17765_v24  ;;  %14802 = vmatprep.mubr.msk.f32.mxu0 %vm234_vm0, %v19781_v32  ;;  %19793 = vst [vmem:[#allocation48_spill] sm:$0xff] %v18479_v3 }
 0x39e   :  { %14816 = vmatprep.mubr.msk.f32.mxu1 %vm234_vm0, %v19782_v17  ;;  %14820 = vmatpush3.msra.mxu0 %v17765_v24  ;;  %v18483_v17 = vld [vmem:[#allocation7 + $0x10] sm:$0xff] }
 0x39f   :  { %14834 = vmatpush3.msra.mxu1 %v17765_v24  ;;  %14821 = vmatprep.subr.mxu0 %v17786_v29  ;;  %v19785_v24 = vld [vmem:[#allocation37_spill] sm:$0xff]  ;;  %19794 = vst [vmem:[#allocation36_spill] sm:$0xff] %v18483_v17 }
 0x3a0   :  { %14835 = vmatprep.subr.mxu1 %v17786_v29  ;;  %14822 = vmatpush3.msra.mxu0 %v17786_v29 }
 0x3a1   :  { %14836 = vmatpush3.msra.mxu1 %v17786_v29  ;;  %14803 = vmatmul.mubr.msk.f32.gmra.mxu0 %vm234_vm0, %v19783_v5  ;;  %v19787_v29 = vld [vmem:[#allocation35_spill] sm:$0xff] }
 0x3a2   :  { %14817 = vmatmul.mubr.msk.f32.gmra.mxu1 %vm234_vm0, %v19784_v31  ;;  %14823 = vmatprep.subr.mxu0 %v17812_v54  ;;  %v18494_v31 = vld [vmem:[#allocation7 + $0x18] sm:$0xff] }
 0x3a3   :  { %14837 = vmatprep.subr.mxu1 %v17812_v54  ;;  %14824 = vmatpush3.msra.mxu0 %v17812_v54  ;;  %19795 = vst [vmem:[#allocation70_spill] sm:$0xff] %v18494_v31 }
 0x3a4   :  { %14827 = vmatprep.mubr.msk.f32.mxu0 %vm234_vm0, %v19785_v24  ;;  %14838 = vmatpush3.msra.mxu1 %v17812_v54  ;;  %v19790_v54 = vld [vmem:[#allocation63_spill] sm:$0xff] }
 0x3a5   :  { %14841 = vmatprep.mubr.msk.f32.mxu1 %vm234_vm0, %v19786_v22  ;;  %14825 = vmatprep.subr.mxu0 %v17835_v34 }
 0x3a6   :  { %14839 = vmatprep.subr.mxu1 %v17835_v34  ;;  %14826 = vmatpush3.msra.mxu0 %v17835_v34 }
 0x3a7   :  { %14840 = vmatpush3.msra.mxu1 %v17835_v34  ;;  %14828 = vmatmul.mubr.msk.f32.vlgmr.msra.gmra.mxu0 %vm234_vm0, %v19787_v29 }
 0x3a8   :  { %14842 = vmatmul.mubr.msk.f32.vlgmr.msra.gmra.mxu1 %vm234_vm0, %v19788_v26  ;;  %14830 = vmatprep.mubr.msk.f32.mxu0 %vm234_vm0, %v19789_v28 }
 0x3a9   :  { %14844 = vmatprep.mubr.msk.f32.mxu1 %vm234_vm0, %v19790_v54 }
 0x3ab   :  { %14831 = vmatmul.mubr.msk.f32.gmra.mxu0 %vm234_vm0, %v19792_v47  ;;  %v14409_v34 = vpop.f32.mrf.mxu0  ;;  %v14423_v63 = vpop.f32.mrf.mxu1 }
 0x3ac   :  { %14845 = vmatmul.mubr.msk.f32.gmra.mxu1 %vm234_vm0, %v17816_v12  ;;  %14855 = vmatprep.mubr.msk.f32.mxu0 %vm234_vm0, %v18394_v51 }
 0x3ad   :  { %14869 = vmatprep.mubr.msk.f32.mxu1 %vm234_vm0, %v18394_v51  ;;  %v6225_v37 = vpop.f32.mrf.mxu0  ;;  %v6322_v62 = vpop.f32.mrf.mxu1 }
 0x3b1   :  { %v14412_v39 = vpop.f32.mrf.mxu0  ;;  %v14426_v8 = vpop.f32.mrf.mxu1 }
 0x3b3   :  { %v6235_v58 = vpop.f32.mrf.mxu0  ;;  %v6332_v55 = vpop.f32.mrf.mxu1 }
 0x3b9   :  { %v18404_v25 = vpop.f32.mrf.mxu0  ;;  %v18406_v1 = vpop.f32.mrf.mxu1 }
 0x3bb   :  { %v18408_v53 = vpop.f32.mrf.mxu0  ;;  %v18410_v12 = vpop.f32.mrf.mxu1 }
 0x3c1   :  { %v18412_v18 = vpop.f32.mrf.mxu0  ;;  %v18414_v52 = vpop.f32.mrf.mxu1 }
 0x3c3   :  { %v18416_v42 = vpop.f32.mrf.mxu0  ;;  %v18418_v60 = vpop.f32.mrf.mxu1 }
 0x3c9   :  { %v18420_v27 = vpop.f32.mrf.mxu0 }
 0x3ca   :  { %v18422_v2 = vpop.f32.mrf.mxu1 }
 0x3cb   :  { %v18424_v6 = vpop.f32.mrf.mxu0 }
 0x3cc   :  { %v18426_v61 = vpop.f32.mrf.mxu1 }
 0x3d0   :  { %v18428_v16 = vpop.f32.mrf.mxu0 }
 0x3d1   :  { %v18430_v44 = vpop.f32.mrf.mxu1 }
 0x3d2   :  { %v18432_v48 = vpop.f32.mrf.mxu0 }
 0x3d3   :  { %v18434_v20 = vpop.f32.mrf.mxu1 }
 0x3d7   :  { %v18436_v9 = vpop.f32.mrf.mxu0 }
 0x3d8   :  { %v18438_v38 = vpop.f32.mrf.mxu1 }
 0x3d9   :  { %v18440_v13 = vpop.f32.mrf.mxu0 }
 0x3da   :  { %v18442_v11 = vpop.f32.mrf.mxu1 }
 0x3dd   :  { %v18444_v14 = vpop.f32.mrf.mxu0 }
 0x3de   :  { %v18446_v15 = vpop.f32.mrf.mxu1 }
 0x3df   :  { %v18448_v23 = vpop.f32.mrf.mxu0 }
 0x3e0   :  { %v18450_v4 = vpop.f32.mrf.mxu1 }
 0x3e3   :  { %v14521_v59 = vpop.f32.mrf.mxu0 }
 0x3e4   :  { %v14535_v49 = vpop.f32.mrf.mxu1  ;;  %v18463_v50 = vsub.f32 %v14409_v34, %v14521_v59 }
 0x3e5   :  { %v7001_v21 = vpop.f32.mrf.mxu0  ;;  %v18467_v10 = vsub.f32 %v14423_v63, %v14535_v49 }
 0x3e6   :  { %v7098_v36 = vpop.f32.mrf.mxu1  ;;  %v18471_v43 = vsub.f32 %v6225_v37, %v7001_v21 }
 0x3e7   :  { %v18475_v57 = vsub.f32 %v6322_v62, %v7098_v36 }
 0x3e9   :  { %v14524_v0 = vpop.f32.mrf.mxu0 }
 0x3ea   :  { %v18452_v19 = vsub.f32 %v14412_v39, %v14524_v0  ;;  %v14538_v46 = vpop.f32.mrf.mxu1 }
 0x3eb   :  { %v18454_v56 = vsub.f32 %v14426_v8, %v14538_v46  ;;  %v7011_v7 = vpop.f32.mrf.mxu0 }
 0x3ec   :  { %v18456_v33 = vsub.f32 %v6235_v58, %v7011_v7  ;;  %v7108_v41 = vpop.f32.mrf.mxu1  ;;  %14847 = vmatprep.subr.mxu0 %v18452_v19 }
 0x3ed   :  { %v18459_v40 = vsub.f32 %v6332_v55, %v7108_v41  ;;  %14861 = vmatprep.subr.mxu1 %v18454_v56  ;;  %14848 = vmatpush3.msra.mxu0 %v18452_v19 }
 0x3ee   :  { %14862 = vmatpush3.msra.mxu1 %v18454_v56  ;;  %14849 = vmatprep.subr.mxu0 %v18456_v33 }
 0x3ef   :  { %v14549_v35 = vpop.f32.mrf.mxu0  ;;  %14863 = vmatprep.subr.mxu1 %v18459_v40  ;;  %14850 = vmatpush3.msra.mxu0 %v18456_v33 }
 0x3f0   :  { %v14563_v45 = vpop.f32.mrf.mxu1  ;;  %14864 = vmatpush3.msra.mxu1 %v18459_v40  ;;  %14851 = vmatprep.subr.mxu0 %v18463_v50  ;;  %v18516_v34 = vsub.f32 %v18404_v25, %v14549_v35 }
 0x3f1   :  { %v7195_v30 = vpop.f32.mrf.mxu0  ;;  %14865 = vmatprep.subr.mxu1 %v18467_v10  ;;  %14852 = vmatpush3.msra.mxu0 %v18463_v50  ;;  %v18521_v63 = vsub.f32 %v18406_v1, %v14563_v45 }
 0x3f2   :  { %v7292_v32 = vpop.f32.mrf.mxu1  ;;  %14866 = vmatpush3.msra.mxu1 %v18467_v10  ;;  %14853 = vmatprep.subr.mxu0 %v18471_v43  ;;  %v18528_v39 = vsub.f32 %v18408_v53, %v7195_v30 }
 0x3f3   :  { %14867 = vmatprep.subr.mxu1 %v18475_v57  ;;  %14854 = vmatpush3.msra.mxu0 %v18471_v43  ;;  %v18531_v8 = vsub.f32 %v18410_v12, %v7292_v32 }
 0x3f4   :  { %14868 = vmatpush3.msra.mxu1 %v18475_v57  ;;  %14856 = vmatmul.mubr.msk.f32.vlgmr.msra.gmra.mxu0 %vm234_vm0, %v18479_v3 }
 0x3f5   :  { %v14552_v5 = vpop.f32.mrf.mxu0  ;;  %14870 = vmatmul.mubr.msk.f32.vlgmr.msra.gmra.mxu1 %vm234_vm0, %v18479_v3  ;;  %14858 = vmatprep.mubr.msk.f32.mxu0 %vm234_vm0, %v18483_v17 }
 0x3f6   :  { %v18497_v24 = vsub.f32 %v18412_v18, %v14552_v5  ;;  %v14566_v22 = vpop.f32.mrf.mxu1  ;;  %14872 = vmatprep.mubr.msk.f32.mxu1 %vm234_vm0, %v18483_v17  ;;  %v18674_v5 = vld [vmem:[#allocation7 + $0x20] sm:$0xff] }
 0x3f7   :  { %v18502_v29 = vsub.f32 %v18414_v52, %v14566_v22  ;;  %v7205_v26 = vpop.f32.mrf.mxu0 }
 0x3f8   :  { %v18505_v28 = vsub.f32 %v18416_v42, %v7205_v26  ;;  %v7302_v54 = vpop.f32.mrf.mxu1  ;;  %14875 = vmatprep.subr.mxu0 %v18497_v24  ;;  %14859 = vmatmul.mubr.msk.f32.gmra.mxu0 %vm234_vm0, %v18494_v31 }
 0x3f9   :  { %v18511_v47 = vsub.f32 %v18418_v60, %v7302_v54  ;;  %14889 = vmatprep.subr.mxu1 %v18502_v29  ;;  %14876 = vmatpush3.msra.mxu0 %v18497_v24 }
 0x3fa   :  { %14890 = vmatpush3.msra.mxu1 %v18502_v29  ;;  %14877 = vmatprep.subr.mxu0 %v18505_v28 }
 0x3fb   :  { %v14577_v37 = vpop.f32.mrf.mxu0  ;;  %14891 = vmatprep.subr.mxu1 %v18511_v47  ;;  %14878 = vmatpush3.msra.mxu0 %v18505_v28 }
 0x3fc   :  { %v14591_v62 = vpop.f32.mrf.mxu1  ;;  %14892 = vmatpush3.msra.mxu1 %v18511_v47  ;;  %14879 = vmatprep.subr.mxu0 %v18516_v34 }
 0x3fd   :  { %v7389_v58 = vpop.f32.mrf.mxu0  ;;  %14893 = vmatprep.subr.mxu1 %v18521_v63  ;;  %14873 = vmatmul.mubr.msk.f32.gmra.mxu1 %vm234_vm0, %v18494_v31 }
 0x3fe   :  { %v7486_v55 = vpop.f32.mrf.mxu1  ;;  %14880 = vmatpush3.msra.mxu0 %v18516_v34  ;;  %14894 = vmatpush3.msra.mxu1 %v18521_v63 }
 0x3ff   :  { %14881 = vmatprep.subr.mxu0 %v18528_v39  ;;  %14895 = vmatprep.subr.mxu1 %v18531_v8 }
 0x400   :  { %14882 = vmatpush3.msra.mxu0 %v18528_v39  ;;  %14896 = vmatpush3.msra.mxu1 %v18531_v8 }
 0x401   :  { %v14580_v25 = vpop.f32.mrf.mxu0  ;;  %14883 = vmatprep.mubr.msk.f32.mxu0 %vm234_vm0, %v18394_v51  ;;  %14897 = vmatprep.mubr.msk.f32.mxu1 %vm234_vm0, %v18394_v51 }
 0x402   :  { %v18547_v1 = vsub.f32 %v18428_v16, %v14580_v25  ;;  %v14594_v53 = vpop.f32.mrf.mxu1  ;;  %14884 = vmatmul.mubr.msk.f32.vlgmr.msra.gmra.mxu0 %vm234_vm0, %v18479_v3  ;;  %14898 = vmatmul.mubr.msk.f32.vlgmr.msra.gmra.mxu1 %vm234_vm0, %v18479_v3  ;;  %v18570_v16 = vsub.f32 %v18420_v27, %v14577_v37  ;;  %v18582_v27 = vsub.f32 %v18424_v6, %v7389_v58 }
 0x403   :  { %v18554_v12 = vsub.f32 %v18430_v44, %v14594_v53  ;;  %v7399_v18 = vpop.f32.mrf.mxu0  ;;  %14886 = vmatprep.mubr.msk.f32.mxu0 %vm234_vm0, %v18483_v17  ;;  %14900 = vmatprep.mubr.msk.f32.mxu1 %vm234_vm0, %v18483_v17  ;;  %v18575_v44 = vsub.f32 %v18422_v2, %v14591_v62  ;;  %v18588_v2 = vsub.f32 %v18426_v61, %v7486_v55 }
 0x404   :  { %v18561_v52 = vsub.f32 %v18432_v48, %v7399_v18  ;;  %v7496_v42 = vpop.f32.mrf.mxu1  ;;  %14903 = vmatprep.subr.mxu0 %v18547_v1  ;;  %19798 = vst [vmem:[#allocation54_spill] sm:$0xff] %v18570_v16  ;;  %19800 = vst [vmem:[#allocation67_spill] sm:$0xff] %v18582_v27 }
 0x405   :  { %v18565_v60 = vsub.f32 %v18434_v20, %v7496_v42  ;;  %14917 = vmatprep.subr.mxu1 %v18554_v12  ;;  %14904 = vmatpush3.msra.mxu0 %v18547_v1  ;;  %19799 = vst [vmem:[#allocation23_spill] sm:$0xff] %v18575_v44  ;;  %19801 = vst [vmem:[#allocation68_spill] sm:$0xff] %v18588_v2 }
 0x406   :  { %19796 = vst [vmem:[#allocation53_spill] sm:$0xff] %v18561_v52  ;;  %14918 = vmatpush3.msra.mxu1 %v18554_v12  ;;  %14905 = vmatprep.subr.mxu0 %v18561_v52 }
 0x407   :  { %19797 = vst [vmem:[#allocation41_spill] sm:$0xff] %v18565_v60  ;;  %v14605_v48 = vpop.f32.mrf.mxu0  ;;  %14919 = vmatprep.subr.mxu1 %v18565_v60  ;;  %14906 = vmatpush3.msra.mxu0 %v18561_v52 }
 0x408   :  { %v14619_v20 = vpop.f32.mrf.mxu1  ;;  %14920 = vmatpush3.msra.mxu1 %v18565_v60  ;;  %14907 = vmatprep.subr.mxu0 %v18570_v16 }
 0x409   :  { %v7583_v59 = vpop.f32.mrf.mxu0  ;;  %14921 = vmatprep.subr.mxu1 %v18575_v44  ;;  %14887 = vmatmul.mubr.msk.f32.gmra.mxu0 %vm234_vm0, %v18494_v31 }
 0x40a   :  { %v7680_v49 = vpop.f32.mrf.mxu1  ;;  %14901 = vmatmul.mubr.msk.f32.gmra.mxu1 %vm234_vm0, %v18494_v31  ;;  %14908 = vmatpush3.msra.mxu0 %v18570_v16 }
 0x40b   :  { %14922 = vmatpush3.msra.mxu1 %v18575_v44  ;;  %14909 = vmatprep.subr.mxu0 %v18582_v27 }
 0x40c   :  { %14923 = vmatprep.subr.mxu1 %v18588_v2  ;;  %14910 = vmatpush3.msra.mxu0 %v18582_v27 }
 0x40d   :  { %v14608_v6 = vpop.f32.mrf.mxu0  ;;  %14924 = vmatpush3.msra.mxu1 %v18588_v2  ;;  %14911 = vmatprep.mubr.msk.f32.mxu0 %vm234_vm0, %v18394_v51 }
 0x40e   :  { %v18601_v61 = vsub.f32 %v18444_v14, %v14608_v6  ;;  %v14622_v21 = vpop.f32.mrf.mxu1  ;;  %14925 = vmatprep.mubr.msk.f32.mxu1 %vm234_vm0, %v18394_v51  ;;  %14912 = vmatmul.mubr.msk.f32.vlgmr.msra.gmra.mxu0 %vm234_vm0, %v18479_v3 }
 0x40f   :  { %v18608_v36 = vsub.f32 %v18446_v15, %v14622_v21  ;;  %v7593_v0 = vpop.f32.mrf.mxu0  ;;  %14926 = vmatmul.mubr.msk.f32.vlgmr.msra.gmra.mxu1 %vm234_vm0, %v18479_v3  ;;  %14914 = vmatprep.mubr.msk.f32.mxu0 %vm234_vm0, %v18483_v17  ;;  %v18626_v15 = vsub.f32 %v18436_v9, %v14605_v48  ;;  %v18645_v9 = vsub.f32 %v18442_v11, %v7680_v49 }
 0x410   :  { %19802 = vst [vmem:[#allocation51_spill] sm:$0xff] %v18601_v61  ;;  %v18615_v14 = vsub.f32 %v18448_v23, %v7593_v0  ;;  %v7690_v46 = vpop.f32.mrf.mxu1  ;;  %14931 = vmatprep.subr.mxu0 %v18601_v61  ;;  %14928 = vmatprep.mubr.msk.f32.mxu1 %vm234_vm0, %v18483_v17  ;;  %v18631_v23 = vsub.f32 %v18438_v38, %v14619_v20 }
 0x411   :  { %19803 = vst [vmem:[#allocation39_spill] sm:$0xff] %v18608_v36  ;;  %v18621_v7 = vsub.f32 %v18450_v4, %v7690_v46  ;;  %14945 = vmatprep.subr.mxu1 %v18608_v36  ;;  %14932 = vmatpush3.msra.mxu0 %v18601_v61  ;;  %19806 = vst [vmem:[#allocation77_spill] sm:$0xff] %v18626_v15  ;;  %v18638_v4 = vsub.f32 %v18440_v13, %v7583_v59 }
 0x412   :  { %19804 = vst [vmem:[#allocation52_spill] sm:$0xff] %v18615_v14  ;;  %14946 = vmatpush3.msra.mxu1 %v18608_v36  ;;  %14933 = vmatprep.subr.mxu0 %v18615_v14  ;;  %19807 = vst [vmem:[#allocation78_spill] sm:$0xff] %v18631_v23 }
 0x413   :  { %19805 = vst [vmem:[#allocation40_spill] sm:$0xff] %v18621_v7  ;;  %v18633_v41 = vpop.f32.mrf.mxu0  ;;  %14947 = vmatprep.subr.mxu1 %v18621_v7  ;;  %14934 = vmatpush3.msra.mxu0 %v18615_v14  ;;  %19808 = vst [vmem:[#allocation71_spill] sm:$0xff] %v18638_v4 }
 0x414   :  { %v18640_v35 = vpop.f32.mrf.mxu1  ;;  %14948 = vmatpush3.msra.mxu1 %v18621_v7  ;;  %14935 = vmatprep.subr.mxu0 %v18626_v15  ;;  %19809 = vst [vmem:[#allocation73_spill] sm:$0xff] %v18645_v9 }
 0x415   :  { %v18647_v38 = vpop.f32.mrf.mxu0  ;;  %14949 = vmatprep.subr.mxu1 %v18631_v23  ;;  %14936 = vmatpush3.msra.mxu0 %v18626_v15 }
 0x416   :  { %v18651_v45 = vpop.f32.mrf.mxu1  ;;  %14950 = vmatpush3.msra.mxu1 %v18631_v23  ;;  %14937 = vmatprep.subr.mxu0 %v18638_v4 }
 0x417   :  { %14951 = vmatprep.subr.mxu1 %v18645_v9  ;;  %14938 = vmatpush3.msra.mxu0 %v18638_v4 }
 0x418   :  { %14952 = vmatpush3.msra.mxu1 %v18645_v9  ;;  %14915 = vmatmul.mubr.msk.f32.gmra.mxu0 %vm234_vm0, %v18494_v31 }
 0x419   :  { %v14636_v13 = vpop.f32.mrf.mxu0  ;;  %14929 = vmatmul.mubr.msk.f32.gmra.mxu1 %vm234_vm0, %v18494_v31  ;;  %14939 = vmatprep.mubr.msk.f32.mxu0 %vm234_vm0, %v18394_v51 }
 0x41a   :  { %v14650_v11 = vpop.f32.mrf.mxu1  ;;  %14953 = vmatprep.mubr.msk.f32.mxu1 %vm234_vm0, %v18394_v51 }
 0x41b   :  { %v7807_v30 = vpop.f32.mrf.mxu0 }
 0x41c   :  { %v7892_v32 = vpop.f32.mrf.mxu1  ;;  %14940 = vmatmul.mubr.msk.f32.vlgmr.msra.gmra.mxu0 %vm234_vm0, %v18479_v3 }
 0x41d   :  { %14954 = vmatmul.mubr.msk.f32.vlgmr.msra.gmra.mxu1 %vm234_vm0, %v18479_v3  ;;  %14942 = vmatprep.mubr.msk.f32.mxu0 %vm234_vm0, %v18483_v17 }
 0x41e   :  { %14956 = vmatprep.mubr.msk.f32.mxu1 %vm234_vm0, %v18483_v17 }
 0x41f   :  { %v18676_v22 = vpop.f32.mrf.mxu0 }
 0x420   :  { %v18678_v26 = vpop.f32.mrf.mxu1  ;;  %14943 = vmatmul.mubr.msk.f32.gmra.mxu0 %vm234_vm0, %v18494_v31 }
 0x421   :  { %v18682_v54 = vpop.f32.mrf.mxu0  ;;  %14957 = vmatmul.mubr.msk.f32.gmra.mxu1 %vm234_vm0, %v18494_v31  ;;  %14967 = vmatprep.mubr.msk.f32.mxu0 %vm234_vm0, %v18674_v5 }
 0x422   :  { %v18688_v37 = vpop.f32.mrf.mxu1  ;;  %14981 = vmatprep.mubr.msk.f32.mxu1 %vm234_vm0, %v18674_v5 }
 0x425   :  { %v18692_v62 = vpop.f32.mrf.mxu0 }
 0x426   :  { %v18694_v58 = vpop.f32.mrf.mxu1 }
 0x427   :  { %v18696_v55 = vpop.f32.mrf.mxu0 }
 0x428   :  { %v18698_v25 = vpop.f32.mrf.mxu1 }
 0x42b   :  { %v18700_v53 = vpop.f32.mrf.mxu0 }
 0x42c   :  { %v18702_v18 = vpop.f32.mrf.mxu1 }
 0x42d   :  { %v18704_v42 = vpop.f32.mrf.mxu0 }
 0x42e   :  { %v18706_v48 = vpop.f32.mrf.mxu1 }
 0x431   :  { %v18708_v20 = vpop.f32.mrf.mxu0 }
 0x432   :  { %v18710_v59 = vpop.f32.mrf.mxu1 }
 0x433   :  { %v18712_v49 = vpop.f32.mrf.mxu0 }
 0x434   :  { %v18714_v6 = vpop.f32.mrf.mxu1 }
 0x437   :  { %v18716_v21 = vpop.f32.mrf.mxu0 }
 0x438   :  { %v18718_v0 = vpop.f32.mrf.mxu1 }
 0x439   :  { %v18720_v46 = vpop.f32.mrf.mxu0 }
 0x43a   :  { %v18722_v31 = vpop.f32.mrf.mxu1 }
 0x43d   :  { %v18724_v17 = vpop.f32.mrf.mxu0 }
 0x43e   :  { %v18726_v3 = vpop.f32.mrf.mxu1 }
 0x43f   :  { %v18728_v51 = vpop.f32.mrf.mxu0 }
 0x440   :  { %v18730_v9 = vpop.f32.mrf.mxu1 }
 0x443   :  { %v14745_v4 = vpop.f32.mrf.mxu0 }
 0x444   :  { %v14759_v23 = vpop.f32.mrf.mxu1  ;;  %v18744_v52 = vadd.f32 %v14745_v4, %v18633_v41 }
 0x445   :  { %v8477_v15 = vpop.f32.mrf.mxu0 }
 0x446   :  { %v8562_v7 = vpop.f32.mrf.mxu1 }
 0x447   :  { %v18759_v41 = vadd.f32 %v8562_v7, %v18651_v45 }
 0x449   :  { %v14748_v14 = vpop.f32.mrf.mxu0  ;;  %19810 = vst [vmem:[#allocation72_spill] sm:$0xff] %v18759_v41 }
 0x44a   :  { %v18732_v36 = vadd.f32 %v14748_v14, %v14636_v13  ;;  %v14762_v61 = vpop.f32.mrf.mxu1 }
 0x44b   :  { %v18734_v2 = vadd.f32 %v14762_v61, %v14650_v11  ;;  %v8487_v27 = vpop.f32.mrf.mxu0  ;;  %v18749_v61 = vadd.f32 %v14759_v23, %v18640_v35  ;;  %v18763_v23 = vld [vmem:[#allocation7 + $0x28] sm:$0xff] }
 0x44c   :  { %v18736_v44 = vadd.f32 %v8487_v27, %v7807_v30  ;;  %v8572_v16 = vpop.f32.mrf.mxu1  ;;  %14959 = vmatprep.subr.mxu0 %v18732_v36 }
 0x44d   :  { %v18739_v60 = vadd.f32 %v8572_v16, %v7892_v32  ;;  %14973 = vmatprep.subr.mxu1 %v18734_v2  ;;  %14960 = vmatpush3.msra.mxu0 %v18732_v36  ;;  %v18754_v16 = vadd.f32 %v8477_v15, %v18647_v38  ;;  %v18767_v15 = vld [vmem:[#allocation7 + $0x30] sm:$0xff]  ;;  %v18778_v38 = vld [vmem:[#allocation7 + $0x38] sm:$0xff] }
 0x44e   :  { %14974 = vmatpush3.msra.mxu1 %v18734_v2  ;;  %14961 = vmatprep.subr.mxu0 %v18736_v44 }
 0x44f   :  { %v14773_v27 = vpop.f32.mrf.mxu0  ;;  %14975 = vmatprep.subr.mxu1 %v18739_v60  ;;  %14962 = vmatpush3.msra.mxu0 %v18736_v44 }
 0x450   :  { %v14787_v14 = vpop.f32.mrf.mxu1  ;;  %14976 = vmatpush3.msra.mxu1 %v18739_v60  ;;  %14963 = vmatprep.subr.mxu0 %v18744_v52 }
 0x451   :  { %v8647_v4 = vpop.f32.mrf.mxu0  ;;  %14977 = vmatprep.subr.mxu1 %v18749_v61  ;;  %14964 = vmatpush3.msra.mxu0 %v18744_v52 }
 0x452   :  { %v8732_v35 = vpop.f32.mrf.mxu1  ;;  %14978 = vmatpush3.msra.mxu1 %v18749_v61  ;;  %14965 = vmatprep.subr.mxu0 %v18754_v16 }
 0x453   :  { %14979 = vmatprep.subr.mxu1 %v18759_v41  ;;  %14966 = vmatpush3.msra.mxu0 %v18754_v16 }
 0x454   :  { %14980 = vmatpush3.msra.mxu1 %v18759_v41  ;;  %14968 = vmatmul.mubr.msk.f32.vlgmr.msra.gmra.mxu0 %vm234_vm0, %v18763_v23 }
 0x455   :  { %v14776_v7 = vpop.f32.mrf.mxu0  ;;  %14982 = vmatmul.mubr.msk.f32.vlgmr.msra.gmra.mxu1 %vm234_vm0, %v18763_v23  ;;  %14970 = vmatprep.mubr.msk.f32.mxu0 %vm234_vm0, %v18767_v15 }
 0x456   :  { %v18781_v45 = vadd.f32 %v14776_v7, %v18692_v62  ;;  %v14790_v13 = vpop.f32.mrf.mxu1  ;;  %14984 = vmatprep.mubr.msk.f32.mxu1 %vm234_vm0, %v18767_v15 }
 0x457   :  { %v18786_v11 = vadd.f32 %v14790_v13, %v18694_v58  ;;  %v8657_v30 = vpop.f32.mrf.mxu0  ;;  %v18800_v58 = vadd.f32 %v14773_v27, %v18676_v22  ;;  %v18812_v22 = vadd.f32 %v8647_v4, %v18682_v54  ;;  %v18815_v27 = vadd.f32 %v8732_v35, %v18688_v37 }
 0x458   :  { %v18789_v32 = vadd.f32 %v8657_v30, %v18696_v55  ;;  %v8742_v41 = vpop.f32.mrf.mxu1  ;;  %14987 = vmatprep.subr.mxu0 %v18781_v45  ;;  %14971 = vmatmul.mubr.msk.f32.gmra.mxu0 %vm234_vm0, %v18778_v38  ;;  %v18805_v55 = vadd.f32 %v14787_v14, %v18678_v26 }
 0x459   :  { %v18795_v62 = vadd.f32 %v8742_v41, %v18698_v25  ;;  %15001 = vmatprep.subr.mxu1 %v18786_v11  ;;  %14988 = vmatpush3.msra.mxu0 %v18781_v45 }
 0x45a   :  { %15002 = vmatpush3.msra.mxu1 %v18786_v11  ;;  %14989 = vmatprep.subr.mxu0 %v18789_v32 }
 0x45b   :  { %v14801_v7 = vpop.f32.mrf.mxu0  ;;  %15003 = vmatprep.subr.mxu1 %v18795_v62  ;;  %14990 = vmatpush3.msra.mxu0 %v18789_v32 }
 0x45c   :  { %v14815_v25 = vpop.f32.mrf.mxu1  ;;  %15004 = vmatpush3.msra.mxu1 %v18795_v62  ;;  %14991 = vmatprep.subr.mxu0 %v18800_v58 }
 0x45d   :  { %v8817_v41 = vpop.f32.mrf.mxu0  ;;  %14985 = vmatmul.mubr.msk.f32.gmra.mxu1 %vm234_vm0, %v18778_v38  ;;  %15005 = vmatprep.subr.mxu1 %v18805_v55 }
 0x45e   :  { %v8902_v26 = vpop.f32.mrf.mxu1  ;;  %14992 = vmatpush3.msra.mxu0 %v18800_v58  ;;  %15006 = vmatpush3.msra.mxu1 %v18805_v55 }
 0x45f   :  { %14993 = vmatprep.subr.mxu0 %v18812_v22  ;;  %15007 = vmatprep.subr.mxu1 %v18815_v27 }
 0x460   :  { %14994 = vmatpush3.msra.mxu0 %v18812_v22  ;;  %14995 = vmatprep.mubr.msk.f32.mxu0 %vm234_vm0, %v18674_v5 }
 0x461   :  { %v14804_v54 = vpop.f32.mrf.mxu0  ;;  %15008 = vmatpush3.msra.mxu1 %v18815_v27  ;;  %15009 = vmatprep.mubr.msk.f32.mxu1 %vm234_vm0, %v18674_v5 }
 0x462   :  { %v18831_v37 = vadd.f32 %v14804_v54, %v18708_v20  ;;  %v14818_v14 = vpop.f32.mrf.mxu1  ;;  %14996 = vmatmul.mubr.msk.f32.vlgmr.msra.gmra.mxu0 %vm234_vm0, %v18763_v23  ;;  %15010 = vmatmul.mubr.msk.f32.vlgmr.msra.gmra.mxu1 %vm234_vm0, %v18763_v23 }
 0x463   :  { %v18838_v4 = vadd.f32 %v14818_v14, %v18710_v59  ;;  %v8827_v35 = vpop.f32.mrf.mxu0  ;;  %14998 = vmatprep.mubr.msk.f32.mxu0 %vm234_vm0, %v18767_v15  ;;  %15012 = vmatprep.mubr.msk.f32.mxu1 %vm234_vm0, %v18767_v15  ;;  %v18856_v59 = vadd.f32 %v14801_v7, %v18700_v53  ;;  %v18867_v14 = vadd.f32 %v8817_v41, %v18704_v42 }
 0x464   :  { %v18845_v20 = vadd.f32 %v8827_v35, %v18712_v49  ;;  %v8912_v13 = vpop.f32.mrf.mxu1  ;;  %15015 = vmatprep.subr.mxu0 %v18831_v37  ;;  %v18861_v49 = vadd.f32 %v14815_v25, %v18702_v18  ;;  %v18873_v53 = vadd.f32 %v8902_v26, %v18706_v48 }
 0x465   :  { %v18849_v30 = vadd.f32 %v8912_v13, %v18714_v6  ;;  %15029 = vmatprep.subr.mxu1 %v18838_v4  ;;  %15016 = vmatpush3.msra.mxu0 %v18831_v37 }
 0x466   :  { %15030 = vmatpush3.msra.mxu1 %v18838_v4  ;;  %15017 = vmatprep.subr.mxu0 %v18845_v20 }
 0x467   :  { %v14829_v54 = vpop.f32.mrf.mxu0  ;;  %15031 = vmatprep.subr.mxu1 %v18849_v30  ;;  %15018 = vmatpush3.msra.mxu0 %v18845_v20 }
 0x468   :  { %v14843_v6 = vpop.f32.mrf.mxu1  ;;  %15032 = vmatpush3.msra.mxu1 %v18849_v30  ;;  %14999 = vmatmul.mubr.msk.f32.gmra.mxu0 %vm234_vm0, %v18778_v38 }
 0x469   :  { %v8987_v35 = vpop.f32.mrf.mxu0  ;;  %15013 = vmatmul.mubr.msk.f32.gmra.mxu1 %vm234_vm0, %v18778_v38  ;;  %15019 = vmatprep.subr.mxu0 %v18856_v59 }
 0x46a   :  { %v9072_v18 = vpop.f32.mrf.mxu1  ;;  %15033 = vmatprep.subr.mxu1 %v18861_v49  ;;  %15020 = vmatpush3.msra.mxu0 %v18856_v59 }
 0x46b   :  { %v14832_v7 = vpop.f32.mrf.mxu0  ;;  %15034 = vmatpush3.msra.mxu1 %v18861_v49  ;;  %15021 = vmatprep.subr.mxu0 %v18867_v14 }
 0x46c   :  { %v18880_v42 = vadd.f32 %v14832_v7, %v18724_v17  ;;  %v14846_v25 = vpop.f32.mrf.mxu1  ;;  %15035 = vmatprep.subr.mxu1 %v18873_v53  ;;  %15022 = vmatpush3.msra.mxu0 %v18867_v14 }
 0x46d   :  { %v18885_v48 = vadd.f32 %v14846_v25, %v18726_v3  ;;  %v8997_v41 = vpop.f32.mrf.mxu0  ;;  %15023 = vmatprep.mubr.msk.f32.mxu0 %vm234_vm0, %v18674_v5  ;;  %15036 = vmatpush3.msra.mxu1 %v18873_v53  ;;  %v18917_v3 = vadd.f32 %v14843_v6, %v18718_v0 }
 0x46e   :  { %v18891_v26 = vadd.f32 %v8997_v41, %v18728_v51  ;;  %v9082_v13 = vpop.f32.mrf.mxu1  ;;  %15037 = vmatprep.mubr.msk.f32.mxu1 %vm234_vm0, %v18674_v5  ;;  %15024 = vmatmul.mubr.msk.f32.vlgmr.msra.gmra.mxu0 %vm234_vm0, %v18763_v23  ;;  %v18911_v51 = vadd.f32 %v14829_v54, %v18716_v21  ;;  %v18929_v21 = vadd.f32 %v9072_v18, %v18722_v31  ;;  %v19819_v31 = vld [vmem:[#allocation52_spill] sm:$0xff] }
 0x46f   :  { %v18898_v17 = vadd.f32 %v9082_v13, %v18730_v9  ;;  %15038 = vmatmul.mubr.msk.f32.vlgmr.msra.gmra.mxu1 %vm234_vm0, %v18763_v23  ;;  %15043 = vmatprep.subr.mxu0 %v18880_v42  ;;  %v18923_v9 = vadd.f32 %v8987_v35, %v18720_v46 }
 0x470   :  { %15057 = vmatprep.subr.mxu1 %v18885_v48  ;;  %15044 = vmatpush3.msra.mxu0 %v18880_v42 }
 0x471   :  { %15058 = vmatpush3.msra.mxu1 %v18885_v48  ;;  %15045 = vmatprep.subr.mxu0 %v18891_v26 }
 0x472   :  { %15059 = vmatprep.subr.mxu1 %v18898_v17  ;;  %15026 = vmatprep.mubr.msk.f32.mxu0 %vm234_vm0, %v18767_v15 }
 0x473   :  { %15040 = vmatprep.mubr.msk.f32.mxu1 %vm234_vm0, %v18767_v15  ;;  %15046 = vmatpush3.msra.mxu0 %v18891_v26 }
 0x474   :  { %15060 = vmatpush3.msra.mxu1 %v18898_v17  ;;  %15027 = vmatmul.mubr.msk.f32.gmra.mxu0 %vm234_vm0, %v18778_v38 }
 0x475   :  { %15041 = vmatmul.mubr.msk.f32.gmra.mxu1 %vm234_vm0, %v18778_v38  ;;  %15047 = vmatprep.subr.mxu0 %v18911_v51 }
 0x476   :  { %15061 = vmatprep.subr.mxu1 %v18917_v3  ;;  %15048 = vmatpush3.msra.mxu0 %v18911_v51 }
 0x477   :  { %15062 = vmatpush3.msra.mxu1 %v18917_v3  ;;  %15049 = vmatprep.subr.mxu0 %v18923_v9 }
 0x478   :  { %15063 = vmatprep.subr.mxu1 %v18929_v21  ;;  %15050 = vmatpush3.msra.mxu0 %v18923_v9 }
 0x479   :  { %15051 = vmatprep.mubr.msk.f32.mxu0 %vm234_vm0, %v18674_v5  ;;  %15064 = vmatpush3.msra.mxu1 %v18929_v21 }
 0x47a   :  { %15065 = vmatprep.mubr.msk.f32.mxu1 %vm234_vm0, %v18674_v5  ;;  %15052 = vmatmul.mubr.msk.f32.vlgmr.msra.gmra.mxu0 %vm234_vm0, %v18763_v23 }
 0x47b   :  { %15066 = vmatmul.mubr.msk.f32.vlgmr.msra.gmra.mxu1 %vm234_vm0, %v18763_v23  ;;  %15071 = vmatprep.subr.mxu0 %v18452_v19 }
 0x47c   :  { %15085 = vmatprep.subr.mxu1 %v18454_v56  ;;  %15072 = vmatpush3.msra.mxu0 %v18452_v19  ;;  %v19811_v19 = vld [vmem:[#allocation53_spill] sm:$0xff] }
 0x47d   :  { %15086 = vmatpush3.msra.mxu1 %v18454_v56  ;;  %15073 = vmatprep.subr.mxu0 %v18456_v33  ;;  %v19812_v56 = vld [vmem:[#allocation41_spill] sm:$0xff] }
 0x47e   :  { %15087 = vmatprep.subr.mxu1 %v18459_v40  ;;  %15054 = vmatprep.mubr.msk.f32.mxu0 %vm234_vm0, %v18767_v15 }
 0x47f   :  { %15068 = vmatprep.mubr.msk.f32.mxu1 %vm234_vm0, %v18767_v15  ;;  %15074 = vmatpush3.msra.mxu0 %v18456_v33  ;;  %v19813_v33 = vld [vmem:[#allocation54_spill] sm:$0xff] }
 0x480   :  { %15088 = vmatpush3.msra.mxu1 %v18459_v40  ;;  %15055 = vmatmul.mubr.msk.f32.gmra.mxu0 %vm234_vm0, %v18778_v38  ;;  %v19814_v40 = vld [vmem:[#allocation23_spill] sm:$0xff] }
 0x481   :  { %15069 = vmatmul.mubr.msk.f32.gmra.mxu1 %vm234_vm0, %v18778_v38  ;;  %15075 = vmatprep.subr.mxu0 %v18463_v50 }
 0x482   :  { %15089 = vmatprep.subr.mxu1 %v18467_v10  ;;  %15076 = vmatpush3.msra.mxu0 %v18463_v50  ;;  %v19815_v50 = vld [vmem:[#allocation67_spill] sm:$0xff] }
 0x483   :  { %15090 = vmatpush3.msra.mxu1 %v18467_v10  ;;  %15077 = vmatprep.subr.mxu0 %v18471_v43  ;;  %v19816_v10 = vld [vmem:[#allocation68_spill] sm:$0xff] }
 0x484   :  { %15091 = vmatprep.subr.mxu1 %v18475_v57  ;;  %15078 = vmatpush3.msra.mxu0 %v18471_v43  ;;  %v19817_v43 = vld [vmem:[#allocation51_spill] sm:$0xff] }
 0x485   :  { %15079 = vmatprep.mubr.msk.f32.mxu0 %vm234_vm0, %v18674_v5  ;;  %15092 = vmatpush3.msra.mxu1 %v18475_v57  ;;  %v19818_v57 = vld [vmem:[#allocation39_spill] sm:$0xff] }
 0x486   :  { %15093 = vmatprep.mubr.msk.f32.mxu1 %vm234_vm0, %v18674_v5  ;;  %15080 = vmatmul.mubr.msk.f32.vlgmr.msra.gmra.mxu0 %vm234_vm0, %v18763_v23 }
 0x487   :  { %15094 = vmatmul.mubr.msk.f32.vlgmr.msra.gmra.mxu1 %vm234_vm0, %v18763_v23  ;;  %15099 = vmatprep.subr.mxu0 %v18497_v24 }
 0x488   :  { %15113 = vmatprep.subr.mxu1 %v18502_v29  ;;  %15100 = vmatpush3.msra.mxu0 %v18497_v24  ;;  %v19820_v24 = vld [vmem:[#allocation40_spill] sm:$0xff] }
 0x489   :  { %15114 = vmatpush3.msra.mxu1 %v18502_v29  ;;  %15101 = vmatprep.subr.mxu0 %v18505_v28  ;;  %v19821_v29 = vld [vmem:[#allocation77_spill] sm:$0xff] }
 0x48a   :  { %15115 = vmatprep.subr.mxu1 %v18511_v47  ;;  %15082 = vmatprep.mubr.msk.f32.mxu0 %vm234_vm0, %v18767_v15 }
 0x48b   :  { %15096 = vmatprep.mubr.msk.f32.mxu1 %vm234_vm0, %v18767_v15  ;;  %15102 = vmatpush3.msra.mxu0 %v18505_v28  ;;  %v19822_v28 = vld [vmem:[#allocation78_spill] sm:$0xff] }
 0x48c   :  { %15116 = vmatpush3.msra.mxu1 %v18511_v47  ;;  %15083 = vmatmul.mubr.msk.f32.gmra.mxu0 %vm234_vm0, %v18778_v38  ;;  %v19823_v47 = vld [vmem:[#allocation71_spill] sm:$0xff] }
 0x48d   :  { %15097 = vmatmul.mubr.msk.f32.gmra.mxu1 %vm234_vm0, %v18778_v38  ;;  %15103 = vmatprep.subr.mxu0 %v18516_v34 }
 0x48e   :  { %15117 = vmatprep.subr.mxu1 %v18521_v63  ;;  %15104 = vmatpush3.msra.mxu0 %v18516_v34  ;;  %v19824_v34 = vld [vmem:[#allocation73_spill] sm:$0xff] }
 0x48f   :  { %15118 = vmatpush3.msra.mxu1 %v18521_v63  ;;  %15105 = vmatprep.subr.mxu0 %v18528_v39  ;;  %v19825_v63 = vld [vmem:[#allocation72_spill] sm:$0xff] }
 0x490   :  { %15119 = vmatprep.subr.mxu1 %v18531_v8  ;;  %15106 = vmatpush3.msra.mxu0 %v18528_v39  ;;  %v19826_v39 = vld [vmem:[#allocation69_spill] sm:$0xff] }
 0x491   :  { %15107 = vmatprep.mubr.msk.f32.mxu0 %vm234_vm0, %v18674_v5  ;;  %15120 = vmatpush3.msra.mxu1 %v18531_v8  ;;  %v19827_v8 = vld [vmem:[#allocation48_spill] sm:$0xff] }
 0x492   :  { %15121 = vmatprep.mubr.msk.f32.mxu1 %vm234_vm0, %v18674_v5  ;;  %15108 = vmatmul.mubr.msk.f32.vlgmr.msra.gmra.mxu0 %vm234_vm0, %v18763_v23 }
 0x493   :  { %15122 = vmatmul.mubr.msk.f32.vlgmr.msra.gmra.mxu1 %vm234_vm0, %v18763_v23  ;;  %15127 = vmatprep.subr.mxu0 %v18547_v1 }
 0x494   :  { %15141 = vmatprep.subr.mxu1 %v18554_v12  ;;  %15128 = vmatpush3.msra.mxu0 %v18547_v1  ;;  %v19828_v1 = vld [vmem:[#allocation36_spill] sm:$0xff] }
 0x495   :  { %15142 = vmatpush3.msra.mxu1 %v18554_v12  ;;  %15129 = vmatprep.subr.mxu0 %v19811_v19  ;;  %v19829_v12 = vld [vmem:[#allocation70_spill] sm:$0xff] }
 0x496   :  { %15143 = vmatprep.subr.mxu1 %v19812_v56  ;;  %15110 = vmatprep.mubr.msk.f32.mxu0 %vm234_vm0, %v18767_v15 }
 0x497   :  { %15124 = vmatprep.mubr.msk.f32.mxu1 %vm234_vm0, %v18767_v15  ;;  %15130 = vmatpush3.msra.mxu0 %v19811_v19 }
 0x498   :  { %15144 = vmatpush3.msra.mxu1 %v19812_v56  ;;  %15111 = vmatmul.mubr.msk.f32.gmra.mxu0 %vm234_vm0, %v18778_v38 }
 0x499   :  { %15125 = vmatmul.mubr.msk.f32.gmra.mxu1 %vm234_vm0, %v18778_v38  ;;  %15131 = vmatprep.subr.mxu0 %v19813_v33 }
 0x49a   :  { %15145 = vmatprep.subr.mxu1 %v19814_v40  ;;  %15132 = vmatpush3.msra.mxu0 %v19813_v33 }
 0x49b   :  { %15146 = vmatpush3.msra.mxu1 %v19814_v40  ;;  %15133 = vmatprep.subr.mxu0 %v19815_v50 }
 0x49c   :  { %15147 = vmatprep.subr.mxu1 %v19816_v10  ;;  %15134 = vmatpush3.msra.mxu0 %v19815_v50 }
 0x49d   :  { %15135 = vmatprep.mubr.msk.f32.mxu0 %vm234_vm0, %v18674_v5  ;;  %15148 = vmatpush3.msra.mxu1 %v19816_v10 }
 0x49e   :  { %15149 = vmatprep.mubr.msk.f32.mxu1 %vm234_vm0, %v18674_v5  ;;  %15136 = vmatmul.mubr.msk.f32.vlgmr.msra.gmra.mxu0 %vm234_vm0, %v18763_v23 }
 0x49f   :  { %15150 = vmatmul.mubr.msk.f32.vlgmr.msra.gmra.mxu1 %vm234_vm0, %v18763_v23  ;;  %15155 = vmatprep.subr.mxu0 %v19817_v43 }
 0x4a0   :  { %15169 = vmatprep.subr.mxu1 %v19818_v57  ;;  %15156 = vmatpush3.msra.mxu0 %v19817_v43 }
 0x4a1   :  { %15170 = vmatpush3.msra.mxu1 %v19818_v57  ;;  %15157 = vmatprep.subr.mxu0 %v19819_v31 }
 0x4a2   :  { %15171 = vmatprep.subr.mxu1 %v19820_v24  ;;  %15138 = vmatprep.mubr.msk.f32.mxu0 %vm234_vm0, %v18767_v15 }
 0x4a3   :  { %15152 = vmatprep.mubr.msk.f32.mxu1 %vm234_vm0, %v18767_v15  ;;  %15158 = vmatpush3.msra.mxu0 %v19819_v31 }
 0x4a4   :  { %15172 = vmatpush3.msra.mxu1 %v19820_v24  ;;  %15139 = vmatmul.mubr.msk.f32.gmra.mxu0 %vm234_vm0, %v18778_v38 }
 0x4a5   :  { %15153 = vmatmul.mubr.msk.f32.gmra.mxu1 %vm234_vm0, %v18778_v38  ;;  %15159 = vmatprep.subr.mxu0 %v19821_v29 }
 0x4a6   :  { %15173 = vmatprep.subr.mxu1 %v19822_v28  ;;  %15160 = vmatpush3.msra.mxu0 %v19821_v29 }
 0x4a7   :  { %15174 = vmatpush3.msra.mxu1 %v19822_v28  ;;  %15161 = vmatprep.subr.mxu0 %v19823_v47 }
 0x4a8   :  { %15175 = vmatprep.subr.mxu1 %v19824_v34  ;;  %15162 = vmatpush3.msra.mxu0 %v19823_v47 }
 0x4a9   :  { %15163 = vmatprep.mubr.msk.f32.mxu0 %vm234_vm0, %v18674_v5  ;;  %15176 = vmatpush3.msra.mxu1 %v19824_v34 }
 0x4aa   :  { %15177 = vmatprep.mubr.msk.f32.mxu1 %vm234_vm0, %v18674_v5  ;;  %15164 = vmatmul.mubr.msk.f32.vlgmr.msra.gmra.mxu0 %vm234_vm0, %v18763_v23  ;;  %v15315_v5 = vld [vmem:[#allocation7 + $0x10] sm:$0xff] }
 0x4ab   :  { %15178 = vmatmul.mubr.msk.f32.vlgmr.msra.gmra.mxu1 %vm234_vm0, %v18763_v23  ;;  %15183 = vmatprep.subr.mxu0 %v18732_v36 }
 0x4ac   :  { %15197 = vmatprep.subr.mxu1 %v18734_v2  ;;  %15184 = vmatpush3.msra.mxu0 %v18732_v36 }
 0x4ad   :  { %15198 = vmatpush3.msra.mxu1 %v18734_v2  ;;  %15185 = vmatprep.subr.mxu0 %v18736_v44  ;;  %v15314_v2 = vld [vmem:[#allocation7 + $0x8] sm:$0xff] }
 0x4ae   :  { %15199 = vmatprep.subr.mxu1 %v18739_v60  ;;  %15166 = vmatprep.mubr.msk.f32.mxu0 %vm234_vm0, %v18767_v15 }
 0x4af   :  { %15180 = vmatprep.mubr.msk.f32.mxu1 %vm234_vm0, %v18767_v15  ;;  %15186 = vmatpush3.msra.mxu0 %v18736_v44 }
 0x4b0   :  { %15200 = vmatpush3.msra.mxu1 %v18739_v60  ;;  %15167 = vmatmul.mubr.msk.f32.gmra.mxu0 %vm234_vm0, %v18778_v38 }
 0x4b1   :  { %15181 = vmatmul.mubr.msk.f32.gmra.mxu1 %vm234_vm0, %v18778_v38  ;;  %15187 = vmatprep.subr.mxu0 %v18744_v52 }
 0x4b2   :  { %15201 = vmatprep.subr.mxu1 %v18749_v61  ;;  %15188 = vmatpush3.msra.mxu0 %v18744_v52  ;;  %v15313_v52 = vld [vmem:[#allocation7] sm:$0xff] }
 0x4b3   :  { %15202 = vmatpush3.msra.mxu1 %v18749_v61  ;;  %15189 = vmatprep.subr.mxu0 %v18754_v16 }
 0x4b4   :  { %15203 = vmatprep.subr.mxu1 %v19825_v63  ;;  %15190 = vmatpush3.msra.mxu0 %v18754_v16  ;;  %v14857_v60 = vpop.f32.mrf.mxu0 }
 0x4b5   :  { %15191 = vmatprep.mubr.msk.f32.mxu0 %vm234_vm0, %v19826_v39  ;;  %15204 = vmatpush3.msra.mxu1 %v19825_v63  ;;  %v14871_v44 = vpop.f32.mrf.mxu1 }
 0x4b6   :  { %15205 = vmatprep.mubr.msk.f32.mxu1 %vm234_vm0, %v19826_v39  ;;  %15192 = vmatmul.mubr.msk.f32.vlgmr.msra.gmra.mxu0 %vm234_vm0, %v19827_v8  ;;  %v9169_v36 = vpop.f32.mrf.mxu0 }
 0x4b7   :  { %15206 = vmatmul.mubr.msk.f32.vlgmr.msra.gmra.mxu1 %vm234_vm0, %v19827_v8  ;;  %15211 = vmatprep.subr.mxu0 %v18781_v45  ;;  %v9254_v0 = vpop.f32.mrf.mxu1 }
 0x4b8   :  { %15225 = vmatprep.subr.mxu1 %v18786_v11  ;;  %15212 = vmatpush3.msra.mxu0 %v18781_v45  ;;  %v14860_v46 = vpop.f32.mrf.mxu0 }
 0x4b9   :  { %15226 = vmatpush3.msra.mxu1 %v18786_v11  ;;  %15213 = vmatprep.subr.mxu0 %v18789_v32 }
 0x4ba   :  { %15227 = vmatprep.subr.mxu1 %v18795_v62  ;;  %15194 = vmatprep.mubr.msk.f32.mxu0 %vm234_vm0, %v19828_v1  ;;  %v9179_v16 = vpop.f32.mrf.mxu0 }
 0x4bb   :  { %15208 = vmatprep.mubr.msk.f32.mxu1 %vm234_vm0, %v19828_v1  ;;  %15214 = vmatpush3.msra.mxu0 %v18789_v32 }
 0x4bc   :  { %15228 = vmatpush3.msra.mxu1 %v18795_v62  ;;  %15195 = vmatmul.mubr.msk.f32.gmra.mxu0 %vm234_vm0, %v19829_v12 }
 0x4bd   :  { %15209 = vmatmul.mubr.msk.f32.gmra.mxu1 %vm234_vm0, %v19829_v12  ;;  %15215 = vmatprep.subr.mxu0 %v18800_v58  ;;  %v14874_v61 = vpop.f32.mrf.mxu1 }
 0x4be   :  { %15229 = vmatprep.subr.mxu1 %v18805_v55  ;;  %15216 = vmatpush3.msra.mxu0 %v18800_v58 }
 0x4bf   :  { %15230 = vmatpush3.msra.mxu1 %v18805_v55  ;;  %15217 = vmatprep.subr.mxu0 %v18812_v22  ;;  %v9264_v23 = vpop.f32.mrf.mxu1 }
 0x4c0   :  { %15231 = vmatprep.subr.mxu1 %v18815_v27  ;;  %15218 = vmatpush3.msra.mxu0 %v18812_v22 }
 0x4c1   :  { %15219 = vmatprep.mubr.msk.f32.mxu0 %vm234_vm0, %v15313_v52  ;;  %15232 = vmatpush3.msra.mxu1 %v18815_v27 }
 0x4c2   :  { %15233 = vmatprep.mubr.msk.f32.mxu1 %vm234_vm0, %v15313_v52  ;;  %15220 = vmatmul.mubr.msk.f32.vlgmr.msra.gmra.mxu0 %vm234_vm0, %v19827_v8  ;;  %v14885_v15 = vpop.f32.mrf.mxu0  ;;  %v14899_v38 = vpop.f32.mrf.mxu1 }
 0x4c3   :  { %15234 = vmatmul.mubr.msk.f32.vlgmr.msra.gmra.mxu1 %vm234_vm0, %v19827_v8  ;;  %15239 = vmatprep.subr.mxu0 %v18831_v37 }
 0x4c4   :  { %15253 = vmatprep.subr.mxu1 %v18838_v4  ;;  %15240 = vmatpush3.msra.mxu0 %v18831_v37  ;;  %v9339_v45 = vpop.f32.mrf.mxu0  ;;  %v9424_v11 = vpop.f32.mrf.mxu1 }
 0x4c5   :  { %15254 = vmatpush3.msra.mxu1 %v18838_v4  ;;  %15241 = vmatprep.subr.mxu0 %v18845_v20 }
 0x4c6   :  { %15255 = vmatprep.subr.mxu1 %v18849_v30  ;;  %15222 = vmatprep.mubr.msk.f32.mxu0 %vm234_vm0, %v19828_v1 }
 0x4c7   :  { %15236 = vmatprep.mubr.msk.f32.mxu1 %vm234_vm0, %v19828_v1  ;;  %15242 = vmatpush3.msra.mxu0 %v18845_v20 }
 0x4c8   :  { %15256 = vmatpush3.msra.mxu1 %v18849_v30  ;;  %15223 = vmatmul.mubr.msk.f32.gmra.mxu0 %vm234_vm0, %v19829_v12 }
 0x4c9   :  { %15237 = vmatmul.mubr.msk.f32.gmra.mxu1 %vm234_vm0, %v19829_v12  ;;  %15243 = vmatprep.subr.mxu0 %v18856_v59  ;;  %v14888_v32 = vpop.f32.mrf.mxu0 }
 0x4ca   :  { %15257 = vmatprep.subr.mxu1 %v18861_v49  ;;  %15244 = vmatpush3.msra.mxu0 %v18856_v59  ;;  %v19200_v62 = vpop.f32.mrf.mxu1 }
 0x4cb   :  { %15258 = vmatpush3.msra.mxu1 %v18861_v49  ;;  %15245 = vmatprep.subr.mxu0 %v18867_v14  ;;  %v19202_v58 = vpop.f32.mrf.mxu0 }
 0x4cc   :  { %15259 = vmatprep.subr.mxu1 %v18873_v53  ;;  %15246 = vmatpush3.msra.mxu0 %v18867_v14  ;;  %v19204_v55 = vpop.f32.mrf.mxu1 }
 0x4cd   :  { %15247 = vmatprep.mubr.msk.f32.mxu0 %vm234_vm0, %v15313_v52  ;;  %15260 = vmatpush3.msra.mxu1 %v18873_v53 }
 0x4ce   :  { %15261 = vmatprep.mubr.msk.f32.mxu1 %vm234_vm0, %v15313_v52  ;;  %15248 = vmatmul.mubr.msk.f32.vlgmr.msra.gmra.mxu0 %vm234_vm0, %v19827_v8  ;;  %v19206_v22 = vpop.f32.mrf.mxu0 }
 0x4cf   :  { %15262 = vmatmul.mubr.msk.f32.vlgmr.msra.gmra.mxu1 %vm234_vm0, %v19827_v8  ;;  %15267 = vmatprep.subr.mxu0 %v18880_v42  ;;  %v19208_v27 = vpop.f32.mrf.mxu1 }
 0x4d0   :  { %15281 = vmatprep.subr.mxu1 %v18885_v48  ;;  %15268 = vmatpush3.msra.mxu0 %v18880_v42  ;;  %v19210_v37 = vpop.f32.mrf.mxu0 }
 0x4d1   :  { %15282 = vmatpush3.msra.mxu1 %v18885_v48  ;;  %15269 = vmatprep.subr.mxu0 %v18891_v26  ;;  %v19212_v4 = vpop.f32.mrf.mxu1 }
 0x4d2   :  { %15283 = vmatprep.subr.mxu1 %v18898_v17  ;;  %15250 = vmatprep.mubr.msk.f32.mxu0 %vm234_vm0, %v19828_v1 }
 0x4d3   :  { %15264 = vmatprep.mubr.msk.f32.mxu1 %vm234_vm0, %v19828_v1  ;;  %15270 = vmatpush3.msra.mxu0 %v18891_v26 }
 0x4d4   :  { %15284 = vmatpush3.msra.mxu1 %v18898_v17  ;;  %15251 = vmatmul.mubr.msk.f32.gmra.mxu0 %vm234_vm0, %v19829_v12 }
 0x4d5   :  { %15265 = vmatmul.mubr.msk.f32.gmra.mxu1 %vm234_vm0, %v19829_v12  ;;  %15271 = vmatprep.subr.mxu0 %v18911_v51 }
 0x4d6   :  { %15285 = vmatprep.subr.mxu1 %v18917_v3  ;;  %15272 = vmatpush3.msra.mxu0 %v18911_v51 }
 0x4d7   :  { %15286 = vmatpush3.msra.mxu1 %v18917_v3  ;;  %15273 = vmatprep.subr.mxu0 %v18923_v9 }
 0x4d8   :  { %15287 = vmatprep.subr.mxu1 %v18929_v21  ;;  %15274 = vmatpush3.msra.mxu0 %v18923_v9  ;;  %v19214_v20 = vpop.f32.mrf.mxu0 }
 0x4d9   :  { %15275 = vmatprep.mubr.msk.f32.mxu0 %vm234_vm0, %v15313_v52  ;;  %15288 = vmatpush3.msra.mxu1 %v18929_v21  ;;  %v19216_v30 = vpop.f32.mrf.mxu1 }
 0x4da   :  { %15289 = vmatprep.mubr.msk.f32.mxu1 %vm234_vm0, %v15313_v52  ;;  %15276 = vmatmul.mubr.msk.f32.vlgmr.msra.gmra.mxu0 %vm234_vm0, %v15314_v2  ;;  %v19218_v59 = vpop.f32.mrf.mxu0 }
 0x4db   :  { %15290 = vmatmul.mubr.msk.f32.vlgmr.msra.gmra.mxu1 %vm234_vm0, %v15314_v2  ;;  %15278 = vmatprep.mubr.msk.f32.mxu0 %vm234_vm0, %v15315_v5  ;;  %v19220_v54 = vpop.f32.mrf.mxu1 }
 0x4dc   :  { %15292 = vmatprep.mubr.msk.f32.mxu1 %vm234_vm0, %v15315_v5  ;;  %v19222_v49 = vpop.f32.mrf.mxu0 }
 0x4dd   :  { %v19224_v6 = vpop.f32.mrf.mxu1 }
 0x4de   :  { %15279 = vmatmul.mubr.msk.f32.gmra.mxu0 %vm234_vm0, %v19829_v12  ;;  %v19226_v14 = vpop.f32.mrf.mxu0 }
 0x4df   :  { %15293 = vmatmul.mubr.msk.f32.gmra.mxu1 %vm234_vm0, %v19829_v12  ;;  %v19228_v35 = vpop.f32.mrf.mxu1 }
 0x4e0   :  { %v19230_v53 = vpop.f32.mrf.mxu0 }
 0x4e1   :  { %v19232_v18 = vpop.f32.mrf.mxu1 }
 0x4e2   :  { %v19234_v7 = vpop.f32.mrf.mxu0 }
 0x4e3   :  { %v19236_v42 = vpop.f32.mrf.mxu1 }
 0x514   :  { %v14969_v25 = vpop.f32.mrf.mxu0 }
 0x515   :  { %v10476_v48 = vsub.f32 %v14857_v60, %v14969_v25  ;;  %v14983_v41 = vpop.f32.mrf.mxu1 }
 0x516   :  { %v10480_v26 = vsub.f32 %v14871_v44, %v14983_v41  ;;  %v9861_v13 = vpop.f32.mrf.mxu0 }
 0x517   :  { %11868 = vst.msk [vmem:[#allocation14 + $0x8] sm:$0xff] %vm234_vm0, %v10476_v48  ;;  %v10475_v17 = vsub.f32 %v9169_v36, %v9861_v13  ;;  %v9946_v51 = vpop.f32.mrf.mxu1 }
 0x518   :  { %11872 = vst.msk [vmem:[#allocation14 + $0x28] sm:$0xff] %vm234_vm0, %v10480_v26  ;;  %v10479_v3 = vsub.f32 %v9254_v0, %v9946_v51  ;;  %v14972_v9 = vpop.f32.mrf.mxu0 }
 0x519   :  { %11867 = vst.msk [vmem:[#allocation14] sm:$0xff] %vm234_vm0, %v10475_v17  ;;  %v10478_v21 = vsub.f32 %v14860_v46, %v14972_v9 }
 0x51a   :  { %11871 = vst.msk [vmem:[#allocation14 + $0x20] sm:$0xff] %vm234_vm0, %v10479_v3  ;;  %v9871_v19 = vpop.f32.mrf.mxu0 }
 0x51b   :  { %11870 = vst.msk [vmem:[#allocation14 + $0x18] sm:$0xff] %vm234_vm0, %v10478_v21  ;;  %v10477_v56 = vsub.f32 %v9179_v16, %v9871_v19 }
 0x51d   :  { %v14986_v33 = vpop.f32.mrf.mxu1  ;;  %11869 = vst.msk [vmem:[#allocation14 + $0x10] sm:$0xff] %vm234_vm0, %v10477_v56 }
 0x51e   :  { %v10482_v40 = vsub.f32 %v14874_v61, %v14986_v33 }
 0x51f   :  { %v9956_v50 = vpop.f32.mrf.mxu1 }
 0x520   :  { %11874 = vst.msk [vmem:[#allocation14 + $0x38] sm:$0xff] %vm234_vm0, %v10482_v40  ;;  %v10481_v10 = vsub.f32 %v9264_v23, %v9956_v50 }
 0x522   :  { %11873 = vst.msk [vmem:[#allocation14 + $0x30] sm:$0xff] %vm234_vm0, %v10481_v10  ;;  %v14997_v43 = vpop.f32.mrf.mxu0  ;;  %v15011_v57 = vpop.f32.mrf.mxu1 }
 0x523   :  { %v10484_v31 = vsub.f32 %v14885_v15, %v14997_v43  ;;  %v10488_v24 = vsub.f32 %v14899_v38, %v15011_v57 }
 0x524   :  { %v10031_v29 = vpop.f32.mrf.mxu0  ;;  %v10116_v28 = vpop.f32.mrf.mxu1 }
 0x525   :  { %11876 = vst.msk [vmem:[#allocation14 + $0x48] sm:$0xff] %vm234_vm0, %v10484_v31  ;;  %11880 = vst.msk [vmem:[#allocation14 + $0x68] sm:$0xff] %vm234_vm0, %v10488_v24  ;;  %v10483_v47 = vsub.f32 %v9339_v45, %v10031_v29  ;;  %v10487_v34 = vsub.f32 %v9424_v11, %v10116_v28 }
 0x527   :  { %11875 = vst.msk [vmem:[#allocation14 + $0x40] sm:$0xff] %vm234_vm0, %v10483_v47  ;;  %11879 = vst.msk [vmem:[#allocation14 + $0x60] sm:$0xff] %vm234_vm0, %v10487_v34 }
 0x528   :  { %v15000_v63 = vpop.f32.mrf.mxu0 }
 0x529   :  { %v10486_v39 = vsub.f32 %v14888_v32, %v15000_v63  ;;  %v15014_v8 = vpop.f32.mrf.mxu1 }
 0x52a   :  { %v10490_v1 = vsub.f32 %v19200_v62, %v15014_v8  ;;  %v10041_v12 = vpop.f32.mrf.mxu0 }
 0x52b   :  { %11878 = vst.msk [vmem:[#allocation14 + $0x58] sm:$0xff] %vm234_vm0, %v10486_v39  ;;  %v10485_v52 = vsub.f32 %v19202_v58, %v10041_v12  ;;  %v10126_v60 = vpop.f32.mrf.mxu1 }
 0x52c   :  { %11882 = vst.msk [vmem:[#allocation14 + $0x78] sm:$0xff] %vm234_vm0, %v10490_v1  ;;  %v10489_v44 = vsub.f32 %v19204_v55, %v10126_v60 }
 0x52d   :  { %11877 = vst.msk [vmem:[#allocation14 + $0x50] sm:$0xff] %vm234_vm0, %v10485_v52 }
 0x52e   :  { %11881 = vst.msk [vmem:[#allocation14 + $0x70] sm:$0xff] %vm234_vm0, %v10489_v44  ;;  %v15025_v2 = vpop.f32.mrf.mxu0 }
 0x52f   :  { %v10492_v36 = vsub.f32 %v19206_v22, %v15025_v2  ;;  %v15039_v5 = vpop.f32.mrf.mxu1 }
 0x530   :  { %v10496_v0 = vsub.f32 %v19208_v27, %v15039_v5  ;;  %v10201_v46 = vpop.f32.mrf.mxu0 }
 0x531   :  { %11884 = vst.msk [vmem:[#allocation14 + $0x88] sm:$0xff] %vm234_vm0, %v10492_v36  ;;  %v10491_v61 = vsub.f32 %v19210_v37, %v10201_v46  ;;  %v10286_v16 = vpop.f32.mrf.mxu1 }
 0x532   :  { %11888 = vst.msk [vmem:[#allocation14 + $0xa8] sm:$0xff] %vm234_vm0, %v10496_v0  ;;  %v10495_v23 = vsub.f32 %v19212_v4, %v10286_v16 }
 0x533   :  { %11883 = vst.msk [vmem:[#allocation14 + $0x80] sm:$0xff] %vm234_vm0, %v10491_v61 }
 0x534   :  { %11887 = vst.msk [vmem:[#allocation14 + $0xa0] sm:$0xff] %vm234_vm0, %v10495_v23  ;;  %v15028_v15 = vpop.f32.mrf.mxu0 }
 0x535   :  { %v10494_v38 = vsub.f32 %v19214_v20, %v15028_v15  ;;  %v15042_v45 = vpop.f32.mrf.mxu1 }
 0x536   :  { %v10498_v11 = vsub.f32 %v19216_v30, %v15042_v45  ;;  %v10211_v32 = vpop.f32.mrf.mxu0 }
 0x537   :  { %11886 = vst.msk [vmem:[#allocation14 + $0x98] sm:$0xff] %vm234_vm0, %v10494_v38  ;;  %v10493_v62 = vsub.f32 %v19218_v59, %v10211_v32  ;;  %v10296_v58 = vpop.f32.mrf.mxu1 }
 0x538   :  { %11890 = vst.msk [vmem:[#allocation14 + $0xb8] sm:$0xff] %vm234_vm0, %v10498_v11  ;;  %v10497_v55 = vsub.f32 %v19220_v54, %v10296_v58 }
 0x539   :  { %11885 = vst.msk [vmem:[#allocation14 + $0x90] sm:$0xff] %vm234_vm0, %v10493_v62 }
 0x53a   :  { %11889 = vst.msk [vmem:[#allocation14 + $0xb0] sm:$0xff] %vm234_vm0, %v10497_v55  ;;  %v15053_v22 = vpop.f32.mrf.mxu0 }
 0x53b   :  { %v10500_v27 = vsub.f32 %v19222_v49, %v15053_v22  ;;  %v15067_v37 = vpop.f32.mrf.mxu1 }
 0x53c   :  { %v10504_v4 = vsub.f32 %v19224_v6, %v15067_v37  ;;  %v10371_v20 = vpop.f32.mrf.mxu0 }
 0x53d   :  { %11892 = vst.msk [vmem:[#allocation14 + $0xc8] sm:$0xff] %vm234_vm0, %v10500_v27  ;;  %v10499_v30 = vsub.f32 %v19226_v14, %v10371_v20  ;;  %v10456_v59 = vpop.f32.mrf.mxu1 }
 0x53e   :  { %11896 = vst.msk [vmem:[#allocation14 + $0xe8] sm:$0xff] %vm234_vm0, %v10504_v4  ;;  %v10503_v54 = vsub.f32 %v19228_v35, %v10456_v59 }
 0x53f   :  { %11891 = vst.msk [vmem:[#allocation14 + $0xc0] sm:$0xff] %vm234_vm0, %v10499_v30 }
 0x540   :  { %11895 = vst.msk [vmem:[#allocation14 + $0xe0] sm:$0xff] %vm234_vm0, %v10503_v54  ;;  %v15056_v25 = vpop.f32.mrf.mxu0 }
 0x541   :  { %v10502_v49 = vsub.f32 %v19230_v53, %v15056_v25  ;;  %v15070_v48 = vpop.f32.mrf.mxu1 }
 0x542   :  { %v10506_v6 = vsub.f32 %v19232_v18, %v15070_v48  ;;  %v10381_v41 = vpop.f32.mrf.mxu0 }
 0x543   :  { %11894 = vst.msk [vmem:[#allocation14 + $0xd8] sm:$0xff] %vm234_vm0, %v10502_v49  ;;  %v10501_v14 = vsub.f32 %v19234_v7, %v10381_v41  ;;  %v10466_v26 = vpop.f32.mrf.mxu1 }
 0x544   :  { %11898 = vst.msk [vmem:[#allocation14 + $0xf8] sm:$0xff] %vm234_vm0, %v10506_v6  ;;  %v10505_v35 = vsub.f32 %v19236_v42, %v10466_v26 }
 0x545   :  { %11893 = vst.msk [vmem:[#allocation14 + $0xd0] sm:$0xff] %vm234_vm0, %v10501_v14 }
 0x546   :  { %11897 = vst.msk [vmem:[#allocation14 + $0xf0] sm:$0xff] %vm234_vm0, %v10505_v35  ;;  %v15081_v53 = vpop.f32.mrf.mxu0 }
 0x547   :  { %v15095_v13 = vpop.f32.mrf.mxu1 }
 0x548   :  { %15467 = shalt.err (!%p15464_p11)
}
 0x549   :  { %11942 = dma.vmem_to_hbm [thread:$0]  %s11937_s6, 4096, %s19388_s7, [#allocation4], %s15510_s10, %s15510_s10, %s15511_s11   ;;  %v10573_v18 = vpop.f32.mrf.mxu0  ;;  %v10658_v7 = vpop.f32.mrf.mxu1 }
 0x54a   :  { %s15518_s7 = smov [#allocation15]  }
 0x54b   :  { %s11948_s20 = sshll.u32 %s15518_s7, 4  ;;  %s11949_s20 = int_to_ptr.vmem [resolvable:$true] %s11948_s20 }
 0x54c   :  { %v15084_v42 = vpop.f32.mrf.mxu0  ;;  %s15476_s1 = scalar_lea.vmem %s11949_s20, 4096  ;;  %p15481_p13 = scmp.lt.s32.totalorder %s11949_s20, %s11949_s20 }
 0x54d   :  { %v15098_v17 = vpop.f32.mrf.mxu1  ;;  %p15477_p12 = scmp.ne.s32.totalorder %s11949_s20, %s15476_s1  ;;  %p15482_p0 = scmp.lt.s32.totalorder %s15476_s1, %s15476_s1 }
 0x54e   :  { %v10583_v51 = vpop.f32.mrf.mxu0 }
 0x54f   :  { %v10668_v3 = vpop.f32.mrf.mxu1  ;;  %p15483_p1 = por %p15482_p0, %p15481_p13 }
 0x551   :  { %p15484_p2 = pnand %p15483_p1, %p15477_p12 }
 0x552   :  { %v15109_v9 = vpop.f32.mrf.mxu0 }
 0x553   :  { %v15123_v21 = vpop.f32.mrf.mxu1 }
 0x554   :  { %v10743_v19 = vpop.f32.mrf.mxu0 }
 0x555   :  { %v10828_v56 = vpop.f32.mrf.mxu1 }
 0x558   :  { %v15112_v33 = vpop.f32.mrf.mxu0 }
 0x559   :  { %v15126_v40 = vpop.f32.mrf.mxu1 }
 0x55a   :  { %v10753_v50 = vpop.f32.mrf.mxu0 }
 0x55b   :  { %v10838_v10 = vpop.f32.mrf.mxu1 }
 0x55e   :  { %v19295_v43 = vpop.f32.mrf.mxu0 }
 0x55f   :  { %v19297_v57 = vpop.f32.mrf.mxu1 }
 0x560   :  { %v19299_v31 = vpop.f32.mrf.mxu0 }
 0x561   :  { %v19301_v24 = vpop.f32.mrf.mxu1 }
 0x564   :  { %v19303_v29 = vpop.f32.mrf.mxu0 }
 0x565   :  { %v19305_v28 = vpop.f32.mrf.mxu1 }
 0x566   :  { %v19307_v47 = vpop.f32.mrf.mxu0 }
 0x567   :  { %v19309_v34 = vpop.f32.mrf.mxu1 }
 0x56a   :  { %v19311_v63 = vpop.f32.mrf.mxu0 }
 0x56b   :  { %v19313_v39 = vpop.f32.mrf.mxu1 }
 0x56c   :  { %v19315_v8 = vpop.f32.mrf.mxu0 }
 0x56d   :  { %v19317_v1 = vpop.f32.mrf.mxu1 }
 0x570   :  { %v19319_v12 = vpop.f32.mrf.mxu0 }
 0x571   :  { %v19321_v52 = vpop.f32.mrf.mxu1 }
 0x572   :  { %v19323_v60 = vpop.f32.mrf.mxu0 }
 0x573   :  { %v19325_v44 = vpop.f32.mrf.mxu1 }
 0x576   :  { %v15193_v2 = vpop.f32.mrf.mxu0 }
 0x577   :  { %v11259_v36 = vadd.f32 %v15193_v2, %v15081_v53  ;;  %v15207_v5 = vpop.f32.mrf.mxu1 }
 0x578   :  { %v11344_v0 = vadd.f32 %v15207_v5, %v15095_v13  ;;  %v11253_v46 = vpop.f32.mrf.mxu0 }
 0x579   :  { %11900 = vst.msk [vmem:[#allocation15 + $0x8] sm:$0xff] %vm234_vm0, %v11259_v36  ;;  %v11254_v61 = vadd.f32 %v11253_v46, %v10573_v18  ;;  %v11338_v16 = vpop.f32.mrf.mxu1 }
 0x57a   :  { %11904 = vst.msk [vmem:[#allocation15 + $0x28] sm:$0xff] %vm234_vm0, %v11344_v0  ;;  %v11339_v23 = vadd.f32 %v11338_v16, %v10658_v7 }
 0x57b   :  { %11899 = vst.msk [vmem:[#allocation15] sm:$0xff] %vm234_vm0, %v11254_v61 }
 0x57c   :  { %11903 = vst.msk [vmem:[#allocation15 + $0x20] sm:$0xff] %vm234_vm0, %v11339_v23  ;;  %v15196_v15 = vpop.f32.mrf.mxu0 }
 0x57d   :  { %v11269_v38 = vadd.f32 %v15196_v15, %v15084_v42  ;;  %v15210_v45 = vpop.f32.mrf.mxu1 }
 0x57e   :  { %v11354_v11 = vadd.f32 %v15210_v45, %v15098_v17  ;;  %v11263_v32 = vpop.f32.mrf.mxu0 }
 0x57f   :  { %11902 = vst.msk [vmem:[#allocation15 + $0x18] sm:$0xff] %vm234_vm0, %v11269_v38  ;;  %v11264_v62 = vadd.f32 %v11263_v32, %v10583_v51  ;;  %v11348_v58 = vpop.f32.mrf.mxu1 }
 0x580   :  { %11906 = vst.msk [vmem:[#allocation15 + $0x38] sm:$0xff] %vm234_vm0, %v11354_v11  ;;  %v11349_v55 = vadd.f32 %v11348_v58, %v10668_v3 }
 0x581   :  { %11901 = vst.msk [vmem:[#allocation15 + $0x10] sm:$0xff] %vm234_vm0, %v11264_v62 }
 0x582   :  { %11905 = vst.msk [vmem:[#allocation15 + $0x30] sm:$0xff] %vm234_vm0, %v11349_v55  ;;  %v15221_v22 = vpop.f32.mrf.mxu0 }
 0x583   :  { %v11429_v27 = vadd.f32 %v15221_v22, %v15109_v9  ;;  %v15235_v37 = vpop.f32.mrf.mxu1 }
 0x584   :  { %v11514_v4 = vadd.f32 %v15235_v37, %v15123_v21  ;;  %v11423_v20 = vpop.f32.mrf.mxu0 }
 0x585   :  { %11908 = vst.msk [vmem:[#allocation15 + $0x48] sm:$0xff] %vm234_vm0, %v11429_v27  ;;  %v11424_v30 = vadd.f32 %v11423_v20, %v10743_v19  ;;  %v11508_v59 = vpop.f32.mrf.mxu1 }
 0x586   :  { %11912 = vst.msk [vmem:[#allocation15 + $0x68] sm:$0xff] %vm234_vm0, %v11514_v4  ;;  %v11509_v54 = vadd.f32 %v11508_v59, %v10828_v56 }
 0x587   :  { %11907 = vst.msk [vmem:[#allocation15 + $0x40] sm:$0xff] %vm234_vm0, %v11424_v30 }
 0x588   :  { %11911 = vst.msk [vmem:[#allocation15 + $0x60] sm:$0xff] %vm234_vm0, %v11509_v54  ;;  %v15224_v25 = vpop.f32.mrf.mxu0 }
 0x589   :  { %v11439_v49 = vadd.f32 %v15224_v25, %v15112_v33  ;;  %v15238_v48 = vpop.f32.mrf.mxu1 }
 0x58a   :  { %v11524_v6 = vadd.f32 %v15238_v48, %v15126_v40  ;;  %v11433_v41 = vpop.f32.mrf.mxu0 }
 0x58b   :  { %11910 = vst.msk [vmem:[#allocation15 + $0x58] sm:$0xff] %vm234_vm0, %v11439_v49  ;;  %v11434_v14 = vadd.f32 %v11433_v41, %v10753_v50  ;;  %v11518_v26 = vpop.f32.mrf.mxu1 }
 0x58c   :  { %11914 = vst.msk [vmem:[#allocation15 + $0x78] sm:$0xff] %vm234_vm0, %v11524_v6  ;;  %v11519_v35 = vadd.f32 %v11518_v26, %v10838_v10 }
 0x58d   :  { %11909 = vst.msk [vmem:[#allocation15 + $0x50] sm:$0xff] %vm234_vm0, %v11434_v14 }
 0x58e   :  { %11913 = vst.msk [vmem:[#allocation15 + $0x70] sm:$0xff] %vm234_vm0, %v11519_v35  ;;  %v15249_v53 = vpop.f32.mrf.mxu0 }
 0x58f   :  { %v11599_v13 = vadd.f32 %v15249_v53, %v19295_v43  ;;  %v15263_v18 = vpop.f32.mrf.mxu1 }
 0x590   :  { %v11684_v7 = vadd.f32 %v15263_v18, %v19297_v57  ;;  %v11593_v42 = vpop.f32.mrf.mxu0 }
 0x591   :  { %11916 = vst.msk [vmem:[#allocation15 + $0x88] sm:$0xff] %vm234_vm0, %v11599_v13  ;;  %v11594_v17 = vadd.f32 %v11593_v42, %v19299_v31  ;;  %v11678_v51 = vpop.f32.mrf.mxu1 }
 0x592   :  { %11920 = vst.msk [vmem:[#allocation15 + $0xa8] sm:$0xff] %vm234_vm0, %v11684_v7  ;;  %v11679_v3 = vadd.f32 %v11678_v51, %v19301_v24 }
 0x593   :  { %11915 = vst.msk [vmem:[#allocation15 + $0x80] sm:$0xff] %vm234_vm0, %v11594_v17 }
 0x594   :  { %11919 = vst.msk [vmem:[#allocation15 + $0xa0] sm:$0xff] %vm234_vm0, %v11679_v3  ;;  %v15252_v9 = vpop.f32.mrf.mxu0 }
 0x595   :  { %v11609_v21 = vadd.f32 %v15252_v9, %v19303_v29  ;;  %v15266_v19 = vpop.f32.mrf.mxu1 }
 0x596   :  { %v11694_v56 = vadd.f32 %v15266_v19, %v19305_v28  ;;  %v11603_v33 = vpop.f32.mrf.mxu0 }
 0x597   :  { %11918 = vst.msk [vmem:[#allocation15 + $0x98] sm:$0xff] %vm234_vm0, %v11609_v21  ;;  %v11604_v40 = vadd.f32 %v11603_v33, %v19307_v47  ;;  %v11688_v50 = vpop.f32.mrf.mxu1 }
 0x598   :  { %11922 = vst.msk [vmem:[#allocation15 + $0xb8] sm:$0xff] %vm234_vm0, %v11694_v56  ;;  %v11689_v10 = vadd.f32 %v11688_v50, %v19309_v34 }
 0x599   :  { %11917 = vst.msk [vmem:[#allocation15 + $0x90] sm:$0xff] %vm234_vm0, %v11604_v40 }
 0x59a   :  { %11921 = vst.msk [vmem:[#allocation15 + $0xb0] sm:$0xff] %vm234_vm0, %v11689_v10  ;;  %v15277_v43 = vpop.f32.mrf.mxu0 }
 0x59b   :  { %v11769_v57 = vadd.f32 %v15277_v43, %v19311_v63  ;;  %v15291_v31 = vpop.f32.mrf.mxu1 }
 0x59c   :  { %v11854_v24 = vadd.f32 %v15291_v31, %v19313_v39  ;;  %v11763_v29 = vpop.f32.mrf.mxu0 }
 0x59d   :  { %11924 = vst.msk [vmem:[#allocation15 + $0xc8] sm:$0xff] %vm234_vm0, %v11769_v57  ;;  %v11764_v28 = vadd.f32 %v11763_v29, %v19315_v8  ;;  %v11848_v47 = vpop.f32.mrf.mxu1 }
 0x59e   :  { %11928 = vst.msk [vmem:[#allocation15 + $0xe8] sm:$0xff] %vm234_vm0, %v11854_v24  ;;  %v11849_v34 = vadd.f32 %v11848_v47, %v19317_v1  ;;  %v15280_v2 = vpop.f32.mrf.mxu0 }
 0x59f   :  { %11923 = vst.msk [vmem:[#allocation15 + $0xc0] sm:$0xff] %vm234_vm0, %v11764_v28  ;;  %v11779_v36 = vadd.f32 %v15280_v2, %v19319_v12  ;;  %v15294_v5 = vpop.f32.mrf.mxu1 }
 0x5a0   :  { %11927 = vst.msk [vmem:[#allocation15 + $0xe0] sm:$0xff] %vm234_vm0, %v11849_v34  ;;  %v11864_v63 = vadd.f32 %v15294_v5, %v19321_v52  ;;  %v11773_v39 = vpop.f32.mrf.mxu0 }
 0x5a1   :  { %11926 = vst.msk [vmem:[#allocation15 + $0xd8] sm:$0xff] %vm234_vm0, %v11779_v36  ;;  %v11774_v8 = vadd.f32 %v11773_v39, %v19323_v60  ;;  %v11858_v0 = vpop.f32.mrf.mxu1 }
 0x5a2   :  { %11930 = vst.msk [vmem:[#allocation15 + $0xf8] sm:$0xff] %vm234_vm0, %v11864_v63  ;;  %v11859_v1 = vadd.f32 %v11858_v0, %v19325_v44 }
 0x5a3   :  { %11925 = vst.msk [vmem:[#allocation15 + $0xd0] sm:$0xff] %vm234_vm0, %v11774_v8 }
 0x5a4   :  { %11929 = vst.msk [vmem:[#allocation15 + $0xf0] sm:$0xff] %vm234_vm0, %v11859_v1 }
 0x5a5   :  { %15487 = shalt.err (!%p15484_p2)
}
 0x5a6   :  { %11954 = dma.vmem_to_hbm [thread:$0]  %s11949_s20, 4096, %s19389_s8, [#allocation16], %s15510_s10, %s15510_s10, %s15511_s11  }
 0x5a7   :  { %15504 = dma.done.wait [#allocation4], 4096  }
 0x5a8   :  { %15505 = vsyncadd [#allocation4], 4294963200 }
 0x5a9   :  { %15506 = dma.done.wait [#allocation16], 4096  }
 0x5aa   :  { %15507 = vsyncadd [#allocation16], 4294963200 }
 0x5ab   :  { %11961 = vsyncpa [#allocation3], 1 }
 0x5ac   :  { %11962 = vsyncpa [#allocation6], 1 }
 0x5ad   :  { %11963 = vsyncpa [#allocation9], 1 }
 0x5ae   :  { %11964 = vsyncpa [#allocation12], 1 }
 0x5af   :  { %11965 = vsyncpa [#allocation4], 1 }
 0x5b0   :  { %11966 = vsyncpa [#allocation16], 1 }

</bundles_post_ra>
